<compile_context>
chip_gen: v7x
topology: tpu7x:2x2x1
jax: 0.10.0
libtpu: 0.0.40
codegen_flags: <defaults>
</compile_context>

<pallas_src>
import numpy as np

import jax
import jax.numpy as jnp
from jax import lax
from jax.experimental import pallas as pl
from jax.experimental.pallas import tpu as pltpu


# ----------------------------- fused Pallas kernel ---------------------------

def _binnet_fused_kernel(
    x_ref,                                             # (B*H, W*Cin)
    a1_ref, t1_ref, a2_ref, t2_ref, a3_ref, t3_ref,    # conv tap matrices
    p1_ref, p1t_ref, g1_ref, be1_ref,                  # BN1 pool + affine
    p2_ref, p2t_ref, g2_ref, be2_ref,                  # BN2
    p3_ref, p3t_ref, g3_ref, be3_ref,                  # BN3
    gf_ref, fw1_ref, fb1_ref,                          # fc head (conv_final folded)
    fw2_ref, fb2_ref, fw3_ref, fb3_ref,
    out_ref,                                           # (B, out_dim*n_rot)
):
    f32 = jnp.float32

    def conv(x, a_ref, t_ref):
        """Y[(b,ho),(wo,co)] = sum_i (A_i @ X) @ T_i  (per-kernel-row taps)."""
        acc = None
        for i in range(a_ref.shape[0]):
            t = jnp.dot(jnp.dot(a_ref[i], x, preferred_element_type=f32),
                        t_ref[i], preferred_element_type=f32)
            acc = t if acc is None else acc + t
        return acc

    def bn_relu(y, p_ref, pt_ref, g_ref, be_ref):
        """Training-mode BN (batch stats, biased var) + ReLU on (rows, Wo*C)."""
        c = g_ref.shape[-1]
        count = y.shape[0] * (y.shape[1] // c)         # B*Ho*Wo samples / channel
        inv_n = 1.0 / float(count)
        p = p_ref[...]
        s1 = jnp.dot(jnp.sum(y, axis=0, keepdims=True), p,
                     preferred_element_type=f32)       # (1, C) sum
        s2 = jnp.dot(jnp.sum(y * y, axis=0, keepdims=True), p,
                     preferred_element_type=f32)       # (1, C) sum of squares
        mean = s1 * inv_n
        var = jnp.maximum(s2 * inv_n - mean * mean, 0.0)   # clamp fp cancellation
        scale = g_ref[...] * lax.rsqrt(var + 1e-5)
        shift = be_ref[...] - mean * scale
        pt = pt_ref[...]
        scale_l = jnp.dot(scale, pt, preferred_element_type=f32)  # (1, Wo*C)
        shift_l = jnp.dot(shift, pt, preferred_element_type=f32)
        return jnp.maximum(y * scale_l + shift_l, 0.0)

    x = x_ref[...]
    h = bn_relu(conv(x, a1_ref, t1_ref), p1_ref, p1t_ref, g1_ref, be1_ref)
    h = bn_relu(conv(h, a2_ref, t2_ref), p2_ref, p2t_ref, g2_ref, be2_ref)
    h = bn_relu(conv(h, a3_ref, t3_ref), p3_ref, p3t_ref, g3_ref, be3_ref)

    # conv_final (1x1, OC=1, +bias) is folded into fc1; gather spatial rows ho.
    acc = None
    for ho in range(gf_ref.shape[0]):
        t = jnp.dot(jnp.dot(gf_ref[ho], h, preferred_element_type=f32),
                    fw1_ref[ho], preferred_element_type=f32)
        acc = t if acc is None else acc + t
    h = jnp.maximum(acc + fb1_ref[...], 0.0)
    h = jnp.maximum(jnp.dot(h, fw2_ref[...], preferred_element_type=f32)
                    + fb2_ref[...], 0.0)
    # The PyTorch Sequential ends with nn.ReLU(), so the last layer is ReLU'd.
    out_ref[...] = jnp.maximum(
        jnp.dot(h, fw3_ref[...], preferred_element_type=f32) + fb3_ref[...], 0.0)


# ------------------------ one-time parameter preprocessing -------------------

def _conv_tap_mats(w, B, Hin, Win, stride, pad):
    """w: (OC, IC, kh, kw) torch layout.

    Returns A (kh, B*Ho, B*Hin) row-gather mats and T (kh, Win*IC, Wo*OC)
    width/channel tap-weight mats so that Y = sum_i (A_i @ X) @ T_i equals the
    zero-padded strided conv (without bias) in (B*H, W*C) layout.
    """
    w = np.asarray(w, np.float32)
    OC, IC, kh, kw = w.shape
    Ho = (Hin + 2 * pad - kh) // stride + 1
    Wo = (Win + 2 * pad - kw) // stride + 1
    A = np.zeros((kh, B * Ho, B * Hin), np.float32)
    T = np.zeros((kh, Win * IC, Wo * OC), np.float32)
    for i in range(kh):
        for b in range(B):
            for ho in range(Ho):
                h = stride * ho + i - pad
                if 0 <= h < Hin:
                    A[i, b * Ho + ho, b * Hin + h] = 1.0
        for wo in range(Wo):
            for j in range(kw):
                wc = stride * wo + j - pad
                if 0 <= wc < Win:
                    T[i, wc * IC:(wc + 1) * IC, wo * OC:(wo + 1) * OC] = \
                        w[:, :, i, j].T
    return A, T, Ho, Wo


def _bn_pool_mats(Wo, C):
    """P (Wo*C, C): sums (wo, c) lanes per channel; Pt broadcasts back."""
    P = np.zeros((Wo * C, C), np.float32)
    for wcol in range(Wo):
        P[wcol * C:(wcol + 1) * C, :] = np.eye(C, dtype=np.float32)
    return P, np.ascontiguousarray(P.T)


def _fc_gather_mat(B, Ho):
    """G (Ho, B, B*Ho): G[ho] @ Y3 picks row (b, ho) for every batch b."""
    G = np.zeros((Ho, B, B * Ho), np.float32)
    for ho in range(Ho):
        for b in range(B):
            G[ho, b, b * Ho + ho] = 1.0
    return G


def _fold_convf_into_fc1(convf_w, convf_b, fc1_w, fc1_b, Ho, Wo, C):
    """Fold the 1x1 conv_final (OC=1, +bias) into fc1 (exact; no nonlinearity
    sits between them in the PyTorch module)."""
    cw = np.asarray(convf_w, np.float32).reshape(-1)            # (C,)
    fw = np.asarray(fc1_w, np.float32)                          # (Ho*Wo, O)
    fb = np.asarray(fc1_b, np.float32)
    bf = float(np.asarray(convf_b, np.float32).reshape(-1)[0])
    S, O = fw.shape
    wfold = (fw[:, None, :] * cw[None, :, None]).reshape(S * C, O)
    bfold = bf * fw.sum(axis=0) + fb
    return wfold.reshape(Ho, Wo * C, O), bfold.reshape(1, O)


def prepare_params(params, B, H, W, in_channels):
    """Build every derived constant ONCE (hoisted out of the jitted forward)."""
    assert params["conv1_w"].shape[1] == in_channels + 2
    n1 = params["conv1_w"].shape[0]
    n2 = params["conv2_w"].shape[0]
    n3 = params["conv3_w"].shape[0]

    # NOTE: conv1_b / conv2_b / conv3_b are intentionally unused — a per-channel
    # bias immediately followed by training-mode BatchNorm is a no-op.
    a1, t1, H1, W1 = _conv_tap_mats(params["conv1_w"], B, H, W, 1, 1)
    a2, t2, H2, W2 = _conv_tap_mats(params["conv2_w"], B, H1, W1, 2, 1)
    a3, t3, H3, W3 = _conv_tap_mats(params["conv3_w"], B, H2, W2, 2, 1)
    p1, p1t = _bn_pool_mats(W1, n1)
    p2, p2t = _bn_pool_mats(W2, n2)
    p3, p3t = _bn_pool_mats(W3, n3)

    assert params["fc1_w"].shape[0] == H3 * W3, "fc1 expects a 4x4 conv3 output"
    gf = _fc_gather_mat(B, H3)
    fw1, fb1 = _fold_convf_into_fc1(params["convf_w"], params["convf_b"],
                                    params["fc1_w"], params["fc1_b"], H3, W3, n3)

    def dev(x):
        return jnp.asarray(x, jnp.float32)

    return {
        "a1": dev(a1), "t1": dev(t1), "a2": dev(a2), "t2": dev(t2),
        "a3": dev(a3), "t3": dev(t3),
        "p1": dev(p1), "p1t": dev(p1t),
        "g1": dev(params["bn1_g"]).reshape(1, -1),
        "be1": dev(params["bn1_b"]).reshape(1, -1),
        "p2": dev(p2), "p2t": dev(p2t),
        "g2": dev(params["bn2_g"]).reshape(1, -1),
        "be2": dev(params["bn2_b"]).reshape(1, -1),
        "p3": dev(p3), "p3t": dev(p3t),
        "g3": dev(params["bn3_g"]).reshape(1, -1),
        "be3": dev(params["bn3_b"]).reshape(1, -1),
        "gf": dev(gf), "fw1": dev(fw1), "fb1": dev(fb1),
        "fw2": dev(params["fc2_w"]),
        "fb2": dev(params["fc2_b"]).reshape(1, -1),
        "fw3": dev(params["fc3_w"]),
        "fb3": dev(params["fc3_b"]).reshape(1, -1),
    }


# ------------------------------ BinNet forward --------------------------------

def _full_spec(arr):
    return pl.BlockSpec(arr.shape, lambda i, _n=arr.ndim: (0,) * _n)


def binnet_forward(prep, x, block, n_rotations):
    B, C, H, W = x.shape
    nb = block.shape[1]

    # NCHW -> lane-dense (B*H, W*(C+2)) once at the model boundary; the block
    # channels (ceil(block*H)/H, constant over H,W) are appended here, exactly
    # like torch.cat([x, x_block], dim=1) in channel-last order.
    x_nhwc = jnp.transpose(x, (0, 2, 3, 1))
    xb = jnp.ceil(block * H) / H                                  # (B, nb)
    xb = jnp.broadcast_to(xb[:, None, None, :], (B, H, W, nb)).astype(x.dtype)
    xcat = jnp.concatenate([x_nhwc, xb], axis=-1)
    xcat = xcat.reshape(B * H, W * (C + nb)).astype(jnp.float32)

    operands = (
        xcat,
        prep["a1"], prep["t1"], prep["a2"], prep["t2"], prep["a3"], prep["t3"],
        prep["p1"], prep["p1t"], prep["g1"], prep["be1"],
        prep["p2"], prep["p2t"], prep["g2"], prep["be2"],
        prep["p3"], prep["p3t"], prep["g3"], prep["be3"],
        prep["gf"], prep["fw1"], prep["fb1"],
        prep["fw2"], prep["fb2"], prep["fw3"], prep["fb3"],
    )
    out_n = prep["fw3"].shape[1]

    out = pl.pallas_call(
        _binnet_fused_kernel,
        out_shape=jax.ShapeDtypeStruct((B, out_n), jnp.float32),
        grid=(1,),   # single program: batch-stat BN needs the whole batch;
                     # extra grid steps are pure overhead on single-TC chips.
        in_specs=[_full_spec(a) for a in operands],
        out_specs=pl.BlockSpec((B, out_n), lambda i: (0, 0)),
        compiler_params=pltpu.CompilerParams(
            dimension_semantics=("arbitrary",),
            vmem_limit_bytes=32 * 1024 * 1024),      # valid on v5e/v6e/v7x
    )(*operands)

    return out.reshape(B, n_rotations, H, W)


# ------------------------------ BinNet params ---------------------------------

def init_params(key, in_channels, out_dim, n_rotations, n_hidden=(16, 32, 64)):
    c_in = in_channels + 2  # use_coordnconv=False => +2 channels from `block`
    ks = jax.random.split(key, 20)

    def winit(k, shape, fan_in):
        return (jax.random.normal(k, shape, jnp.float32)
                / jnp.sqrt(fan_in)).astype(jnp.float32)

    p = {}
    p["conv1_w"] = winit(ks[0], (n_hidden[0], c_in, 3, 3), c_in * 9)
    p["conv1_b"] = winit(ks[1], (n_hidden[0],), c_in * 9)      # inert under BN
    p["bn1_g"] = jnp.ones((n_hidden[0],), jnp.float32)
    p["bn1_b"] = jnp.zeros((n_hidden[0],), jnp.float32)

    p["conv2_w"] = winit(ks[2], (n_hidden[1], n_hidden[0], 2, 2), n_hidden[0] * 4)
    p["conv2_b"] = winit(ks[3], (n_hidden[1],), n_hidden[0] * 4)  # inert under BN
    p["bn2_g"] = jnp.ones((n_hidden[1],), jnp.float32)
    p["bn2_b"] = jnp.zeros((n_hidden[1],), jnp.float32)

    p["conv3_w"] = winit(ks[4], (n_hidden[2], n_hidden[1], 2, 2), n_hidden[1] * 4)
    p["conv3_b"] = winit(ks[5], (n_hidden[2],), n_hidden[1] * 4)  # inert under BN
    p["bn3_g"] = jnp.ones((n_hidden[2],), jnp.float32)
    p["bn3_b"] = jnp.zeros((n_hidden[2],), jnp.float32)

    p["convf_w"] = winit(ks[6], (1, n_hidden[2], 1, 1), n_hidden[2])
    p["convf_b"] = winit(ks[7], (1,), n_hidden[2])

    # upscore MLP: 16 -> 256 -> 256 -> out_dim*n_rotations (stored as (in,out))
    p["fc1_w"] = winit(ks[8], (16, 256), 16)
    p["fc1_b"] = winit(ks[9], (256,), 16)
    p["fc2_w"] = winit(ks[10], (256, 256), 256)
    p["fc2_b"] = winit(ks[11], (256,), 256)
    p["fc3_w"] = winit(ks[12], (256, out_dim * n_rotations), 256)
    p["fc3_b"] = winit(ks[13], (out_dim * n_rotations,), 256)
    return p


# ----------------------------------- main --------------------------------------

if __name__ == "__main__":
    # Shapes: the final conv output must be 4x4 (Linear(16, 256)), so H=W=12:
    #   12 --(k3,s1,p1)--> 12 --(k2,s2,p1)--> 7 --(k2,s2,p1)--> 4
    B, C_IN, H, W = 2, 4, 12, 12
    N_ROT = 2
    OUT_DIM = H * W  # view(-1, n_rotations, H, W) implies out_dim == H*W

    key = jax.random.PRNGKey(0)
    kx, kb, kp = jax.random.split(key, 3)
    x = jax.random.normal(kx, (B, C_IN, H, W), jnp.float32)
    block = jax.random.uniform(kb, (B, 2), jnp.float32)

    params = init_params(kp, C_IN, OUT_DIM, N_ROT)
    prep = prepare_params(params, B, H, W, C_IN)   # one-time preprocessing

    fwd = jax.jit(binnet_forward, static_argnums=(3,))
    out = jax.block_until_ready(fwd(prep, x, block, N_ROT))

    assert out.shape == (B, N_ROT, H, W), out.shape
    assert bool(jnp.all(jnp.isfinite(out)))
    print("KERNEL_OK")
</pallas_src>

<mosaic_0001>
module attributes {stable_mosaic.version = 11 : i64} {
  func.func @_binnet_fused_kernel(%arg0: i32, %arg1: memref<24x72xf32, #tpu.memory_space<vmem>>, %arg2: memref<3x24x24xf32, #tpu.memory_space<vmem>>, %arg3: memref<3x72x192xf32, #tpu.memory_space<vmem>>, %arg4: memref<2x14x24xf32, #tpu.memory_space<vmem>>, %arg5: memref<2x192x224xf32, #tpu.memory_space<vmem>>, %arg6: memref<2x8x14xf32, #tpu.memory_space<vmem>>, %arg7: memref<2x224x256xf32, #tpu.memory_space<vmem>>, %arg8: memref<192x16xf32, #tpu.memory_space<vmem>>, %arg9: memref<16x192xf32, #tpu.memory_space<vmem>>, %arg10: memref<1x16xf32, #tpu.memory_space<vmem>>, %arg11: memref<1x16xf32, #tpu.memory_space<vmem>>, %arg12: memref<224x32xf32, #tpu.memory_space<vmem>>, %arg13: memref<32x224xf32, #tpu.memory_space<vmem>>, %arg14: memref<1x32xf32, #tpu.memory_space<vmem>>, %arg15: memref<1x32xf32, #tpu.memory_space<vmem>>, %arg16: memref<256x64xf32, #tpu.memory_space<vmem>>, %arg17: memref<64x256xf32, #tpu.memory_space<vmem>>, %arg18: memref<1x64xf32, #tpu.memory_space<vmem>>, %arg19: memref<1x64xf32, #tpu.memory_space<vmem>>, %arg20: memref<4x2x8xf32, #tpu.memory_space<vmem>>, %arg21: memref<4x256x256xf32, #tpu.memory_space<vmem>>, %arg22: memref<1x256xf32, #tpu.memory_space<vmem>>, %arg23: memref<256x256xf32, #tpu.memory_space<vmem>>, %arg24: memref<1x256xf32, #tpu.memory_space<vmem>>, %arg25: memref<256x288xf32, #tpu.memory_space<vmem>>, %arg26: memref<1x288xf32, #tpu.memory_space<vmem>>, %arg27: memref<2x288xf32, #tpu.memory_space<vmem>>) attributes {dimension_semantics = [#tpu.dimension_semantics<arbitrary>], iteration_bounds = array<i64: 1>, scalar_prefetch = 0 : i64, scratch_operands = 0 : i64, tpu.core_type = #tpu.core_type<tc>, window_params = [{pipeline_mode = #tpu.pipeline_mode<synchronous>, transform_indices = @transform_0, window_bounds = array<i64: 24, 72>}, {pipeline_mode = #tpu.pipeline_mode<synchronous>, transform_indices = @transform_1, window_bounds = array<i64: 3, 24, 24>}, {pipeline_mode = #tpu.pipeline_mode<synchronous>, transform_indices = @transform_2, window_bounds = array<i64: 3, 72, 192>}, {pipeline_mode = #tpu.pipeline_mode<synchronous>, transform_indices = @transform_3, window_bounds = array<i64: 2, 14, 24>}, {pipeline_mode = #tpu.pipeline_mode<synchronous>, transform_indices = @transform_4, window_bounds = array<i64: 2, 192, 224>}, {pipeline_mode = #tpu.pipeline_mode<synchronous>, transform_indices = @transform_5, window_bounds = array<i64: 2, 8, 14>}, {pipeline_mode = #tpu.pipeline_mode<synchronous>, transform_indices = @transform_6, window_bounds = array<i64: 2, 224, 256>}, {pipeline_mode = #tpu.pipeline_mode<synchronous>, transform_indices = @transform_7, window_bounds = array<i64: 192, 16>}, {pipeline_mode = #tpu.pipeline_mode<synchronous>, transform_indices = @transform_8, window_bounds = array<i64: 16, 192>}, {pipeline_mode = #tpu.pipeline_mode<synchronous>, transform_indices = @transform_9, window_bounds = array<i64: 1, 16>}, {pipeline_mode = #tpu.pipeline_mode<synchronous>, transform_indices = @transform_10, window_bounds = array<i64: 1, 16>}, {pipeline_mode = #tpu.pipeline_mode<synchronous>, transform_indices = @transform_11, window_bounds = array<i64: 224, 32>}, {pipeline_mode = #tpu.pipeline_mode<synchronous>, transform_indices = @transform_12, window_bounds = array<i64: 32, 224>}, {pipeline_mode = #tpu.pipeline_mode<synchronous>, transform_indices = @transform_13, window_bounds = array<i64: 1, 32>}, {pipeline_mode = #tpu.pipeline_mode<synchronous>, transform_indices = @transform_14, window_bounds = array<i64: 1, 32>}, {pipeline_mode = #tpu.pipeline_mode<synchronous>, transform_indices = @transform_15, window_bounds = array<i64: 256, 64>}, {pipeline_mode = #tpu.pipeline_mode<synchronous>, transform_indices = @transform_16, window_bounds = array<i64: 64, 256>}, {pipeline_mode = #tpu.pipeline_mode<synchronous>, transform_indices = @transform_17, window_bounds = array<i64: 1, 64>}, {pipeline_mode = #tpu.pipeline_mode<synchronous>, transform_indices = @transform_18, window_bounds = array<i64: 1, 64>}, {pipeline_mode = #tpu.pipeline_mode<synchronous>, transform_indices = @transform_19, window_bounds = array<i64: 4, 2, 8>}, {pipeline_mode = #tpu.pipeline_mode<synchronous>, transform_indices = @transform_20, window_bounds = array<i64: 4, 256, 256>}, {pipeline_mode = #tpu.pipeline_mode<synchronous>, transform_indices = @transform_21, window_bounds = array<i64: 1, 256>}, {pipeline_mode = #tpu.pipeline_mode<synchronous>, transform_indices = @transform_22, window_bounds = array<i64: 256, 256>}, {pipeline_mode = #tpu.pipeline_mode<synchronous>, transform_indices = @transform_23, window_bounds = array<i64: 1, 256>}, {pipeline_mode = #tpu.pipeline_mode<synchronous>, transform_indices = @transform_24, window_bounds = array<i64: 256, 288>}, {pipeline_mode = #tpu.pipeline_mode<synchronous>, transform_indices = @transform_25, window_bounds = array<i64: 1, 288>}, {pipeline_mode = #tpu.pipeline_mode<synchronous>, transform_indices = @transform_26, window_bounds = array<i64: 2, 288>}]} {
    %c0 = arith.constant 0 : index
    %c0_0 = arith.constant 0 : index
    %0 = vector.load %arg1[%c0, %c0_0] : memref<24x72xf32, #tpu.memory_space<vmem>>, vector<24x72xf32>
    %c0_1 = arith.constant 0 : index
    %c0_2 = arith.constant 0 : index
    %c0_3 = arith.constant 0 : index
    %1 = vector.load %arg2[%c0_1, %c0_2, %c0_3] : memref<3x24x24xf32, #tpu.memory_space<vmem>>, vector<1x24x24xf32>
    %2 = vector.shape_cast %1 : vector<1x24x24xf32> to vector<24x24xf32>
    %cst = arith.constant dense<0.000000e+00> : vector<24x72xf32>
    %3 = tpu.matmul %2, %0, %cst {dimension_numbers = #tpu.dot_dimension_numbers<[1], [0], [0], [1], [0, 0, 1, 1], [], []>} : vector<24x24xf32>, vector<24x72xf32>, vector<24x72xf32> -> vector<24x72xf32>
    %c0_4 = arith.constant 0 : index
    %c0_5 = arith.constant 0 : index
    %c0_6 = arith.constant 0 : index
    %4 = vector.load %arg3[%c0_4, %c0_5, %c0_6] : memref<3x72x192xf32, #tpu.memory_space<vmem>>, vector<1x72x192xf32>
    %5 = vector.shape_cast %4 : vector<1x72x192xf32> to vector<72x192xf32>
    %cst_7 = arith.constant dense<0.000000e+00> : vector<24x192xf32>
    %6 = tpu.matmul %3, %5, %cst_7 {dimension_numbers = #tpu.dot_dimension_numbers<[1], [0], [0], [1], [0, 0, 1, 1], [], []>} : vector<24x72xf32>, vector<72x192xf32>, vector<24x192xf32> -> vector<24x192xf32>
    %c1 = arith.constant 1 : index
    %c0_8 = arith.constant 0 : index
    %c0_9 = arith.constant 0 : index
    %7 = vector.load %arg2[%c1, %c0_8, %c0_9] : memref<3x24x24xf32, #tpu.memory_space<vmem>>, vector<1x24x24xf32>
    %8 = vector.shape_cast %7 : vector<1x24x24xf32> to vector<24x24xf32>
    %cst_10 = arith.constant dense<0.000000e+00> : vector<24x72xf32>
    %9 = tpu.matmul %8, %0, %cst_10 {dimension_numbers = #tpu.dot_dimension_numbers<[1], [0], [0], [1], [0, 0, 1, 1], [], []>} : vector<24x24xf32>, vector<24x72xf32>, vector<24x72xf32> -> vector<24x72xf32>
    %c1_11 = arith.constant 1 : index
    %c0_12 = arith.constant 0 : index
    %c0_13 = arith.constant 0 : index
    %10 = vector.load %arg3[%c1_11, %c0_12, %c0_13] : memref<3x72x192xf32, #tpu.memory_space<vmem>>, vector<1x72x192xf32>
    %11 = vector.shape_cast %10 : vector<1x72x192xf32> to vector<72x192xf32>
    %cst_14 = arith.constant dense<0.000000e+00> : vector<24x192xf32>
    %12 = tpu.matmul %9, %11, %cst_14 {dimension_numbers = #tpu.dot_dimension_numbers<[1], [0], [0], [1], [0, 0, 1, 1], [], []>} : vector<24x72xf32>, vector<72x192xf32>, vector<24x192xf32> -> vector<24x192xf32>
    %13 = arith.addf %6, %12 : vector<24x192xf32>
    %c2 = arith.constant 2 : index
    %c0_15 = arith.constant 0 : index
    %c0_16 = arith.constant 0 : index
    %14 = vector.load %arg2[%c2, %c0_15, %c0_16] : memref<3x24x24xf32, #tpu.memory_space<vmem>>, vector<1x24x24xf32>
    %15 = vector.shape_cast %14 : vector<1x24x24xf32> to vector<24x24xf32>
    %cst_17 = arith.constant dense<0.000000e+00> : vector<24x72xf32>
    %16 = tpu.matmul %15, %0, %cst_17 {dimension_numbers = #tpu.dot_dimension_numbers<[1], [0], [0], [1], [0, 0, 1, 1], [], []>} : vector<24x24xf32>, vector<24x72xf32>, vector<24x72xf32> -> vector<24x72xf32>
    %c2_18 = arith.constant 2 : index
    %c0_19 = arith.constant 0 : index
    %c0_20 = arith.constant 0 : index
    %17 = vector.load %arg3[%c2_18, %c0_19, %c0_20] : memref<3x72x192xf32, #tpu.memory_space<vmem>>, vector<1x72x192xf32>
    %18 = vector.shape_cast %17 : vector<1x72x192xf32> to vector<72x192xf32>
    %cst_21 = arith.constant dense<0.000000e+00> : vector<24x192xf32>
    %19 = tpu.matmul %16, %18, %cst_21 {dimension_numbers = #tpu.dot_dimension_numbers<[1], [0], [0], [1], [0, 0, 1, 1], [], []>} : vector<24x72xf32>, vector<72x192xf32>, vector<24x192xf32> -> vector<24x192xf32>
    %20 = arith.addf %13, %19 : vector<24x192xf32>
    %c0_22 = arith.constant 0 : index
    %c0_23 = arith.constant 0 : index
    %21 = vector.load %arg8[%c0_22, %c0_23] : memref<192x16xf32, #tpu.memory_space<vmem>>, vector<192x16xf32>
    %cst_24 = arith.constant dense<0.000000e+00> : vector<192xf32>
    %22 = vector.multi_reduction <add>, %20, %cst_24 [0] : vector<24x192xf32> to vector<192xf32>
    %23 = vector.shape_cast %22 : vector<192xf32> to vector<1x192xf32>
    %cst_25 = arith.constant dense<0.000000e+00> : vector<1x16xf32>
    %24 = tpu.matmul %23, %21, %cst_25 {dimension_numbers = #tpu.dot_dimension_numbers<[1], [0], [0], [1], [0, 0, 1, 1], [], []>} : vector<1x192xf32>, vector<192x16xf32>, vector<1x16xf32> -> vector<1x16xf32>
    %25 = arith.mulf %20, %20 : vector<24x192xf32>
    %cst_26 = arith.constant dense<0.000000e+00> : vector<192xf32>
    %26 = vector.multi_reduction <add>, %25, %cst_26 [0] : vector<24x192xf32> to vector<192xf32>
    %27 = vector.shape_cast %26 : vector<192xf32> to vector<1x192xf32>
    %cst_27 = arith.constant dense<0.000000e+00> : vector<1x16xf32>
    %28 = tpu.matmul %27, %21, %cst_27 {dimension_numbers = #tpu.dot_dimension_numbers<[1], [0], [0], [1], [0, 0, 1, 1], [], []>} : vector<1x192xf32>, vector<192x16xf32>, vector<1x16xf32> -> vector<1x16xf32>
    %cst_28 = arith.constant 0.00347222225 : f32
    %29 = vector.broadcast %cst_28 : f32 to vector<1x16xf32>
    %30 = arith.mulf %24, %29 : vector<1x16xf32>
    %cst_29 = arith.constant 0.00347222225 : f32
    %31 = vector.broadcast %cst_29 : f32 to vector<1x16xf32>
    %32 = arith.mulf %28, %31 : vector<1x16xf32>
    %33 = arith.mulf %30, %30 : vector<1x16xf32>
    %34 = arith.subf %32, %33 : vector<1x16xf32>
    %cst_30 = arith.constant 0.000000e+00 : f32
    %35 = vector.broadcast %cst_30 : f32 to vector<1x16xf32>
    %36 = arith.maximumf %34, %35 : vector<1x16xf32>
    %c0_31 = arith.constant 0 : index
    %c0_32 = arith.constant 0 : index
    %37 = vector.load %arg10[%c0_31, %c0_32] : memref<1x16xf32, #tpu.memory_space<vmem>>, vector<1x16xf32>
    %cst_33 = arith.constant 9.99999974E-6 : f32
    %38 = vector.broadcast %cst_33 : f32 to vector<1x16xf32>
    %39 = arith.addf %36, %38 : vector<1x16xf32>
    %40 = math.rsqrt %39 : vector<1x16xf32>
    %41 = arith.mulf %37, %40 : vector<1x16xf32>
    %c0_34 = arith.constant 0 : index
    %c0_35 = arith.constant 0 : index
    %42 = vector.load %arg11[%c0_34, %c0_35] : memref<1x16xf32, #tpu.memory_space<vmem>>, vector<1x16xf32>
    %43 = arith.mulf %30, %41 : vector<1x16xf32>
    %44 = arith.subf %42, %43 : vector<1x16xf32>
    %c0_36 = arith.constant 0 : index
    %c0_37 = arith.constant 0 : index
    %45 = vector.load %arg9[%c0_36, %c0_37] : memref<16x192xf32, #tpu.memory_space<vmem>>, vector<16x192xf32>
    %cst_38 = arith.constant dense<0.000000e+00> : vector<1x192xf32>
    %46 = tpu.matmul %41, %45, %cst_38 {dimension_numbers = #tpu.dot_dimension_numbers<[1], [0], [0], [1], [0, 0, 1, 1], [], []>} : vector<1x16xf32>, vector<16x192xf32>, vector<1x192xf32> -> vector<1x192xf32>
    %cst_39 = arith.constant dense<0.000000e+00> : vector<1x192xf32>
    %47 = tpu.matmul %44, %45, %cst_39 {dimension_numbers = #tpu.dot_dimension_numbers<[1], [0], [0], [1], [0, 0, 1, 1], [], []>} : vector<1x16xf32>, vector<16x192xf32>, vector<1x192xf32> -> vector<1x192xf32>
    %48 = vector.broadcast %46 : vector<1x192xf32> to vector<24x192xf32>
    %49 = arith.mulf %20, %48 : vector<24x192xf32>
    %50 = vector.broadcast %47 : vector<1x192xf32> to vector<24x192xf32>
    %51 = arith.addf %49, %50 : vector<24x192xf32>
    %cst_40 = arith.constant 0.000000e+00 : f32
    %52 = vector.broadcast %cst_40 : f32 to vector<24x192xf32>
    %53 = arith.maximumf %51, %52 : vector<24x192xf32>
    %c0_41 = arith.constant 0 : index
    %c0_42 = arith.constant 0 : index
    %c0_43 = arith.constant 0 : index
    %54 = vector.load %arg4[%c0_41, %c0_42, %c0_43] : memref<2x14x24xf32, #tpu.memory_space<vmem>>, vector<1x14x24xf32>
    %55 = vector.shape_cast %54 : vector<1x14x24xf32> to vector<14x24xf32>
    %cst_44 = arith.constant dense<0.000000e+00> : vector<14x192xf32>
    %56 = tpu.matmul %55, %53, %cst_44 {dimension_numbers = #tpu.dot_dimension_numbers<[1], [0], [0], [1], [0, 0, 1, 1], [], []>} : vector<14x24xf32>, vector<24x192xf32>, vector<14x192xf32> -> vector<14x192xf32>
    %c0_45 = arith.constant 0 : index
    %c0_46 = arith.constant 0 : index
    %c0_47 = arith.constant 0 : index
    %57 = vector.load %arg5[%c0_45, %c0_46, %c0_47] : memref<2x192x224xf32, #tpu.memory_space<vmem>>, vector<1x192x224xf32>
    %58 = vector.shape_cast %57 : vector<1x192x224xf32> to vector<192x224xf32>
    %cst_48 = arith.constant dense<0.000000e+00> : vector<14x224xf32>
    %59 = tpu.matmul %56, %58, %cst_48 {dimension_numbers = #tpu.dot_dimension_numbers<[1], [0], [0], [1], [0, 0, 1, 1], [], []>} : vector<14x192xf32>, vector<192x224xf32>, vector<14x224xf32> -> vector<14x224xf32>
    %c1_49 = arith.constant 1 : index
    %c0_50 = arith.constant 0 : index
    %c0_51 = arith.constant 0 : index
    %60 = vector.load %arg4[%c1_49, %c0_50, %c0_51] : memref<2x14x24xf32, #tpu.memory_space<vmem>>, vector<1x14x24xf32>
    %61 = vector.shape_cast %60 : vector<1x14x24xf32> to vector<14x24xf32>
    %cst_52 = arith.constant dense<0.000000e+00> : vector<14x192xf32>
    %62 = tpu.matmul %61, %53, %cst_52 {dimension_numbers = #tpu.dot_dimension_numbers<[1], [0], [0], [1], [0, 0, 1, 1], [], []>} : vector<14x24xf32>, vector<24x192xf32>, vector<14x192xf32> -> vector<14x192xf32>
    %c1_53 = arith.constant 1 : index
    %c0_54 = arith.constant 0 : index
    %c0_55 = arith.constant 0 : index
    %63 = vector.load %arg5[%c1_53, %c0_54, %c0_55] : memref<2x192x224xf32, #tpu.memory_space<vmem>>, vector<1x192x224xf32>
    %64 = vector.shape_cast %63 : vector<1x192x224xf32> to vector<192x224xf32>
    %cst_56 = arith.constant dense<0.000000e+00> : vector<14x224xf32>
    %65 = tpu.matmul %62, %64, %cst_56 {dimension_numbers = #tpu.dot_dimension_numbers<[1], [0], [0], [1], [0, 0, 1, 1], [], []>} : vector<14x192xf32>, vector<192x224xf32>, vector<14x224xf32> -> vector<14x224xf32>
    %66 = arith.addf %59, %65 : vector<14x224xf32>
    %c0_57 = arith.constant 0 : index
    %c0_58 = arith.constant 0 : index
    %67 = vector.load %arg12[%c0_57, %c0_58] : memref<224x32xf32, #tpu.memory_space<vmem>>, vector<224x32xf32>
    %cst_59 = arith.constant dense<0.000000e+00> : vector<224xf32>
    %68 = vector.multi_reduction <add>, %66, %cst_59 [0] : vector<14x224xf32> to vector<224xf32>
    %69 = vector.shape_cast %68 : vector<224xf32> to vector<1x224xf32>
    %cst_60 = arith.constant dense<0.000000e+00> : vector<1x32xf32>
    %70 = tpu.matmul %69, %67, %cst_60 {dimension_numbers = #tpu.dot_dimension_numbers<[1], [0], [0], [1], [0, 0, 1, 1], [], []>} : vector<1x224xf32>, vector<224x32xf32>, vector<1x32xf32> -> vector<1x32xf32>
    %71 = arith.mulf %66, %66 : vector<14x224xf32>
    %cst_61 = arith.constant dense<0.000000e+00> : vector<224xf32>
    %72 = vector.multi_reduction <add>, %71, %cst_61 [0] : vector<14x224xf32> to vector<224xf32>
    %73 = vector.shape_cast %72 : vector<224xf32> to vector<1x224xf32>
    %cst_62 = arith.constant dense<0.000000e+00> : vector<1x32xf32>
    %74 = tpu.matmul %73, %67, %cst_62 {dimension_numbers = #tpu.dot_dimension_numbers<[1], [0], [0], [1], [0, 0, 1, 1], [], []>} : vector<1x224xf32>, vector<224x32xf32>, vector<1x32xf32> -> vector<1x32xf32>
    %cst_63 = arith.constant 0.0102040814 : f32
    %75 = vector.broadcast %cst_63 : f32 to vector<1x32xf32>
    %76 = arith.mulf %70, %75 : vector<1x32xf32>
    %cst_64 = arith.constant 0.0102040814 : f32
    %77 = vector.broadcast %cst_64 : f32 to vector<1x32xf32>
    %78 = arith.mulf %74, %77 : vector<1x32xf32>
    %79 = arith.mulf %76, %76 : vector<1x32xf32>
    %80 = arith.subf %78, %79 : vector<1x32xf32>
    %cst_65 = arith.constant 0.000000e+00 : f32
    %81 = vector.broadcast %cst_65 : f32 to vector<1x32xf32>
    %82 = arith.maximumf %80, %81 : vector<1x32xf32>
    %c0_66 = arith.constant 0 : index
    %c0_67 = arith.constant 0 : index
    %83 = vector.load %arg14[%c0_66, %c0_67] : memref<1x32xf32, #tpu.memory_space<vmem>>, vector<1x32xf32>
    %cst_68 = arith.constant 9.99999974E-6 : f32
    %84 = vector.broadcast %cst_68 : f32 to vector<1x32xf32>
    %85 = arith.addf %82, %84 : vector<1x32xf32>
    %86 = math.rsqrt %85 : vector<1x32xf32>
    %87 = arith.mulf %83, %86 : vector<1x32xf32>
    %c0_69 = arith.constant 0 : index
    %c0_70 = arith.constant 0 : index
    %88 = vector.load %arg15[%c0_69, %c0_70] : memref<1x32xf32, #tpu.memory_space<vmem>>, vector<1x32xf32>
    %89 = arith.mulf %76, %87 : vector<1x32xf32>
    %90 = arith.subf %88, %89 : vector<1x32xf32>
    %c0_71 = arith.constant 0 : index
    %c0_72 = arith.constant 0 : index
    %91 = vector.load %arg13[%c0_71, %c0_72] : memref<32x224xf32, #tpu.memory_space<vmem>>, vector<32x224xf32>
    %cst_73 = arith.constant dense<0.000000e+00> : vector<1x224xf32>
    %92 = tpu.matmul %87, %91, %cst_73 {dimension_numbers = #tpu.dot_dimension_numbers<[1], [0], [0], [1], [0, 0, 1, 1], [], []>} : vector<1x32xf32>, vector<32x224xf32>, vector<1x224xf32> -> vector<1x224xf32>
    %cst_74 = arith.constant dense<0.000000e+00> : vector<1x224xf32>
    %93 = tpu.matmul %90, %91, %cst_74 {dimension_numbers = #tpu.dot_dimension_numbers<[1], [0], [0], [1], [0, 0, 1, 1], [], []>} : vector<1x32xf32>, vector<32x224xf32>, vector<1x224xf32> -> vector<1x224xf32>
    %94 = vector.broadcast %92 : vector<1x224xf32> to vector<14x224xf32>
    %95 = arith.mulf %66, %94 : vector<14x224xf32>
    %96 = vector.broadcast %93 : vector<1x224xf32> to vector<14x224xf32>
    %97 = arith.addf %95, %96 : vector<14x224xf32>
    %cst_75 = arith.constant 0.000000e+00 : f32
    %98 = vector.broadcast %cst_75 : f32 to vector<14x224xf32>
    %99 = arith.maximumf %97, %98 : vector<14x224xf32>
    %c0_76 = arith.constant 0 : index
    %c0_77 = arith.constant 0 : index
    %c0_78 = arith.constant 0 : index
    %100 = vector.load %arg6[%c0_76, %c0_77, %c0_78] : memref<2x8x14xf32, #tpu.memory_space<vmem>>, vector<1x8x14xf32>
    %101 = vector.shape_cast %100 : vector<1x8x14xf32> to vector<8x14xf32>
    %cst_79 = arith.constant dense<0.000000e+00> : vector<8x224xf32>
    %102 = tpu.matmul %101, %99, %cst_79 {dimension_numbers = #tpu.dot_dimension_numbers<[1], [0], [0], [1], [0, 0, 1, 1], [], []>} : vector<8x14xf32>, vector<14x224xf32>, vector<8x224xf32> -> vector<8x224xf32>
    %c0_80 = arith.constant 0 : index
    %c0_81 = arith.constant 0 : index
    %c0_82 = arith.constant 0 : index
    %103 = vector.load %arg7[%c0_80, %c0_81, %c0_82] : memref<2x224x256xf32, #tpu.memory_space<vmem>>, vector<1x224x256xf32>
    %104 = vector.shape_cast %103 : vector<1x224x256xf32> to vector<224x256xf32>
    %cst_83 = arith.constant dense<0.000000e+00> : vector<8x256xf32>
    %105 = tpu.matmul %102, %104, %cst_83 {dimension_numbers = #tpu.dot_dimension_numbers<[1], [0], [0], [1], [0, 0, 1, 1], [], []>} : vector<8x224xf32>, vector<224x256xf32>, vector<8x256xf32> -> vector<8x256xf32>
    %c1_84 = arith.constant 1 : index
    %c0_85 = arith.constant 0 : index
    %c0_86 = arith.constant 0 : index
    %106 = vector.load %arg6[%c1_84, %c0_85, %c0_86] : memref<2x8x14xf32, #tpu.memory_space<vmem>>, vector<1x8x14xf32>
    %107 = vector.shape_cast %106 : vector<1x8x14xf32> to vector<8x14xf32>
    %cst_87 = arith.constant dense<0.000000e+00> : vector<8x224xf32>
    %108 = tpu.matmul %107, %99, %cst_87 {dimension_numbers = #tpu.dot_dimension_numbers<[1], [0], [0], [1], [0, 0, 1, 1], [], []>} : vector<8x14xf32>, vector<14x224xf32>, vector<8x224xf32> -> vector<8x224xf32>
    %c1_88 = arith.constant 1 : index
    %c0_89 = arith.constant 0 : index
    %c0_90 = arith.constant 0 : index
    %109 = vector.load %arg7[%c1_88, %c0_89, %c0_90] : memref<2x224x256xf32, #tpu.memory_space<vmem>>, vector<1x224x256xf32>
    %110 = vector.shape_cast %109 : vector<1x224x256xf32> to vector<224x256xf32>
    %cst_91 = arith.constant dense<0.000000e+00> : vector<8x256xf32>
    %111 = tpu.matmul %108, %110, %cst_91 {dimension_numbers = #tpu.dot_dimension_numbers<[1], [0], [0], [1], [0, 0, 1, 1], [], []>} : vector<8x224xf32>, vector<224x256xf32>, vector<8x256xf32> -> vector<8x256xf32>
    %112 = arith.addf %105, %111 : vector<8x256xf32>
    %c0_92 = arith.constant 0 : index
    %c0_93 = arith.constant 0 : index
    %113 = vector.load %arg16[%c0_92, %c0_93] : memref<256x64xf32, #tpu.memory_space<vmem>>, vector<256x64xf32>
    %cst_94 = arith.constant dense<0.000000e+00> : vector<256xf32>
    %114 = vector.multi_reduction <add>, %112, %cst_94 [0] : vector<8x256xf32> to vector<256xf32>
    %115 = vector.shape_cast %114 : vector<256xf32> to vector<1x256xf32>
    %cst_95 = arith.constant dense<0.000000e+00> : vector<1x64xf32>
    %116 = tpu.matmul %115, %113, %cst_95 {dimension_numbers = #tpu.dot_dimension_numbers<[1], [0], [0], [1], [0, 0, 1, 1], [], []>} : vector<1x256xf32>, vector<256x64xf32>, vector<1x64xf32> -> vector<1x64xf32>
    %117 = arith.mulf %112, %112 : vector<8x256xf32>
    %cst_96 = arith.constant dense<0.000000e+00> : vector<256xf32>
    %118 = vector.multi_reduction <add>, %117, %cst_96 [0] : vector<8x256xf32> to vector<256xf32>
    %119 = vector.shape_cast %118 : vector<256xf32> to vector<1x256xf32>
    %cst_97 = arith.constant dense<0.000000e+00> : vector<1x64xf32>
    %120 = tpu.matmul %119, %113, %cst_97 {dimension_numbers = #tpu.dot_dimension_numbers<[1], [0], [0], [1], [0, 0, 1, 1], [], []>} : vector<1x256xf32>, vector<256x64xf32>, vector<1x64xf32> -> vector<1x64xf32>
    %cst_98 = arith.constant 3.125000e-02 : f32
    %121 = vector.broadcast %cst_98 : f32 to vector<1x64xf32>
    %122 = arith.mulf %116, %121 : vector<1x64xf32>
    %cst_99 = arith.constant 3.125000e-02 : f32
    %123 = vector.broadcast %cst_99 : f32 to vector<1x64xf32>
    %124 = arith.mulf %120, %123 : vector<1x64xf32>
    %125 = arith.mulf %122, %122 : vector<1x64xf32>
    %126 = arith.subf %124, %125 : vector<1x64xf32>
    %cst_100 = arith.constant 0.000000e+00 : f32
    %127 = vector.broadcast %cst_100 : f32 to vector<1x64xf32>
    %128 = arith.maximumf %126, %127 : vector<1x64xf32>
    %c0_101 = arith.constant 0 : index
    %c0_102 = arith.constant 0 : index
    %129 = vector.load %arg18[%c0_101, %c0_102] : memref<1x64xf32, #tpu.memory_space<vmem>>, vector<1x64xf32>
    %cst_103 = arith.constant 9.99999974E-6 : f32
    %130 = vector.broadcast %cst_103 : f32 to vector<1x64xf32>
    %131 = arith.addf %128, %130 : vector<1x64xf32>
    %132 = math.rsqrt %131 : vector<1x64xf32>
    %133 = arith.mulf %129, %132 : vector<1x64xf32>
    %c0_104 = arith.constant 0 : index
    %c0_105 = arith.constant 0 : index
    %134 = vector.load %arg19[%c0_104, %c0_105] : memref<1x64xf32, #tpu.memory_space<vmem>>, vector<1x64xf32>
    %135 = arith.mulf %122, %133 : vector<1x64xf32>
    %136 = arith.subf %134, %135 : vector<1x64xf32>
    %c0_106 = arith.constant 0 : index
    %c0_107 = arith.constant 0 : index
    %137 = vector.load %arg17[%c0_106, %c0_107] : memref<64x256xf32, #tpu.memory_space<vmem>>, vector<64x256xf32>
    %cst_108 = arith.constant dense<0.000000e+00> : vector<1x256xf32>
    %138 = tpu.matmul %133, %137, %cst_108 {dimension_numbers = #tpu.dot_dimension_numbers<[1], [0], [0], [1], [0, 0, 1, 1], [], []>} : vector<1x64xf32>, vector<64x256xf32>, vector<1x256xf32> -> vector<1x256xf32>
    %cst_109 = arith.constant dense<0.000000e+00> : vector<1x256xf32>
    %139 = tpu.matmul %136, %137, %cst_109 {dimension_numbers = #tpu.dot_dimension_numbers<[1], [0], [0], [1], [0, 0, 1, 1], [], []>} : vector<1x64xf32>, vector<64x256xf32>, vector<1x256xf32> -> vector<1x256xf32>
    %140 = vector.broadcast %138 : vector<1x256xf32> to vector<8x256xf32>
    %141 = arith.mulf %112, %140 : vector<8x256xf32>
    %142 = vector.broadcast %139 : vector<1x256xf32> to vector<8x256xf32>
    %143 = arith.addf %141, %142 : vector<8x256xf32>
    %cst_110 = arith.constant 0.000000e+00 : f32
    %144 = vector.broadcast %cst_110 : f32 to vector<8x256xf32>
    %145 = arith.maximumf %143, %144 : vector<8x256xf32>
    %c0_111 = arith.constant 0 : index
    %c0_112 = arith.constant 0 : index
    %c0_113 = arith.constant 0 : index
    %146 = vector.load %arg20[%c0_111, %c0_112, %c0_113] : memref<4x2x8xf32, #tpu.memory_space<vmem>>, vector<1x2x8xf32>
    %147 = vector.shape_cast %146 : vector<1x2x8xf32> to vector<2x8xf32>
    %cst_114 = arith.constant dense<0.000000e+00> : vector<2x256xf32>
    %148 = tpu.matmul %147, %145, %cst_114 {dimension_numbers = #tpu.dot_dimension_numbers<[1], [0], [0], [1], [0, 0, 1, 1], [], []>} : vector<2x8xf32>, vector<8x256xf32>, vector<2x256xf32> -> vector<2x256xf32>
    %c0_115 = arith.constant 0 : index
    %c0_116 = arith.constant 0 : index
    %c0_117 = arith.constant 0 : index
    %149 = vector.load %arg21[%c0_115, %c0_116, %c0_117] : memref<4x256x256xf32, #tpu.memory_space<vmem>>, vector<1x256x256xf32>
    %150 = vector.shape_cast %149 : vector<1x256x256xf32> to vector<256x256xf32>
    %cst_118 = arith.constant dense<0.000000e+00> : vector<2x256xf32>
    %151 = tpu.matmul %148, %150, %cst_118 {dimension_numbers = #tpu.dot_dimension_numbers<[1], [0], [0], [1], [0, 0, 1, 1], [], []>} : vector<2x256xf32>, vector<256x256xf32>, vector<2x256xf32> -> vector<2x256xf32>
    %c1_119 = arith.constant 1 : index
    %c0_120 = arith.constant 0 : index
    %c0_121 = arith.constant 0 : index
    %152 = vector.load %arg20[%c1_119, %c0_120, %c0_121] : memref<4x2x8xf32, #tpu.memory_space<vmem>>, vector<1x2x8xf32>
    %153 = vector.shape_cast %152 : vector<1x2x8xf32> to vector<2x8xf32>
    %cst_122 = arith.constant dense<0.000000e+00> : vector<2x256xf32>
    %154 = tpu.matmul %153, %145, %cst_122 {dimension_numbers = #tpu.dot_dimension_numbers<[1], [0], [0], [1], [0, 0, 1, 1], [], []>} : vector<2x8xf32>, vector<8x256xf32>, vector<2x256xf32> -> vector<2x256xf32>
    %c1_123 = arith.constant 1 : index
    %c0_124 = arith.constant 0 : index
    %c0_125 = arith.constant 0 : index
    %155 = vector.load %arg21[%c1_123, %c0_124, %c0_125] : memref<4x256x256xf32, #tpu.memory_space<vmem>>, vector<1x256x256xf32>
    %156 = vector.shape_cast %155 : vector<1x256x256xf32> to vector<256x256xf32>
    %cst_126 = arith.constant dense<0.000000e+00> : vector<2x256xf32>
    %157 = tpu.matmul %154, %156, %cst_126 {dimension_numbers = #tpu.dot_dimension_numbers<[1], [0], [0], [1], [0, 0, 1, 1], [], []>} : vector<2x256xf32>, vector<256x256xf32>, vector<2x256xf32> -> vector<2x256xf32>
    %158 = arith.addf %151, %157 : vector<2x256xf32>
    %c2_127 = arith.constant 2 : index
    %c0_128 = arith.constant 0 : index
    %c0_129 = arith.constant 0 : index
    %159 = vector.load %arg20[%c2_127, %c0_128, %c0_129] : memref<4x2x8xf32, #tpu.memory_space<vmem>>, vector<1x2x8xf32>
    %160 = vector.shape_cast %159 : vector<1x2x8xf32> to vector<2x8xf32>
    %cst_130 = arith.constant dense<0.000000e+00> : vector<2x256xf32>
    %161 = tpu.matmul %160, %145, %cst_130 {dimension_numbers = #tpu.dot_dimension_numbers<[1], [0], [0], [1], [0, 0, 1, 1], [], []>} : vector<2x8xf32>, vector<8x256xf32>, vector<2x256xf32> -> vector<2x256xf32>
    %c2_131 = arith.constant 2 : index
    %c0_132 = arith.constant 0 : index
    %c0_133 = arith.constant 0 : index
    %162 = vector.load %arg21[%c2_131, %c0_132, %c0_133] : memref<4x256x256xf32, #tpu.memory_space<vmem>>, vector<1x256x256xf32>
    %163 = vector.shape_cast %162 : vector<1x256x256xf32> to vector<256x256xf32>
    %cst_134 = arith.constant dense<0.000000e+00> : vector<2x256xf32>
    %164 = tpu.matmul %161, %163, %cst_134 {dimension_numbers = #tpu.dot_dimension_numbers<[1], [0], [0], [1], [0, 0, 1, 1], [], []>} : vector<2x256xf32>, vector<256x256xf32>, vector<2x256xf32> -> vector<2x256xf32>
    %165 = arith.addf %158, %164 : vector<2x256xf32>
    %c3 = arith.constant 3 : index
    %c0_135 = arith.constant 0 : index
    %c0_136 = arith.constant 0 : index
    %166 = vector.load %arg20[%c3, %c0_135, %c0_136] : memref<4x2x8xf32, #tpu.memory_space<vmem>>, vector<1x2x8xf32>
    %167 = vector.shape_cast %166 : vector<1x2x8xf32> to vector<2x8xf32>
    %cst_137 = arith.constant dense<0.000000e+00> : vector<2x256xf32>
    %168 = tpu.matmul %167, %145, %cst_137 {dimension_numbers = #tpu.dot_dimension_numbers<[1], [0], [0], [1], [0, 0, 1, 1], [], []>} : vector<2x8xf32>, vector<8x256xf32>, vector<2x256xf32> -> vector<2x256xf32>
    %c3_138 = arith.constant 3 : index
    %c0_139 = arith.constant 0 : index
    %c0_140 = arith.constant 0 : index
    %169 = vector.load %arg21[%c3_138, %c0_139, %c0_140] : memref<4x256x256xf32, #tpu.memory_space<vmem>>, vector<1x256x256xf32>
    %170 = vector.shape_cast %169 : vector<1x256x256xf32> to vector<256x256xf32>
    %cst_141 = arith.constant dense<0.000000e+00> : vector<2x256xf32>
    %171 = tpu.matmul %168, %170, %cst_141 {dimension_numbers = #tpu.dot_dimension_numbers<[1], [0], [0], [1], [0, 0, 1, 1], [], []>} : vector<2x256xf32>, vector<256x256xf32>, vector<2x256xf32> -> vector<2x256xf32>
    %172 = arith.addf %165, %171 : vector<2x256xf32>
    %c0_142 = arith.constant 0 : index
    %c0_143 = arith.constant 0 : index
    %173 = vector.load %arg22[%c0_142, %c0_143] : memref<1x256xf32, #tpu.memory_space<vmem>>, vector<1x256xf32>
    %174 = vector.broadcast %173 : vector<1x256xf32> to vector<2x256xf32>
    %175 = arith.addf %172, %174 : vector<2x256xf32>
    %cst_144 = arith.constant 0.000000e+00 : f32
    %176 = vector.broadcast %cst_144 : f32 to vector<2x256xf32>
    %177 = arith.maximumf %175, %176 : vector<2x256xf32>
    %c0_145 = arith.constant 0 : index
    %c0_146 = arith.constant 0 : index
    %178 = vector.load %arg23[%c0_145, %c0_146] : memref<256x256xf32, #tpu.memory_space<vmem>>, vector<256x256xf32>
    %cst_147 = arith.constant dense<0.000000e+00> : vector<2x256xf32>
    %179 = tpu.matmul %177, %178, %cst_147 {dimension_numbers = #tpu.dot_dimension_numbers<[1], [0], [0], [1], [0, 0, 1, 1], [], []>} : vector<2x256xf32>, vector<256x256xf32>, vector<2x256xf32> -> vector<2x256xf32>
    %c0_148 = arith.constant 0 : index
    %c0_149 = arith.constant 0 : index
    %180 = vector.load %arg24[%c0_148, %c0_149] : memref<1x256xf32, #tpu.memory_space<vmem>>, vector<1x256xf32>
    %181 = vector.broadcast %180 : vector<1x256xf32> to vector<2x256xf32>
    %182 = arith.addf %179, %181 : vector<2x256xf32>
    %cst_150 = arith.constant 0.000000e+00 : f32
    %183 = vector.broadcast %cst_150 : f32 to vector<2x256xf32>
    %184 = arith.maximumf %182, %183 : vector<2x256xf32>
    %c0_151 = arith.constant 0 : index
    %c0_152 = arith.constant 0 : index
    %185 = vector.load %arg25[%c0_151, %c0_152] : memref<256x288xf32, #tpu.memory_space<vmem>>, vector<256x288xf32>
    %cst_153 = arith.constant dense<0.000000e+00> : vector<2x288xf32>
    %186 = tpu.matmul %184, %185, %cst_153 {dimension_numbers = #tpu.dot_dimension_numbers<[1], [0], [0], [1], [0, 0, 1, 1], [], []>} : vector<2x256xf32>, vector<256x288xf32>, vector<2x288xf32> -> vector<2x288xf32>
    %c0_154 = arith.constant 0 : index
    %c0_155 = arith.constant 0 : index
    %187 = vector.load %arg26[%c0_154, %c0_155] : memref<1x288xf32, #tpu.memory_space<vmem>>, vector<1x288xf32>
    %188 = vector.broadcast %187 : vector<1x288xf32> to vector<2x288xf32>
    %189 = arith.addf %186, %188 : vector<2x288xf32>
    %cst_156 = arith.constant 0.000000e+00 : f32
    %190 = vector.broadcast %cst_156 : f32 to vector<2x288xf32>
    %191 = arith.maximumf %189, %190 : vector<2x288xf32>
    %c0_157 = arith.constant 0 : index
    %c0_158 = arith.constant 0 : index
    %192 = vector.load %arg27[%c0_157, %c0_158] : memref<2x288xf32, #tpu.memory_space<vmem>>, vector<2x288xf32>
    tpu.vector_store %arg27[%c0_157, %c0_158], %191 {strides = array<i32>} : memref<2x288xf32, #tpu.memory_space<vmem>>, vector<2x288xf32>,
    return
  }
  func.func @transform_0(%arg0: i32) -> (i32, i32) {
    %c0_i32 = arith.constant 0 : i32
    %c0_i32_0 = arith.constant 0 : i32
    %c0_i32_1 = arith.constant 0 : i32
    return %c0_i32, %c0_i32_0 : i32, i32
  }
  func.func @transform_1(%arg0: i32) -> (i32, i32, i32) {
    %c0_i32 = arith.constant 0 : i32
    %c0_i32_0 = arith.constant 0 : i32
    %c0_i32_1 = arith.constant 0 : i32
    %c0_i32_2 = arith.constant 0 : i32
    return %c0_i32, %c0_i32_0, %c0_i32_1 : i32, i32, i32
  }
  func.func @transform_2(%arg0: i32) -> (i32, i32, i32) {
    %c0_i32 = arith.constant 0 : i32
    %c0_i32_0 = arith.constant 0 : i32
    %c0_i32_1 = arith.constant 0 : i32
    %c0_i32_2 = arith.constant 0 : i32
    return %c0_i32, %c0_i32_0, %c0_i32_1 : i32, i32, i32
  }
  func.func @transform_3(%arg0: i32) -> (i32, i32, i32) {
    %c0_i32 = arith.constant 0 : i32
    %c0_i32_0 = arith.constant 0 : i32
    %c0_i32_1 = arith.constant 0 : i32
    %c0_i32_2 = arith.constant 0 : i32
    return %c0_i32, %c0_i32_0, %c0_i32_1 : i32, i32, i32
  }
  func.func @transform_4(%arg0: i32) -> (i32, i32, i32) {
    %c0_i32 = arith.constant 0 : i32
    %c0_i32_0 = arith.constant 0 : i32
    %c0_i32_1 = arith.constant 0 : i32
    %c0_i32_2 = arith.constant 0 : i32
    return %c0_i32, %c0_i32_0, %c0_i32_1 : i32, i32, i32
  }
  func.func @transform_5(%arg0: i32) -> (i32, i32, i32) {
    %c0_i32 = arith.constant 0 : i32
    %c0_i32_0 = arith.constant 0 : i32
    %c0_i32_1 = arith.constant 0 : i32
    %c0_i32_2 = arith.constant 0 : i32
    return %c0_i32, %c0_i32_0, %c0_i32_1 : i32, i32, i32
  }
  func.func @transform_6(%arg0: i32) -> (i32, i32, i32) {
    %c0_i32 = arith.constant 0 : i32
    %c0_i32_0 = arith.constant 0 : i32
    %c0_i32_1 = arith.constant 0 : i32
    %c0_i32_2 = arith.constant 0 : i32
    return %c0_i32, %c0_i32_0, %c0_i32_1 : i32, i32, i32
  }
  func.func @transform_7(%arg0: i32) -> (i32, i32) {
    %c0_i32 = arith.constant 0 : i32
    %c0_i32_0 = arith.constant 0 : i32
    %c0_i32_1 = arith.constant 0 : i32
    return %c0_i32, %c0_i32_0 : i32, i32
  }
  func.func @transform_8(%arg0: i32) -> (i32, i32) {
    %c0_i32 = arith.constant 0 : i32
    %c0_i32_0 = arith.constant 0 : i32
    %c0_i32_1 = arith.constant 0 : i32
    return %c0_i32, %c0_i32_0 : i32, i32
  }
  func.func @transform_9(%arg0: i32) -> (i32, i32) {
    %c0_i32 = arith.constant 0 : i32
    %c0_i32_0 = arith.constant 0 : i32
    %c0_i32_1 = arith.constant 0 : i32
    return %c0_i32, %c0_i32_0 : i32, i32
  }
  func.func @transform_10(%arg0: i32) -> (i32, i32) {
    %c0_i32 = arith.constant 0 : i32
    %c0_i32_0 = arith.constant 0 : i32
    %c0_i32_1 = arith.constant 0 : i32
    return %c0_i32, %c0_i32_0 : i32, i32
  }
  func.func @transform_11(%arg0: i32) -> (i32, i32) {
    %c0_i32 = arith.constant 0 : i32
    %c0_i32_0 = arith.constant 0 : i32
    %c0_i32_1 = arith.constant 0 : i32
    return %c0_i32, %c0_i32_0 : i32, i32
  }
  func.func @transform_12(%arg0: i32) -> (i32, i32) {
    %c0_i32 = arith.constant 0 : i32
    %c0_i32_0 = arith.constant 0 : i32
    %c0_i32_1 = arith.constant 0 : i32
    return %c0_i32, %c0_i32_0 : i32, i32
  }
  func.func @transform_13(%arg0: i32) -> (i32, i32) {
    %c0_i32 = arith.constant 0 : i32
    %c0_i32_0 = arith.constant 0 : i32
    %c0_i32_1 = arith.constant 0 : i32
    return %c0_i32, %c0_i32_0 : i32, i32
  }
  func.func @transform_14(%arg0: i32) -> (i32, i32) {
    %c0_i32 = arith.constant 0 : i32
    %c0_i32_0 = arith.constant 0 : i32
    %c0_i32_1 = arith.constant 0 : i32
    return %c0_i32, %c0_i32_0 : i32, i32
  }
  func.func @transform_15(%arg0: i32) -> (i32, i32) {
    %c0_i32 = arith.constant 0 : i32
    %c0_i32_0 = arith.constant 0 : i32
    %c0_i32_1 = arith.constant 0 : i32
    return %c0_i32, %c0_i32_0 : i32, i32
  }
  func.func @transform_16(%arg0: i32) -> (i32, i32) {
    %c0_i32 = arith.constant 0 : i32
    %c0_i32_0 = arith.constant 0 : i32
    %c0_i32_1 = arith.constant 0 : i32
    return %c0_i32, %c0_i32_0 : i32, i32
  }
  func.func @transform_17(%arg0: i32) -> (i32, i32) {
    %c0_i32 = arith.constant 0 : i32
    %c0_i32_0 = arith.constant 0 : i32
    %c0_i32_1 = arith.constant 0 : i32
    return %c0_i32, %c0_i32_0 : i32, i32
  }
  func.func @transform_18(%arg0: i32) -> (i32, i32) {
    %c0_i32 = arith.constant 0 : i32
    %c0_i32_0 = arith.constant 0 : i32
    %c0_i32_1 = arith.constant 0 : i32
    return %c0_i32, %c0_i32_0 : i32, i32
  }
  func.func @transform_19(%arg0: i32) -> (i32, i32, i32) {
    %c0_i32 = arith.constant 0 : i32
    %c0_i32_0 = arith.constant 0 : i32
    %c0_i32_1 = arith.constant 0 : i32
    %c0_i32_2 = arith.constant 0 : i32
    return %c0_i32, %c0_i32_0, %c0_i32_1 : i32, i32, i32
  }
  func.func @transform_20(%arg0: i32) -> (i32, i32, i32) {
    %c0_i32 = arith.constant 0 : i32
    %c0_i32_0 = arith.constant 0 : i32
    %c0_i32_1 = arith.constant 0 : i32
    %c0_i32_2 = arith.constant 0 : i32
    return %c0_i32, %c0_i32_0, %c0_i32_1 : i32, i32, i32
  }
  func.func @transform_21(%arg0: i32) -> (i32, i32) {
    %c0_i32 = arith.constant 0 : i32
    %c0_i32_0 = arith.constant 0 : i32
    %c0_i32_1 = arith.constant 0 : i32
    return %c0_i32, %c0_i32_0 : i32, i32
  }
  func.func @transform_22(%arg0: i32) -> (i32, i32) {
    %c0_i32 = arith.constant 0 : i32
    %c0_i32_0 = arith.constant 0 : i32
    %c0_i32_1 = arith.constant 0 : i32
    return %c0_i32, %c0_i32_0 : i32, i32
  }
  func.func @transform_23(%arg0: i32) -> (i32, i32) {
    %c0_i32 = arith.constant 0 : i32
    %c0_i32_0 = arith.constant 0 : i32
    %c0_i32_1 = arith.constant 0 : i32
    return %c0_i32, %c0_i32_0 : i32, i32
  }
  func.func @transform_24(%arg0: i32) -> (i32, i32) {
    %c0_i32 = arith.constant 0 : i32
    %c0_i32_0 = arith.constant 0 : i32
    %c0_i32_1 = arith.constant 0 : i32
    return %c0_i32, %c0_i32_0 : i32, i32
  }
  func.func @transform_25(%arg0: i32) -> (i32, i32) {
    %c0_i32 = arith.constant 0 : i32
    %c0_i32_0 = arith.constant 0 : i32
    %c0_i32_1 = arith.constant 0 : i32
    return %c0_i32, %c0_i32_0 : i32, i32
  }
  func.func @transform_26(%arg0: i32) -> (i32, i32) {
    %c0_i32 = arith.constant 0 : i32
    %c0_i32_0 = arith.constant 0 : i32
    %c0_i32_1 = arith.constant 0 : i32
    return %c0_i32, %c0_i32_0 : i32, i32
  }
}

</mosaic_0001>

<bundles_post_ra>
// kernel: binnet_forward.1
= control target key start
LH: loop header
LB: loop body
LE: loop exit
PB: predicated region body
PF: predicated region fallthrough
CT: control target
= control target key end

     0   :  { %s8661_s0 = inlined_call_operand.vmem [shape: f32[24,72], index: 0, kind: input, shape index: {}]   ;;  %s8662_s1 = inlined_call_operand.hbm [shape: f32[3,24,24], index: 1, kind: input, shape index: {}]   ;;  %s8663_s2 = inlined_call_operand.vmem [shape: f32[3,72,192], index: 2, kind: input, shape index: {}]   ;;  %s8664_s3 = inlined_call_operand.vmem [shape: f32[2,14,24], index: 3, kind: input, shape index: {}]   ;;  %s8665_s4 = inlined_call_operand.hbm [shape: f32[2,192,224], index: 4, kind: input, shape index: {}]   ;;  %s8666_s5 = inlined_call_operand.vmem [shape: f32[2,8,14], index: 5, kind: input, shape index: {}]   ;;  %s8667_s6 = inlined_call_operand.vmem [shape: f32[2,224,256], index: 6, kind: input, shape index: {}]   ;;  %s8668_s7 = inlined_call_operand.vmem [shape: f32[192,16], index: 7, kind: input, shape index: {}]   ;;  %s8669_s8 = inlined_call_operand.hbm [shape: f32[16,192], index: 8, kind: input, shape index: {}]   ;;  %s8670_s9 = inlined_call_operand.vmem [shape: f32[1,16], index: 9, kind: input, shape index: {}]   ;;  %s8671_s10 = inlined_call_operand.hbm [shape: f32[1,16], index: 10, kind: input, shape index: {}]   ;;  %s8672_s11 = inlined_call_operand.vmem [shape: f32[224,32], index: 11, kind: input, shape index: {}]   ;;  %s8673_s12 = inlined_call_operand.hbm [shape: f32[32,224], index: 12, kind: input, shape index: {}]   ;;  %s8674_s13 = inlined_call_operand.hbm [shape: f32[1,32], index: 13, kind: input, shape index: {}]   ;;  %s8675_s14 = inlined_call_operand.hbm [shape: f32[1,32], index: 14, kind: input, shape index: {}]   ;;  %s8676_s15 = inlined_call_operand.vmem [shape: f32[256,64], index: 15, kind: input, shape index: {}]   ;;  %s8677_s16 = inlined_call_operand.hbm [shape: f32[64,256], index: 16, kind: input, shape index: {}]   ;;  %s8678_s17 = inlined_call_operand.hbm [shape: f32[1,64], index: 17, kind: input, shape index: {}]   ;;  %s8679_s18 = inlined_call_operand.hbm [shape: f32[1,64], index: 18, kind: input, shape index: {}]   ;;  %s8680_s19 = inlined_call_operand.vmem [shape: f32[4,2,8], index: 19, kind: input, shape index: {}]   ;;  %s8681_s20 = inlined_call_operand.vmem [shape: f32[4,256,256], index: 20, kind: input, shape index: {}]   ;;  %s8682_s21 = inlined_call_operand.vmem [shape: f32[1,256], index: 21, kind: input, shape index: {}]   ;;  %s8683_s22 = inlined_call_operand.hbm [shape: f32[256,256], index: 22, kind: input, shape index: {}]   ;;  %s8684_s23 = inlined_call_operand.hbm [shape: f32[1,256], index: 23, kind: input, shape index: {}]   ;;  %s8685_s24 = inlined_call_operand.vmem [shape: f32[256,288], index: 24, kind: input, shape index: {}]   ;;  %s8686_s25 = inlined_call_operand.vmem [shape: f32[1,288], index: 25, kind: input, shape index: {}]   ;;  %s8687_s26 = inlined_call_operand.vmem [shape: f32[2,288], index: 26, kind: output, shape index: {}]  }
   0x1   :  { %8698 = sst [smem:[#allocation28_spill]] %s8661_s0 }
   0x2   :  { %8699 = sst [smem:[#allocation29_spill]] %s8662_s1 }
   0x3   :  { %8700 = sst [smem:[#allocation30_spill]] %s8663_s2 }
   0x4   :  { %8701 = sst [smem:[#allocation31_spill]] %s8664_s3 }
   0x5   :  { %8702 = sst [smem:[#allocation32_spill]] %s8665_s4 }
   0x6   :  { %8703 = sst [smem:[#allocation33_spill]] %s8666_s5 }
   0x7   :  { %8704 = sst [smem:[#allocation34_spill]] %s8667_s6 }
   0x8   :  { %8705 = sst [smem:[#allocation35_spill]] %s8668_s7 }
   0x9   :  { %8706 = sst [smem:[#allocation36_spill]] %s8669_s8 }
   0xa   :  { %8707 = sst [smem:[#allocation37_spill]] %s8670_s9 }
   0xb   :  { %8708 = sst [smem:[#allocation38_spill]] %s8671_s10 }
   0xc   :  { %8709 = sst [smem:[#allocation39_spill]] %s8682_s21 }
   0xd   :  { %8710 = sst [smem:[#allocation40_spill]] %s8686_s25 }
   0xe   :  { %8711 = sst [smem:[#allocation41_spill]] %s8687_s26 }
   0xf   :  { %31 = vsyncpa [#allocation3], 0 }
  0x10   :  { %32 = vsyncpa [#allocation5], 0 }
  0x11   :  { %33 = vsyncpa [#allocation8], 0 }
  0x12   :  { %34 = vsyncpa [#allocation11], 0 }
  0x13   :  { %35 = vsyncpa [#allocation14], 0 }
  0x14   :  { %36 = vsyncpa [#allocation17], 0 }
  0x15   :  { %37 = vsyncpa [#allocation20], 0  ;;  %s6052_s27 = smov [#allocation4]   ;;  %s8712_s8 = sld [smem:[#allocation32_spill]] }
  0x16   :  { %s61_s3 = sshll.u32 %s6052_s27, 4  ;;  %s62_s3 = int_to_ptr.vmem [resolvable:$true] %s61_s3 }
  0x1b   :  { %s5774_s4 = scalar_lea.hbm %s8712_s8, 12288 }
  0x1c   :  { %p5775_p0 = scmp.ne.s32.totalorder %s8712_s8, %s5774_s4  ;;  %p5778_p1 = scmp.lt.u32.totalorder %s5774_s4, %s8712_s8 }
  0x1e   :  { %p5780_p2 = pnand %p5778_p1, %p5775_p0 }
  0x20   :  { %5783 = shalt.err (!%p5780_p2)
}
  0x21   :  { %s5784_s2 = scalar_lea.vmem %s62_s3, 12288  ;;  %p5789_p4 = scmp.lt.s32.totalorder %s62_s3, %s62_s3 }
  0x22   :  { %p5785_p3 = scmp.ne.s32.totalorder %s62_s3, %s5784_s2  ;;  %p5790_p5 = scmp.lt.s32.totalorder %s5784_s2, %s5784_s2 }
  0x24   :  { %p5791_p6 = por %p5790_p5, %p5789_p4 }
  0x26   :  { %p5792_p7 = pnand %p5791_p6, %p5785_p3 }
  0x28   :  { %5795 = shalt.err (!%p5792_p7)
}
  0x29   :  { %s6053_s5 = smov 256   ;;  %s6054_s10 = smov 16  }
  0x2a   :  { %67 = dma.hbm_to_vmem [thread:$0]  %s8712_s8, 12288, %s62_s3, [#allocation5], %s6053_s5, %s6053_s5, %s6054_s10  }
  0x2b   :  { %s6055_s27 = smov [#allocation7]   ;;  %s6056_s28 = smov [#allocation10]  }
  0x2c   :  { %s94_s7 = sshll.u32 %s6055_s27, 4  ;;  %s118_s4 = sshll.u32 %s6056_s28, 4  ;;  %s95_s7 = int_to_ptr.vmem [resolvable:$true] %s94_s7  ;;  %s119_s4 = int_to_ptr.vmem [resolvable:$true] %s118_s4 }
  0x2d   :  { %s8713_s9 = sld [smem:[#allocation38_spill]] }
  0x33   :  { %s5796_s30 = scalar_lea.hbm %s8713_s9, 16 }
  0x34   :  { %p5797_p8 = scmp.ne.s32.totalorder %s8713_s9, %s5796_s30  ;;  %p5800_p9 = scmp.lt.u32.totalorder %s5796_s30, %s8713_s9 }
  0x36   :  { %p5802_p10 = pnand %p5800_p9, %p5797_p8 }
  0x38   :  { %5805 = shalt.err (!%p5802_p10)
}
  0x39   :  { %s5806_s3 = scalar_lea.vmem %s95_s7, 16  ;;  %s5810_s8 = scalar_lea.vmem %s95_s7, 32 }
  0x3a   :  { %p5807_p11 = scmp.ne.s32.totalorder %s95_s7, %s5806_s3  ;;  %p5811_p12 = scmp.lt.s32.totalorder %s95_s7, %s95_s7 }
  0x3b   :  { %p5812_p13 = scmp.lt.s32.totalorder %s5810_s8, %s5806_s3 }
  0x3d   :  { %p5813_p0 = por %p5812_p13, %p5811_p12 }
  0x3f   :  { %p5814_p1 = pnand %p5813_p0, %p5807_p11 }
  0x41   :  { %5817 = shalt.err (!%p5814_p1)
}
  0x42   :  { %97 = dma.hbm_to_vmem [thread:$0]  %s8713_s9, 16, %s95_s7, [#allocation8]  }
  0x43   :  { %s5818_s21 = scalar_lea.hbm %s8674_s13, 16 }
  0x44   :  { %p5819_p2 = scmp.ne.s32.totalorder %s8674_s13, %s5818_s21  ;;  %p5822_p3 = scmp.lt.u32.totalorder %s5818_s21, %s8674_s13 }
  0x46   :  { %p5824_p4 = pnand %p5822_p3, %p5819_p2 }
  0x48   :  { %5827 = shalt.err (!%p5824_p4)
}
  0x49   :  { %s5828_s30 = scalar_lea.vmem %s119_s4, 16  ;;  %s5832_s2 = scalar_lea.vmem %s119_s4, 32 }
  0x4a   :  { %p5829_p5 = scmp.ne.s32.totalorder %s119_s4, %s5828_s30  ;;  %p5833_p6 = scmp.lt.s32.totalorder %s119_s4, %s119_s4 }
  0x4b   :  { %p5834_p7 = scmp.lt.s32.totalorder %s5832_s2, %s5828_s30 }
  0x4d   :  { %p5835_p8 = por %p5834_p7, %p5833_p6 }
  0x4f   :  { %p5836_p9 = pnand %p5835_p8, %p5829_p5 }
  0x51   :  { %5839 = shalt.err (!%p5836_p9)
}
  0x52   :  { %121 = dma.hbm_to_vmem [thread:$0]  %s8674_s13, 16, %s119_s4, [#allocation11]  }
  0x53   :  { %s6057_s3 = smov [#allocation13]   ;;  %s6058_s6 = smov [#allocation16]  }
  0x54   :  { %s139_s8 = sshll.u32 %s6057_s3, 4  ;;  %s162_s1 = sshll.u32 %s6058_s6, 4  ;;  %s140_s8 = int_to_ptr.vmem [resolvable:$true] %s139_s8  ;;  %s163_s1 = int_to_ptr.vmem [resolvable:$true] %s162_s1 }
  0x55   :  { %s5840_s21 = scalar_lea.hbm %s8677_s16, 2048 }
  0x56   :  { %p5841_p10 = scmp.ne.s32.totalorder %s8677_s16, %s5840_s21  ;;  %p5844_p11 = scmp.lt.u32.totalorder %s5840_s21, %s8677_s16 }
  0x58   :  { %p5846_p12 = pnand %p5844_p11, %p5841_p10 }
  0x5a   :  { %5849 = shalt.err (!%p5846_p12)
}
  0x5b   :  { %s5850_s13 = scalar_lea.vmem %s140_s8, 2048  ;;  %p5855_p0 = scmp.lt.s32.totalorder %s140_s8, %s140_s8 }
  0x5c   :  { %p5851_p13 = scmp.ne.s32.totalorder %s140_s8, %s5850_s13  ;;  %p5856_p1 = scmp.lt.s32.totalorder %s5850_s13, %s5850_s13 }
  0x5e   :  { %p5857_p2 = por %p5856_p1, %p5855_p0 }
  0x60   :  { %p5858_p3 = pnand %p5857_p2, %p5851_p13 }
  0x62   :  { %5861 = shalt.err (!%p5858_p3)
}
  0x63   :  { %145 = dma.hbm_to_vmem [thread:$0]  %s8677_s16, 2048, %s140_s8, [#allocation14], %s6053_s5, %s6053_s5, %s6054_s10  }
  0x64   :  { %s5862_s9 = scalar_lea.hbm %s8679_s18, 16 }
  0x65   :  { %p5863_p4 = scmp.ne.s32.totalorder %s8679_s18, %s5862_s9  ;;  %p5866_p5 = scmp.lt.u32.totalorder %s5862_s9, %s8679_s18 }
  0x67   :  { %p5868_p6 = pnand %p5866_p5, %p5863_p4 }
  0x69   :  { %5871 = shalt.err (!%p5868_p6)
}
  0x6a   :  { %s5872_s21 = scalar_lea.vmem %s163_s1, 16  ;;  %s5876_s25 = scalar_lea.vmem %s163_s1, 32 }
  0x6b   :  { %p5873_p7 = scmp.ne.s32.totalorder %s163_s1, %s5872_s21  ;;  %p5877_p8 = scmp.lt.s32.totalorder %s163_s1, %s163_s1 }
  0x6c   :  { %p5878_p9 = scmp.lt.s32.totalorder %s5876_s25, %s5872_s21 }
  0x6e   :  { %p5879_p10 = por %p5878_p9, %p5877_p8 }
  0x70   :  { %p5880_p11 = pnand %p5879_p10, %p5873_p7 }
  0x72   :  { %5883 = shalt.err (!%p5880_p11)
}
  0x73   :  { %165 = dma.hbm_to_vmem [thread:$0]  %s8679_s18, 16, %s163_s1, [#allocation17]  }
  0x74   :  { %s6059_s28 = smov [#allocation2]   ;;  %s8714_s4 = sld [smem:[#allocation29_spill]] }
  0x75   :  { %s45_s29 = sshll.u32 %s6059_s28, 4  ;;  %s46_s29 = int_to_ptr.vmem [resolvable:$true] %s45_s29 }
  0x7a   :  { %s5884_s30 = scalar_lea.hbm %s8714_s4, 1152 }
  0x7b   :  { %p5885_p12 = scmp.ne.s32.totalorder %s8714_s4, %s5884_s30  ;;  %p5888_p13 = scmp.lt.u32.totalorder %s5884_s30, %s8714_s4 }
  0x7d   :  { %p5890_p0 = pnand %p5888_p13, %p5885_p12 }
  0x7f   :  { %5893 = shalt.err (!%p5890_p0)
}
  0x80   :  { %s5894_s6 = scalar_lea.vmem %s46_s29, 1152  ;;  %p5899_p2 = scmp.lt.s32.totalorder %s46_s29, %s46_s29 }
  0x81   :  { %p5895_p1 = scmp.ne.s32.totalorder %s46_s29, %s5894_s6  ;;  %p5900_p3 = scmp.lt.s32.totalorder %s5894_s6, %s5894_s6 }
  0x83   :  { %p5901_p4 = por %p5900_p3, %p5899_p2 }
  0x85   :  { %p5902_p5 = pnand %p5901_p4, %p5895_p1 }
  0x87   :  { %5905 = shalt.err (!%p5902_p5)
}
  0x88   :  { %s6060_s18 = smov 128   ;;  %s6061_s1 = smov 8  }
  0x89   :  { %51 = dma.hbm_to_vmem [thread:$0]  %s8714_s4, 1152, %s46_s29, [#allocation3], %s6060_s18, %s6060_s18, %s6061_s1  }
  0x8a   :  { %s6062_s21 = smov [#allocation6]   ;;  %s6063_s16 = smov [#allocation9]  }
  0x8b   :  { %s79_s25 = sshll.u32 %s6062_s21, 4  ;;  %s105_s8 = sshll.u32 %s6063_s16, 4  ;;  %s80_s25 = int_to_ptr.vmem [resolvable:$true] %s79_s25  ;;  %s6286_s8 = int_to_ptr.vmem [resolvable:$true] %s105_s8 }
  0x8c   :  { %s8715_s13 = sld [smem:[#allocation36_spill]] }
  0x92   :  { %s5906_s30 = scalar_lea.hbm %s8715_s13, 512 }
  0x93   :  { %p5907_p6 = scmp.ne.s32.totalorder %s8715_s13, %s5906_s30  ;;  %p5910_p7 = scmp.lt.u32.totalorder %s5906_s30, %s8715_s13 }
  0x95   :  { %p5912_p8 = pnand %p5910_p7, %p5907_p6 }
  0x97   :  { %5915 = shalt.err (!%p5912_p8)
}
  0x98   :  { %s5916_s29 = scalar_lea.vmem %s80_s25, 512  ;;  %p5921_p10 = scmp.lt.s32.totalorder %s80_s25, %s80_s25 }
  0x99   :  { %p5917_p9 = scmp.ne.s32.totalorder %s80_s25, %s5916_s29  ;;  %p5922_p11 = scmp.lt.s32.totalorder %s5916_s29, %s5916_s29 }
  0x9b   :  { %p5923_p12 = por %p5922_p11, %p5921_p10 }
  0x9d   :  { %p5924_p13 = pnand %p5923_p12, %p5917_p9 }
  0x9f   :  { %5927 = shalt.err (!%p5924_p13)
}
  0xa0   :  { %85 = dma.hbm_to_vmem [thread:$0]  %s8715_s13, 512, %s80_s25, [#allocation5], %s6053_s5, %s6053_s5, %s6054_s10  }
  0xa1   :  { %s5928_s26 = scalar_lea.hbm %s8673_s12, 1024 }
  0xa2   :  { %p5929_p0 = scmp.ne.s32.totalorder %s8673_s12, %s5928_s26  ;;  %p5932_p1 = scmp.lt.u32.totalorder %s5928_s26, %s8673_s12 }
  0xa4   :  { %p5934_p2 = pnand %p5932_p1, %p5929_p0 }
  0xa6   :  { %5937 = shalt.err (!%p5934_p2)
}
  0xa7   :  { %s5938_s0 = scalar_lea.vmem %s6286_s8, 1024  ;;  %p5943_p4 = scmp.lt.s32.totalorder %s6286_s8, %s6286_s8 }
  0xa8   :  { %p5939_p3 = scmp.ne.s32.totalorder %s6286_s8, %s5938_s0  ;;  %p5944_p5 = scmp.lt.s32.totalorder %s5938_s0, %s5938_s0 }
  0xaa   :  { %p5945_p6 = por %p5944_p5, %p5943_p4 }
  0xac   :  { %p5946_p7 = pnand %p5945_p6, %p5939_p3 }
  0xae   :  { %5949 = shalt.err (!%p5946_p7)
}
  0xaf   :  { %111 = dma.hbm_to_vmem [thread:$0]  %s8673_s12, 1024, %s6286_s8, [#allocation8], %s6053_s5, %s6053_s5, %s6054_s10  }
  0xb0   :  { %s6064_s30 = smov [#allocation12]   ;;  %s6065_s7 = smov [#allocation15]  }
  0xb1   :  { %s128_s2 = sshll.u32 %s6064_s30, 4  ;;  %s152_s9 = sshll.u32 %s6065_s7, 4  ;;  %s129_s2 = int_to_ptr.vmem [resolvable:$true] %s128_s2  ;;  %s153_s9 = int_to_ptr.vmem [resolvable:$true] %s152_s9 }
  0xb2   :  { %s5950_s4 = scalar_lea.hbm %s8675_s14, 16 }
  0xb3   :  { %p5951_p8 = scmp.ne.s32.totalorder %s8675_s14, %s5950_s4  ;;  %p5954_p9 = scmp.lt.u32.totalorder %s5950_s4, %s8675_s14 }
  0xb5   :  { %p5956_p10 = pnand %p5954_p9, %p5951_p8 }
  0xb7   :  { %5959 = shalt.err (!%p5956_p10)
}
  0xb8   :  { %s5960_s12 = scalar_lea.vmem %s129_s2, 16  ;;  %s5964_s8 = scalar_lea.vmem %s129_s2, 32 }
  0xb9   :  { %p5961_p11 = scmp.ne.s32.totalorder %s129_s2, %s5960_s12  ;;  %p5965_p12 = scmp.lt.s32.totalorder %s129_s2, %s129_s2 }
  0xba   :  { %p5966_p13 = scmp.lt.s32.totalorder %s5964_s8, %s5960_s12 }
  0xbc   :  { %p5967_p0 = por %p5966_p13, %p5965_p12 }
  0xbe   :  { %p5968_p1 = pnand %p5967_p0, %p5961_p11 }
  0xc0   :  { %5971 = shalt.err (!%p5968_p1)
}
  0xc1   :  { %131 = dma.hbm_to_vmem [thread:$0]  %s8675_s14, 16, %s129_s2, [#allocation11]  }
  0xc2   :  { %s5972_s0 = scalar_lea.hbm %s8678_s17, 16 }
  0xc3   :  { %p5973_p2 = scmp.ne.s32.totalorder %s8678_s17, %s5972_s0  ;;  %p5976_p3 = scmp.lt.u32.totalorder %s5972_s0, %s8678_s17 }
  0xc5   :  { %p5978_p4 = pnand %p5976_p3, %p5973_p2 }
  0xc7   :  { %5981 = shalt.err (!%p5978_p4)
}
  0xc8   :  { %s5982_s3 = scalar_lea.vmem %s153_s9, 16  ;;  %s5986_s29 = scalar_lea.vmem %s153_s9, 32 }
  0xc9   :  { %p5983_p5 = scmp.ne.s32.totalorder %s153_s9, %s5982_s3  ;;  %p5987_p6 = scmp.lt.s32.totalorder %s153_s9, %s153_s9 }
  0xca   :  { %p5988_p7 = scmp.lt.s32.totalorder %s5986_s29, %s5982_s3 }
  0xcc   :  { %p5989_p8 = por %p5988_p7, %p5987_p6 }
  0xce   :  { %p5990_p9 = pnand %p5989_p8, %p5983_p5 }
  0xd0   :  { %5993 = shalt.err (!%p5990_p9)
}
  0xd1   :  { %155 = dma.hbm_to_vmem [thread:$0]  %s8678_s17, 16, %s153_s9, [#allocation14]  }
  0xd2   :  { %s6066_s4 = smov [#allocation18]   ;;  %s6067_s18 = smov [#allocation19]  }
  0xd3   :  { %s177_s6 = sshll.u32 %s6066_s4, 4  ;;  %s190_s1 = sshll.u32 %s6067_s18, 4  ;;  %s178_s6 = int_to_ptr.vmem [resolvable:$true] %s177_s6  ;;  %s191_s1 = int_to_ptr.vmem [resolvable:$true] %s190_s1 }
  0xd4   :  { %s5994_s8 = scalar_lea.hbm %s8683_s22, 8192 }
  0xd5   :  { %p5995_p10 = scmp.ne.s32.totalorder %s8683_s22, %s5994_s8  ;;  %p5998_p11 = scmp.lt.u32.totalorder %s5994_s8, %s8683_s22 }
  0xd7   :  { %p6000_p12 = pnand %p5998_p11, %p5995_p10 }
  0xd9   :  { %6003 = shalt.err (!%p6000_p12)
}
  0xda   :  { %s6004_s17 = scalar_lea.vmem %s178_s6, 8192  ;;  %p6009_p0 = scmp.lt.s32.totalorder %s178_s6, %s178_s6 }
  0xdb   :  { %p6005_p13 = scmp.ne.s32.totalorder %s178_s6, %s6004_s17  ;;  %p6010_p1 = scmp.lt.s32.totalorder %s6004_s17, %s6004_s17 }
  0xdd   :  { %p6011_p2 = por %p6010_p1, %p6009_p0 }
  0xdf   :  { %p6012_p3 = pnand %p6011_p2, %p6005_p13 }
  0xe1   :  { %6015 = shalt.err (!%p6012_p3)
}
  0xe2   :  { %183 = dma.hbm_to_vmem [thread:$0]  %s8683_s22, 8192, %s178_s6, [#allocation17], %s6053_s5, %s6053_s5, %s6054_s10  }
  0xe3   :  { %s6016_s30 = scalar_lea.hbm %s8684_s23, 32 }
  0xe4   :  { %p6017_p4 = scmp.ne.s32.totalorder %s8684_s23, %s6016_s30  ;;  %p6020_p5 = scmp.lt.u32.totalorder %s6016_s30, %s8684_s23 }
  0xe6   :  { %p6022_p6 = pnand %p6020_p5, %p6017_p4 }
  0xe8   :  { %6025 = shalt.err (!%p6022_p6)
}
  0xe9   :  { %s6026_s2 = scalar_lea.vmem %s191_s1, 32  ;;  %p6031_p8 = scmp.lt.s32.totalorder %s191_s1, %s191_s1 }
  0xea   :  { %p6027_p7 = scmp.ne.s32.totalorder %s191_s1, %s6026_s2  ;;  %p6032_p9 = scmp.lt.s32.totalorder %s6026_s2, %s6026_s2 }
  0xec   :  { %p6033_p10 = por %p6032_p9, %p6031_p8 }
  0xee   :  { %p6034_p11 = pnand %p6033_p10, %p6027_p7 }
  0xf0   :  { %6037 = shalt.err (!%p6034_p11)
}
  0xf1   :  { %193 = dma.hbm_to_vmem [thread:$0]  %s8684_s23, 32, %s191_s1, [#allocation20]  }
  0xf2   :  { %6038 = dma.done.wait [#allocation3], 1152  }
  0xf3   :  { %6039 = vsyncadd [#allocation3], 4294966144 }
  0xf4   :  { %6040 = dma.done.wait [#allocation5], 12800  }
  0xf5   :  { %6041 = vsyncadd [#allocation5], 4294954496 }
  0xf6   :  { %6042 = dma.done.wait [#allocation8], 1040  }
  0xf7   :  { %6043 = vsyncadd [#allocation8], 4294966256 }
  0xf8   :  { %6044 = dma.done.wait [#allocation11], 32  }
  0xf9   :  { %6045 = vsyncadd [#allocation11], 4294967264 }
  0xfa   :  { %6046 = dma.done.wait [#allocation14], 2064  }
  0xfb   :  { %6047 = vsyncadd [#allocation14], 4294965232 }
  0xfc   :  { %6048 = dma.done.wait [#allocation17], 8208  }
  0xfd   :  { %6049 = vsyncadd [#allocation17], 4294959088 }
  0xfe   :  { %6050 = dma.done.wait [#allocation20], 32  }
  0xff   :  { %6051 = vsyncadd [#allocation20], 4294967264  ;;  %v6068_v0 = vmov 0.0|0.0   ;;  %vm6069_vm0 = vmmov 0   ;;  %v6070_v1 = vmov 0.0   ;;  %s8716_s4 = sld [smem:[#allocation28_spill]] }
 0x100   :  { %4749 = vmatprep.subr.bf16.mxu1 %v6068_v0  ;;  %4722 = vmatprep.mubr.msk.f32.mxu1 %vm6069_vm0, %v6070_v1  ;;  %s8717_s27 = sld [smem:[#allocation30_spill]]  ;;  %vm240_vm1 = vcmask 195584   ;;  %v349_v9 = vld [vmem:[#allocation2 + $0x18] sm:$0xff]  ;;  %v237_v10 = vld [vmem:[#allocation2] sm:$0xff]  ;;  %v238_v19 = vld [vmem:[#allocation2 + $0x8] sm:$0xff]  ;;  %vm460_vm2 = vcmask 588800  }
 0x101   :  { %4746 = vmatprep.subr.bf16.mxu0 %v6068_v0  ;;  %4707 = vmatprep.mubr.msk.f32.mxu0 %vm6069_vm0, %v6070_v1  ;;  %v350_v18 = vld [vmem:[#allocation2 + $0x20] sm:$0xff]  ;;  %v351_v24 = vld [vmem:[#allocation2 + $0x28] sm:$0xff]  ;;  %v239_v27 = vld [vmem:[#allocation2 + $0x10] sm:$0xff]  ;;  %s8718_s25 = sld [smem:[#allocation35_spill]]  ;;  %vm887_vm3 = vcmask 523264   ;;  %s8719_s0 = sld [smem:[#allocation37_spill]] }
 0x102   :  { %v646_v35 = vld [vmem:[#allocation2 + $0x30] sm:$0xff]  ;;  %v647_v37 = vld [vmem:[#allocation2 + $0x38] sm:$0xff]  ;;  %v648_v40 = vld [vmem:[#allocation2 + $0x40] sm:$0xff]  ;;  %vm1086_vm4 = vcmask 130048   ;;  %s8720_s7 = sld [smem:[#allocation31_spill]]  ;;  %vm1731_vm5 = vcmask 1045504  }
 0x103   :  { %vm1740_vm6 = vcmask 785408   ;;  %vm1742_vm7 = vcmask 783360   ;;  %vm1938_vm8 = vcmask 261120   ;;  %vm6071_vm9 = vmmov 1   ;;  %s8721_s18 = sld [smem:[#allocation34_spill]]  ;;  %s8722_s21 = sld [smem:[#allocation33_spill]] }
 0x104   :  { %vm5088_vm10 = vmpackc.low %vm1731_vm5, %vm6071_vm9  ;;  %vm2116_vm11 = vcmask 113664   ;;  %vm2931_vm12 = vcmask 64512   ;;  %s8724_s5 = sld [smem:[#allocation40_spill]]  ;;  %vm4223_vm13 = vcmask 1041408   ;;  %vm4224_vm14 = vcmask 1043458   ;;  %s8725_s10 = sld [smem:[#allocation41_spill]] }
 0x105   :  { %v234_v2 = vld [vmem:[%s8716_s4] sm:$0xff]  ;;  %v235_v3 = vld [vmem:[%s8716_s4 + $0x8] sm:$0xff]  ;;  %v236_v5 = vld [vmem:[%s8716_s4 + $0x10] sm:$0xff] }
 0x106   :  { %v4747_v4 = vpack.c.bf16 %v235_v3, %v234_v2  ;;  %v4247_v6 = vld [vmem:[%s8717_s27 + $0x98] sm:$0xff]  ;;  %v4249_v7 = vld [vmem:[%s8717_s27 + $0xa8] sm:$0xff]  ;;  %v4246_v8 = vld [vmem:[%s8717_s27 + $0x90] sm:$0xff] }
 0x107   :  { %v4248_v11 = vld [vmem:[%s8717_s27 + $0xa0] sm:$0xff]  ;;  %v4752_v12 = vpack.c.bf16 %v4249_v7, %v4247_v6  ;;  %v4251_v14 = vld [vmem:[%s8717_s27 + $0xb8] sm:$0xff]  ;;  %v4253_v15 = vld [vmem:[%s8717_s27 + $0xc8] sm:$0xff] }
 0x108   :  { %4751 = vmatpush3.bf16.msra.mxu1 %v4747_v4  ;;  %4748 = vmatpush3.bf16.msra.mxu0 %v4747_v4  ;;  %v4754_v13 = vpack.c.bf16 %v4248_v11, %v4246_v8  ;;  %v4250_v16 = vld [vmem:[%s8717_s27 + $0xb0] sm:$0xff]  ;;  %v4252_v17 = vld [vmem:[%s8717_s27 + $0xc0] sm:$0xff]  ;;  %v4756_v20 = vpack.c.bf16 %v4253_v15, %v4251_v14  ;;  %v4255_v21 = vld [vmem:[%s8717_s27 + $0xd8] sm:$0xff] }
 0x109   :  { %4720 = vmatprep.subr.mxu1 %v6070_v1  ;;  %4705 = vmatprep.subr.mxu0 %v6070_v1  ;;  %v4257_v22 = vld [vmem:[%s8717_s27 + $0xe8] sm:$0xff]  ;;  %v4758_v23 = vpack.c.bf16 %v4252_v17, %v4250_v16  ;;  %v4254_v25 = vld [vmem:[%s8717_s27 + $0xd0] sm:$0xff]  ;;  %v4256_v26 = vld [vmem:[%s8717_s27 + $0xe0] sm:$0xff] }
 0x10a   :  { %v4760_v28 = vpack.c.bf16 %v4257_v22, %v4255_v21  ;;  %v4259_v29 = vld [vmem:[%s8717_s27 + $0xf8] sm:$0xff]  ;;  %v4261_v30 = vld [vmem:[%s8717_s27 + $0x108] sm:$0xff]  ;;  %v4762_v31 = vpack.c.bf16 %v4256_v26, %v4254_v25  ;;  %v4258_v33 = vld [vmem:[%s8717_s27 + $0xf0] sm:$0xff] }
 0x10b   :  { %v4764_v32 = vpack.c.bf16 %v4261_v30, %v4259_v29  ;;  %v4260_v34 = vld [vmem:[%s8717_s27 + $0x100] sm:$0xff]  ;;  %v4263_v38 = vld [vmem:[%s8717_s27 + $0x118] sm:$0xff]  ;;  %v4262_v39 = vld [vmem:[%s8717_s27 + $0x110] sm:$0xff] }
 0x10c   :  { %4721 = vmatpush3.msra.mxu1 %v236_v5  ;;  %4706 = vmatpush3.msra.mxu0 %v236_v5  ;;  %v4766_v36 = vpack.c.bf16 %v4260_v34, %v4258_v33  ;;  %v331_v41 = vld [vmem:[%s8717_s27 + $0x8] sm:$0xff]  ;;  %v333_v42 = vld [vmem:[%s8717_s27 + $0x18] sm:$0xff]  ;;  %v330_v44 = vld [vmem:[%s8717_s27] sm:$0xff] }
 0x10d   :  { %4723 = vmatmul.mubr.msk.f32.vlgmr.msra.gmra.mrb[0].mxu1 %vm240_vm1, %v349_v9  ;;  %4708 = vmatmul.mubr.msk.f32.vlgmr.msra.gmra.mrb[0].mxu0 %vm240_vm1, %v237_v10  ;;  %v4768_v43 = vpack.c.bf16 %v333_v42, %v331_v41  ;;  %v332_v45 = vld [vmem:[%s8717_s27 + $0x10] sm:$0xff]  ;;  %v335_v46 = vld [vmem:[%s8717_s27 + $0x28] sm:$0xff]  ;;  %v337_v47 = vld [vmem:[%s8717_s27 + $0x38] sm:$0xff] }
 0x10e   :  { %4725 = vmatprep.mubr.msk.f32.mxu1 %vm6069_vm0, %v6070_v1  ;;  %4710 = vmatprep.mubr.msk.f32.mxu0 %vm6069_vm0, %v6070_v1  ;;  %v4770_v48 = vpack.c.bf16 %v332_v45, %v330_v44  ;;  %v4772_v49 = vpack.c.bf16 %v337_v47, %v335_v46  ;;  %v334_v50 = vld [vmem:[%s8717_s27 + $0x20] sm:$0xff]  ;;  %v336_v51 = vld [vmem:[%s8717_s27 + $0x30] sm:$0xff]  ;;  %v339_v53 = vld [vmem:[%s8717_s27 + $0x48] sm:$0xff] }
 0x10f   :  { %4784 = vmatprep.subr.bf16.mxu1 %v6068_v0  ;;  %4753 = vmatprep.subr.bf16.mxu0 %v4752_v12  ;;  %v341_v54 = vld [vmem:[%s8717_s27 + $0x58] sm:$0xff]  ;;  %v4774_v58 = vpack.c.bf16 %v336_v51, %v334_v50  ;;  %v338_v60 = vld [vmem:[%s8717_s27 + $0x40] sm:$0xff]  ;;  %v340_v61 = vld [vmem:[%s8717_s27 + $0x50] sm:$0xff] }
 0x110   :  { %4786 = vmatpush3.bf16.msra.mxu1 %v4747_v4  ;;  %4755 = vmatpush1.bf16.msra.mxu0 %v4754_v13  ;;  %v4776_v59 = vpack.c.bf16 %v341_v54, %v339_v53  ;;  %v343_v63 = vld [vmem:[%s8717_s27 + $0x68] sm:$0xff]  ;;  %v345_v2 = vld [vmem:[%s8717_s27 + $0x78] sm:$0xff]  ;;  %v4778_v6 = vpack.c.bf16 %v340_v61, %v338_v60  ;;  %v342_v8 = vld [vmem:[%s8717_s27 + $0x60] sm:$0xff] }
 0x111   :  { %4726 = vmatmul.mubr.msk.f32.gmra.mrb[2].mxu1 %vm240_vm1, %v350_v18  ;;  %4711 = vmatmul.mubr.msk.f32.gmra.mrb[2].mxu0 %vm240_vm1, %v238_v19  ;;  %v4780_v7 = vpack.c.bf16 %v345_v2, %v343_v63  ;;  %v344_v9 = vld [vmem:[%s8717_s27 + $0x70] sm:$0xff]  ;;  %v347_v15 = vld [vmem:[%s8717_s27 + $0x88] sm:$0xff]  ;;  %v4276_v17 = vld [vmem:[%s8717_s27 + $0x138] sm:$0xff] }
 0x112   :  { %4728 = vmatprep.mubr.msk.f32.mxu1 %vm6069_vm0, %v6070_v1  ;;  %4713 = vmatprep.mubr.msk.f32.mxu0 %vm6069_vm0, %v6070_v1  ;;  %v4782_v14 = vpack.c.bf16 %v344_v9, %v342_v8  ;;  %v4274_v16 = vld [vmem:[%s8717_s27 + $0x128] sm:$0xff]  ;;  %v4273_v19 = vld [vmem:[%s8717_s27 + $0x120] sm:$0xff]  ;;  %v4279_v30 = vld [vmem:[%s8717_s27 + $0x150] sm:$0xff] }
 0x113   :  { %4735 = vmatprep.subr.mxu1 %v6070_v1  ;;  %4757 = vmatprep.subr.bf16.mxu0 %v4756_v20  ;;  %v4275_v20 = vld [vmem:[%s8717_s27 + $0x130] sm:$0xff]  ;;  %v4278_v22 = vld [vmem:[%s8717_s27 + $0x148] sm:$0xff]  ;;  %v4787_v25 = vpack.c.bf16 %v4276_v17, %v4274_v16  ;;  %v4277_v29 = vld [vmem:[%s8717_s27 + $0x140] sm:$0xff] }
 0x114   :  { %4736 = vmatpush3.msra.mxu1 %v236_v5  ;;  %4759 = vmatpush1.bf16.msra.mxu0 %v4758_v23  ;;  %v4280_v23 = vld [vmem:[%s8717_s27 + $0x158] sm:$0xff]  ;;  %v4789_v26 = vpack.c.bf16 %v4275_v20, %v4273_v19  ;;  %v4793_v34 = vpack.c.bf16 %v4279_v30, %v4277_v29  ;;  %v4285_v44 = vld [vmem:[%s8717_s27 + $0x180] sm:$0xff]  ;;  %v4287_v45 = vld [vmem:[%s8717_s27 + $0x190] sm:$0xff] }
 0x115   :  { %4729 = vmatmul.mubr.msk.f32.gmra.mrb[4].mxu1 %vm240_vm1, %v351_v24  ;;  %4714 = vmatmul.mubr.msk.f32.gmra.mrb[4].mxu0 %vm240_vm1, %v239_v27  ;;  %v346_v24 = vld [vmem:[%s8717_s27 + $0x80] sm:$0xff]  ;;  %v4284_v33 = vld [vmem:[%s8717_s27 + $0x178] sm:$0xff]  ;;  %v4801_v46 = vpack.c.bf16 %v4287_v45, %v4285_v44  ;;  %v4290_v47 = vld [vmem:[%s8717_s27 + $0x1a8] sm:$0xff] }
 0x116   :  { %4737 = vmatprep.mubr.msk.f32.mxu1 %vm6069_vm0, %v6070_v1  ;;  %4761 = vmatprep.subr.bf16.mxu0 %v4760_v28  ;;  %v4791_v28 = vpack.c.bf16 %v4280_v23, %v4278_v22  ;;  %v4288_v41 = vld [vmem:[%s8717_s27 + $0x198] sm:$0xff]  ;;  %v4289_v50 = vld [vmem:[%s8717_s27 + $0x1a0] sm:$0xff]  ;;  %v865_v2 = vld [vmem:[%s8718_s25 + $0x50] sm:$0xff] }
 0x117   :  { %534 = vmatprep.mubr.f32.mxu0 %v6070_v1  ;;  %v858_v53 = vld [vmem:[%s8718_s25 + $0x18] sm:$0xff]  ;;  %v863_v61 = vld [vmem:[%s8718_s25 + $0x40] sm:$0xff]  ;;  %v869_v8 = vld [vmem:[%s8718_s25 + $0x70] sm:$0xff] }
 0x118   :  { %4763 = vmatpush1.bf16.msra.mxu0 %v4762_v31  ;;  %v870_v9 = vld [vmem:[%s8718_s25 + $0x78] sm:$0xff]  ;;  %v875_v17 = vld [vmem:[%s8718_s25 + $0xa0] sm:$0xff]  ;;  %v877_v20 = vld [vmem:[%s8718_s25 + $0xb0] sm:$0xff] }
 0x119   :  { %4738 = vmatmul.mubr.msk.f32.vlgmr.msra.gmra.mrb[6].mxu1 %vm240_vm1, %v646_v35  ;;  %4765 = vmatprep.subr.bf16.mxu0 %v4764_v32  ;;  %v4282_v32 = vld [vmem:[%s8717_s27 + $0x168] sm:$0xff]  ;;  %vm4225_vm15 = vmor %vm4224_vm14, %vm4223_vm13 }
 0x11a   :  { %4740 = vmatprep.mubr.msk.f32.mxu1 %vm6069_vm0, %v6070_v1 }
 0x11c   :  { %4767 = vmatpush1.bf16.msra.mxu0 %v4766_v36  ;;  %v4795_v36 = vpack.c.bf16 %v4284_v33, %v4282_v32 }
 0x11d   :  { %4741 = vmatmul.mubr.msk.f32.gmra.mrb[8].mxu1 %vm240_vm1, %v647_v37  ;;  %486 = vmatprep.subr.mxu0 %v4263_v38  ;;  %v4281_v37 = vld [vmem:[%s8717_s27 + $0x160] sm:$0xff]  ;;  %v4283_v38 = vld [vmem:[%s8717_s27 + $0x170] sm:$0xff] }
 0x11e   :  { %4743 = vmatprep.mubr.msk.f32.mxu1 %vm6069_vm0, %v6070_v1  ;;  %v4797_v42 = vpack.c.bf16 %v4283_v38, %v4281_v37  ;;  %vm4226_vm0 = vcmask 259076  }
 0x120   :  { %487 = vmatpush1.msra.mxu0 %v4262_v39 }
 0x121   :  { %4744 = vmatmul.mubr.msk.f32.gmra.mrb[10].mxu1 %vm240_vm1, %v648_v40  ;;  %4769 = vmatprep.subr.bf16.mxu0 %v4768_v43  ;;  %v4286_v40 = vld [vmem:[%s8717_s27 + $0x188] sm:$0xff] }
 0x122   :  { %1154 = vmatprep.mubr.f32.mxu1 %v6070_v1  ;;  %v4799_v43 = vpack.c.bf16 %v4288_v41, %v4286_v40 }
 0x1e0   :  { %v427_v52 = vpop.f32.mrb[0].mxu1  ;;  %v316_v55 = vpop.f32.mrb[0].mxu0 }
 0x1e1   :  { %v4724_v56 = vpop.f32.mrb[1].mxu1  ;;  %4264 = vmatmul.mubr.msk.f32.vlgmr.msra.gmra.mrb[6].mxu0 %vm460_vm2, %v427_v52  ;;  %v4709_v57 = vpop.f32.mrb[1].mxu0  ;;  %v857_v52 = vld [vmem:[%s8718_s25 + $0x10] sm:$0xff] }
 0x1e2   :  { %4771 = vmatpush1.bf16.msra.mxu0 %v4770_v48  ;;  %540 = vmatprep.mubr.f32.mxu0 %v6070_v1  ;;  %v855_v48 = vld [vmem:[%s8718_s25] sm:$0xff]  ;;  %v6610_v54 = vpack.c.bf16 %v858_v53, %v857_v52  ;;  %v860_v56 = vld [vmem:[%s8718_s25 + $0x28] sm:$0xff] }
 0x1e3   :  { %4773 = vmatprep.subr.bf16.mxu0 %v4772_v49  ;;  %v856_v49 = vld [vmem:[%s8718_s25 + $0x8] sm:$0xff] }
 0x1e4   :  { %v432_v62 = vpop.f32.mrb[2].mxu1  ;;  %v321_v3 = vpop.f32.mrb[2].mxu0  ;;  %v6598_v51 = vpack.c.bf16 %v856_v49, %v855_v48 }
 0x1e5   :  { %v4727_v4 = vpop.f32.mrb[3].mxu1  ;;  %4265 = vmatmul.mubr.msk.f32.gmra.mrb[8].mxu0 %vm460_vm2, %v432_v62  ;;  %v4712_v5 = vpop.f32.mrb[3].mxu0  ;;  %v864_v62 = vld [vmem:[%s8718_s25 + $0x48] sm:$0xff] }
 0x1e6   :  { %4775 = vmatpush1.bf16.msra.mxu0 %v4774_v58  ;;  %546 = vmatprep.mubr.f32.mxu0 %v6070_v1  ;;  %v861_v58 = vld [vmem:[%s8718_s25 + $0x30] sm:$0xff]  ;;  %v6643_v63 = vpack.c.bf16 %v864_v62, %v863_v61  ;;  %v867_v5 = vld [vmem:[%s8718_s25 + $0x60] sm:$0xff] }
 0x1e7   :  { %4777 = vmatprep.subr.bf16.mxu0 %v4776_v59  ;;  %v862_v59 = vld [vmem:[%s8718_s25 + $0x38] sm:$0xff] }
 0x1e8   :  { %v437_v10 = vpop.f32.mrb[4].mxu1  ;;  %v326_v11 = vpop.f32.mrb[4].mxu0  ;;  %v6633_v60 = vpack.c.bf16 %v862_v59, %v861_v58 }
 0x1e9   :  { %v4730_v12 = vpop.f32.mrb[5].mxu1  ;;  %4266 = vmatmul.mubr.msk.f32.gmra.mrb[10].mxu0 %vm460_vm2, %v437_v10  ;;  %v4715_v13 = vpop.f32.mrb[5].mxu0  ;;  %v6674_v10 = vpack.c.bf16 %v870_v9, %v869_v8 }
 0x1ea   :  { %4779 = vmatpush1.bf16.msra.mxu0 %v4778_v6  ;;  %626 = vmatprep.mubr.f32.mxu0 %v6070_v1  ;;  %v868_v6 = vld [vmem:[%s8718_s25 + $0x68] sm:$0xff] }
 0x1eb   :  { %4781 = vmatprep.subr.bf16.mxu0 %v4780_v7  ;;  %v6664_v7 = vpack.c.bf16 %v868_v6, %v867_v5  ;;  %v872_v12 = vld [vmem:[%s8718_s25 + $0x88] sm:$0xff] }
 0x1ec   :  { %v724_v18 = vpop.f32.mrb[6].mxu1 }
 0x1ed   :  { %v4739_v21 = vpop.f32.mrb[7].mxu1 }
 0x1ee   :  { %4783 = vmatpush1.bf16.msra.mxu0 %v4782_v14  ;;  %v873_v14 = vld [vmem:[%s8718_s25 + $0x90] sm:$0xff]  ;;  %v878_v21 = vld [vmem:[%s8718_s25 + $0xb8] sm:$0xff] }
 0x1ef   :  { %578 = vmatprep.subr.mxu0 %v347_v15  ;;  %v874_v15 = vld [vmem:[%s8718_s25 + $0x98] sm:$0xff]  ;;  %v6714_v22 = vpack.c.bf16 %v878_v21, %v877_v20 }
 0x1f0   :  { %v729_v27 = vpop.f32.mrb[8].mxu1  ;;  %v6694_v16 = vpack.c.bf16 %v874_v15, %v873_v14  ;;  %v1082_v14 = vld [vmem:[#allocation6] sm:$0xff]  ;;  %v1084_v15 = vld [vmem:[#allocation6 + $0x10] sm:$0xff] }
 0x1f1   :  { %v4742_v31 = vpop.f32.mrb[9].mxu1 }
 0x1f2   :  { %579 = vmatpush1.msra.mxu0 %v346_v24 }
 0x1f3   :  { %4788 = vmatprep.subr.bf16.mxu0 %v4787_v25  ;;  %4267 = vmatmul.mubr.msk.f32.vlgmr.msra.gmra.mrb[6].mxu0 %vm460_vm2, %v316_v55  ;;  %v859_v55 = vld [vmem:[%s8718_s25 + $0x20] sm:$0xff] }
 0x1f4   :  { %4790 = vmatpush1.bf16.msra.mxu0 %v4789_v26  ;;  %632 = vmatprep.mubr.f32.mxu0 %v6070_v1  ;;  %v734_v35 = vpop.f32.mrb[10].mxu1  ;;  %v6622_v57 = vpack.c.bf16 %v860_v56, %v859_v55 }
 0x1f5   :  { %4792 = vmatprep.subr.bf16.mxu0 %v4791_v28  ;;  %v4745_v39 = vpop.f32.mrb[11].mxu1 }
 0x1f7   :  { %4268 = vmatmul.mubr.msk.f32.gmra.mrb[8].mxu0 %vm460_vm2, %v321_v3  ;;  %v866_v3 = vld [vmem:[%s8718_s25 + $0x58] sm:$0xff] }
 0x1f8   :  { %4794 = vmatpush1.bf16.msra.mxu0 %v4793_v34  ;;  %638 = vmatprep.mubr.f32.mxu0 %v6070_v1  ;;  %v6653_v4 = vpack.c.bf16 %v866_v3, %v865_v2 }
 0x1f9   :  { %4796 = vmatprep.subr.bf16.mxu0 %v4795_v36 }
 0x1fb   :  { %4269 = vmatmul.mubr.msk.f32.gmra.mrb[10].mxu0 %vm460_vm2, %v326_v11  ;;  %v871_v11 = vld [vmem:[%s8718_s25 + $0x80] sm:$0xff] }
 0x1fc   :  { %4798 = vmatpush1.bf16.msra.mxu0 %v4797_v42  ;;  %830 = vmatprep.mubr.f32.mxu0 %v6070_v1  ;;  %v6684_v13 = vpack.c.bf16 %v872_v12, %v871_v11 }
 0x1fd   :  { %4800 = vmatprep.subr.bf16.mxu0 %v4799_v43 }
 0x200   :  { %4802 = vmatpush1.bf16.msra.mxu0 %v4801_v46 }
 0x201   :  { %782 = vmatprep.subr.mxu0 %v4290_v47 }
 0x204   :  { %783 = vmatpush1.msra.mxu0 %v4289_v50 }
 0x205   :  { %4291 = vmatmul.mubr.msk.f32.vlgmr.msra.gmra.mrb[6].mxu0 %vm460_vm2, %v724_v18  ;;  %4803 = vmatprep.subr.bf16.mxu0 %v6068_v0  ;;  %v876_v18 = vld [vmem:[%s8718_s25 + $0xa8] sm:$0xff] }
 0x206   :  { %836 = vmatprep.mubr.f32.mxu0 %v6070_v1  ;;  %4805 = vmatpush1.bf16.msra.mxu0 %v6598_v51  ;;  %v6704_v19 = vpack.c.bf16 %v876_v18, %v875_v17 }
 0x207   :  { %4806 = vmatprep.subr.bf16.mxu0 %v6068_v0 }
 0x209   :  { %4292 = vmatmul.mubr.msk.f32.gmra.mrb[8].mxu0 %vm460_vm2, %v729_v27 }
 0x20a   :  { %842 = vmatprep.mubr.f32.mxu0 %v6070_v1  ;;  %4808 = vmatpush1.bf16.msra.mxu0 %v6610_v54 }
 0x20b   :  { %4809 = vmatprep.subr.bf16.mxu0 %v6068_v0 }
 0x20d   :  { %4293 = vmatmul.mubr.msk.f32.gmra.mrb[10].mxu0 %vm460_vm2, %v734_v35 }
 0x20e   :  { %4811 = vmatpush1.bf16.msra.mxu0 %v6622_v57 }
 0x20f   :  { %4812 = vmatprep.subr.bf16.mxu0 %v6068_v0 }
 0x212   :  { %4814 = vmatpush1.bf16.msra.mxu0 %v6633_v60 }
 0x213   :  { %4815 = vmatprep.subr.bf16.mxu0 %v6068_v0 }
 0x216   :  { %4817 = vmatpush1.bf16.msra.mxu0 %v6643_v63 }
 0x217   :  { %4818 = vmatprep.subr.bf16.mxu0 %v6068_v0 }
 0x21a   :  { %4820 = vmatpush1.bf16.msra.mxu0 %v6653_v4 }
 0x21b   :  { %4821 = vmatprep.subr.bf16.mxu0 %v6068_v0 }
 0x21e   :  { %4823 = vmatpush1.bf16.msra.mxu0 %v6664_v7 }
 0x21f   :  { %4824 = vmatprep.subr.bf16.mxu0 %v6068_v0 }
 0x222   :  { %4826 = vmatpush1.bf16.msra.mxu0 %v6674_v10 }
 0x223   :  { %4827 = vmatprep.subr.bf16.mxu0 %v6068_v0 }
 0x226   :  { %4829 = vmatpush1.bf16.msra.mxu0 %v6684_v13 }
 0x227   :  { %4830 = vmatprep.subr.bf16.mxu0 %v6068_v0 }
 0x22a   :  { %4832 = vmatpush1.bf16.msra.mxu0 %v6694_v16 }
 0x22b   :  { %4833 = vmatprep.subr.bf16.mxu0 %v6068_v0 }
 0x22e   :  { %4835 = vmatpush1.bf16.msra.mxu0 %v6704_v19 }
 0x22f   :  { %4836 = vmatprep.subr.bf16.mxu0 %v6068_v0 }
 0x232   :  { %4838 = vmatpush1.bf16.msra.mxu0 %v6714_v22 }
 0x233   :  { %4839 = vmatprep.subr.bf16.mxu0 %v6068_v0 }
 0x2d8   :  { %v6718_v23 = vpop.f32.mrb[6].mxu0 }
 0x2d9   :  { %v6720_v24 = vpop.f32.mrb[7].mxu0  ;;  %v972_v27 = vmul.f32 %v6718_v23, %v6718_v23 }
 0x2da   :  { %v973_v25 = vmul.f32 %v6720_v24, %v6720_v24  ;;  %v888_v31 = vsel %vm887_vm3, %v6720_v24, 0.0 }
 0x2dc   :  { %v6724_v26 = vpop.f32.mrb[8].mxu0  ;;  %v986_v36 = vsel %vm887_vm3, %v973_v25, 0.0 }
 0x2dd   :  { %v879_v28 = vadd.f32 %v6724_v26, %v6718_v23  ;;  %v974_v29 = vmul.f32 %v6724_v26, %v6724_v26  ;;  %v6732_v30 = vpop.f32.mrb[9].mxu0 }
 0x2de   :  { %v889_v32 = vsel %vm887_vm3, %v6732_v30, 0.0  ;;  %v975_v33 = vmul.f32 %v6732_v30, %v6732_v30 }
 0x2df   :  { %v978_v34 = vadd.f32 %v974_v29, %v972_v27  ;;  %v890_v35 = vadd.f32 %v889_v32, %v888_v31  ;;  %v1075_v31 = vld [vmem:[%s8719_s0] sm:$0x1]  ;;  %s8723_s0 = sld [smem:[#allocation39_spill]] }
 0x2e0   :  { %v987_v37 = vsel %vm887_vm3, %v975_v33, 0.0  ;;  %v6742_v38 = vpop.f32.mrb[10].mxu0 }
 0x2e1   :  { %v988_v39 = vadd.f32 %v987_v37, %v986_v36  ;;  %v880_v40 = vadd.f32 %v879_v28, %v6742_v38  ;;  %v976_v41 = vmul.f32 %v6742_v38, %v6742_v38  ;;  %v6747_v42 = vpop.f32.mrb[11].mxu0  ;;  %v1235_v37 = vlaneseq }
 0x2e2   :  { %v891_v43 = vsel %vm887_vm3, %v6747_v42, 0.0  ;;  %v977_v44 = vmul.f32 %v6747_v42, %v6747_v42 }
 0x2e3   :  { %v881_v45 = vrot.slane %v880_v40, 4  ;;  %v979_v46 = vadd.f32 %v978_v34, %v976_v41  ;;  %v892_v47 = vadd.f32 %v891_v43, %v890_v35  ;;  %v1079_v34 = vld [vmem:[#allocation7] sm:$0x1] }
 0x2e4   :  { %v989_v48 = vsel %vm887_vm3, %v977_v44, 0.0 }
 0x2e5   :  { %v882_v49 = vadd.f32 %v881_v45, %v880_v40  ;;  %v893_v50 = vrot.slane %v892_v47, 4  ;;  %v990_v52 = vadd.f32 %v989_v48, %v988_v39  ;;  %v6785_v39 = vshrl.u32 %v1235_v37, 7  ;;  %v1505_v37 = vld [vmem:[#allocation4 + $0x200] sm:$0xff] }
 0x2e7   :  { %v883_v53 = vrot.slane %v882_v49, 2  ;;  %v894_v55 = vadd.f32 %v893_v50, %v892_v47  ;;  %v991_v56 = vrot.slane %v990_v52, 4  ;;  %v6788_v40 = vsub.s32 0, %v6785_v39 }
 0x2e9   :  { %v884_v58 = vadd.f32 %v883_v53, %v882_v49  ;;  %v895_v59 = vrot.slane %v894_v55, 2  ;;  %v992_v61 = vadd.f32 %v991_v56, %v990_v52 }
 0x2eb   :  { %v896_v62 = vadd.f32 %v895_v59, %v894_v55  ;;  %v993_v2 = vrot.slane %v992_v61, 2  ;;  %v885_v3 = vrot.slane %v884_v58, 1 }
 0x2ed   :  { %v897_v5 = vrot.slane %v896_v62, 1  ;;  %v994_v6 = vadd.f32 %v993_v2, %v992_v61  ;;  %v886_v11 = vadd.f32 %v885_v3, %v884_v58 }
 0x2ef   :  { %v898_v8 = vadd.f32 %v897_v5, %v896_v62  ;;  %v995_v9 = vrot.slane %v994_v6, 1 }
 0x2f1   :  { %4294 = vmatprep.mubr.msk.f32.mxu0 %vm887_vm3, %v898_v8  ;;  %v996_v12 = vadd.f32 %v995_v9, %v994_v6  ;;  %v1269_v9 = vld [vmem:[%s8720_s7] sm:$0xff] }
 0x2f2   :  { %967 = vmatmul.mubr.f32.vlgmr.msra.gmra.mrb[12].mxu0 %v886_v11  ;;  %v1490_v11 = vld [vmem:[#allocation4 + $0x188] sm:$0xff] }
 0x2f3   :  { %4841 = vmatpush1.bf16.msra.mxu0 %v6598_v51  ;;  %4295 = vmatprep.mubr.msk.f32.mxu0 %vm887_vm3, %v996_v12  ;;  %v980_v51 = vrot.slane %v979_v46, 4  ;;  %v1492_v12 = vld [vmem:[#allocation4 + $0x198] sm:$0xff] }
 0x2f4   :  { %4842 = vmatprep.subr.bf16.mxu0 %v6068_v0 }
 0x2f7   :  { %4844 = vmatpush1.bf16.msra.mxu0 %v6610_v54  ;;  %v981_v54 = vadd.f32 %v980_v51, %v979_v46  ;;  %v1270_v51 = vld [vmem:[%s8720_s7 + $0x8] sm:$0x3f] }
 0x2f8   :  { %4845 = vmatprep.subr.bf16.mxu0 %v6068_v0 }
 0x2fb   :  { %4847 = vmatpush1.bf16.msra.mxu0 %v6622_v57  ;;  %v982_v57 = vrot.slane %v981_v54, 2 }
 0x2fc   :  { %4848 = vmatprep.subr.bf16.mxu0 %v6068_v0 }
 0x2ff   :  { %4850 = vmatpush1.bf16.msra.mxu0 %v6633_v60  ;;  %v983_v60 = vadd.f32 %v982_v57, %v981_v54  ;;  %v4891_v54 = vpack.c.bf16 %v1492_v12, %v1490_v11  ;;  %v1489_v57 = vld [vmem:[#allocation4 + $0x180] sm:$0xff]  ;;  %v1527_v12 = vld [vmem:[#allocation4 + $0x2b0] sm:$0xff] }
 0x300   :  { %4851 = vmatprep.subr.bf16.mxu0 %v6068_v0  ;;  %v1525_v11 = vld [vmem:[#allocation4 + $0x2a0] sm:$0xff] }
 0x303   :  { %4853 = vmatpush1.bf16.msra.mxu0 %v6643_v63  ;;  %v984_v63 = vrot.slane %v983_v60, 1 }
 0x304   :  { %4854 = vmatprep.subr.bf16.mxu0 %v6068_v0 }
 0x307   :  { %4856 = vmatpush1.bf16.msra.mxu0 %v6653_v4  ;;  %v985_v4 = vadd.f32 %v984_v63, %v983_v60  ;;  %v1491_v60 = vld [vmem:[#allocation4 + $0x190] sm:$0xff]  ;;  %v1494_v63 = vld [vmem:[#allocation4 + $0x1a8] sm:$0xff] }
 0x308   :  { %4857 = vmatprep.subr.bf16.mxu0 %v6068_v0 }
 0x30b   :  { %4859 = vmatpush1.bf16.msra.mxu0 %v6664_v7  ;;  %v1083_v7 = vld [vmem:[#allocation6 + $0x8] sm:$0xff] }
 0x30c   :  { %4860 = vmatprep.subr.bf16.mxu0 %v6068_v0 }
 0x30f   :  { %4862 = vmatpush1.bf16.msra.mxu0 %v6674_v10  ;;  %v1085_v10 = vld [vmem:[#allocation6 + $0x18] sm:$0xff] }
 0x310   :  { %4863 = vmatprep.subr.bf16.mxu0 %v6068_v0 }
 0x313   :  { %4865 = vmatpush1.bf16.msra.mxu0 %v6684_v13  ;;  %v4875_v13 = vpack.c.bf16 %v1085_v10, %v1083_v7  ;;  %v4300_v7 = vld [vmem:[%s8720_s7 + $0x10] sm:$0xff]  ;;  %v4893_v10 = vpack.c.bf16 %v1491_v60, %v1489_v57  ;;  %v1532_v57 = vld [vmem:[#allocation4 + $0x2d8] sm:$0xff] }
 0x314   :  { %4866 = vmatprep.subr.bf16.mxu0 %v6068_v0 }
 0x315   :  { %4876 = vmatprep.subr.bf16.mxu1 %v4875_v13 }
 0x317   :  { %4868 = vmatpush1.bf16.msra.mxu0 %v6694_v16  ;;  %v4877_v16 = vpack.c.bf16 %v1084_v15, %v1082_v14  ;;  %v1493_v14 = vld [vmem:[#allocation4 + $0x1a0] sm:$0xff]  ;;  %v1495_v15 = vld [vmem:[#allocation4 + $0x1b0] sm:$0xff] }
 0x318   :  { %4869 = vmatprep.subr.bf16.mxu0 %v6068_v0 }
 0x319   :  { %4878 = vmatpush1.bf16.msra.mxu1 %v4877_v16 }
 0x31a   :  { %4880 = vmatprep.subr.bf16.mxu1 %v4875_v13 }
 0x31b   :  { %4871 = vmatpush1.bf16.msra.mxu0 %v6704_v19 }
 0x31c   :  { %4872 = vmatprep.subr.bf16.mxu0 %v6068_v0 }
 0x31f   :  { %4874 = vmatpush1.bf16.msra.mxu0 %v6714_v22 }
 0x320   :  { %4987 = vmatprep.subr.bf16.mxu0 %v6068_v0 }
 0x322   :  { %1065 = vmatmul.mubr.f32.vlgmr.msra.gmra.mrb[14].mxu0 %v985_v4  ;;  %v1496_v4 = vld [vmem:[#allocation4 + $0x1b8] sm:$0xff] }
 0x323   :  { %v4895_v13 = vpack.c.bf16 %v1496_v4, %v1494_v63  ;;  %v1529_v63 = vld [vmem:[#allocation4 + $0x2c0] sm:$0xff]  ;;  %v1531_v4 = vld [vmem:[#allocation4 + $0x2d0] sm:$0xff] }
 0x3c5   :  { %v968_v17 = vpop.f32.mrb[12].mxu0 }
 0x3c6   :  { %v970_v18 = vpop.f32.mrb[13].mxu0  ;;  %v1070_v19 = vmul.f32 0.0034722222, %v968_v17  ;;  %v1500_v17 = vld [vmem:[#allocation4 + $0x1d8] sm:$0xff] }
 0x3c7   :  { %v4301_v18 = vld [vmem:[%s8720_s7 + $0x18] sm:$0x3f] }
 0x3c8   :  { %v1072_v21 = vmul.f32 %v1070_v19, %v1070_v19 }
 0x3f5   :  { %v1066_v20 = vpop.f32.mrb[14].mxu0 }
 0x3f6   :  { %v1071_v25 = vmul.f32 0.0034722222, %v1066_v20  ;;  %v1068_v22 = vpop.f32.mrb[15].mxu0 }
 0x3f7   :  { %v1502_v22 = vld [vmem:[#allocation4 + $0x1e8] sm:$0xff] }
 0x3f8   :  { %v1073_v27 = vsub.f32 %v1071_v25, %v1072_v21  ;;  %v1497_v21 = vld [vmem:[#allocation4 + $0x1c0] sm:$0xff]  ;;  %v1499_v25 = vld [vmem:[#allocation4 + $0x1d0] sm:$0xff] }
 0x3fa   :  { %v1074_v28 = vmax.f32 %v1073_v27, 0.0  ;;  %v1504_v27 = vld [vmem:[#allocation4 + $0x1f8] sm:$0xff] }
 0x3fc   :  { %v1076_v29 = vadd.f32 1e-05, %v1074_v28  ;;  %v4901_v28 = vpack.c.bf16 %v1499_v25, %v1497_v21  ;;  %v1703_v21 = vld [vmem:[%s8672_s11] sm:$0xff]  ;;  %v1704_v25 = vld [vmem:[%s8672_s11 + $0x8] sm:$0xff] }
 0x3fe   :  { %5768 = vrsqrt.f32 %v1076_v29  ;;  %v4903_v29 = vpack.c.bf16 %v1504_v27, %v1502_v22  ;;  %v1705_v22 = vld [vmem:[%s8672_s11 + $0x10] sm:$0xff]  ;;  %v6828_v27 = vpack.c.bf16 %v1704_v25, %v1703_v21  ;;  %v1372_v21 = vld [vmem:[#allocation4 + $0x90] sm:$0xff] }
 0x3ff   :  { %v1375_v25 = vld [vmem:[#allocation4 + $0xa8] sm:$0xff] }
 0x400   :  { %4989 = vmatpush1.bf16.msra.mxu0 %v6828_v27 }
 0x401   :  { %4990 = vmatprep.subr.bf16.mxu0 %v6068_v0 }
 0x408   :  { %v5769_v32 = vpop.eup %5768 }
 0x409   :  { %v1078_v33 = vmul.f32 %v5769_v32, %v1075_v31  ;;  %v1501_v31 = vld [vmem:[#allocation4 + $0x1e0] sm:$0xff]  ;;  %v1503_v32 = vld [vmem:[#allocation4 + $0x1f0] sm:$0xff] }
 0x40b   :  { %4296 = vmatmul.mubr.msk.f32.vlgmr.msra.gmra.mrb[12].mxu1 %vm1086_vm4, %v1078_v33  ;;  %v1080_v35 = vmul.f32 %v1078_v33, %v1070_v19  ;;  %v4897_v19 = vpack.c.bf16 %v1495_v15, %v1493_v14  ;;  %v1506_v33 = vld [vmem:[#allocation4 + $0x208] sm:$0xff]  ;;  %v1533_v15 = vld [vmem:[#allocation4 + $0x2e0] sm:$0xff] }
 0x40c   :  { %4882 = vmatpush1.bf16.msra.mxu1 %v4877_v16  ;;  %1228 = vmatprep.mubr.f32.mxu1 %v6070_v1  ;;  %v1498_v16 = vld [vmem:[#allocation4 + $0x1c8] sm:$0xff] }
 0x40d   :  { %v1081_v36 = vsub.f32 %v1079_v34, %v1080_v35  ;;  %v4899_v20 = vpack.c.bf16 %v1500_v17, %v1498_v16  ;;  %v1508_v34 = vld [vmem:[#allocation4 + $0x218] sm:$0xff]  ;;  %v4905_v35 = vpack.c.bf16 %v1503_v32, %v1501_v31  ;;  %v1535_v16 = vld [vmem:[#allocation4 + $0x2f0] sm:$0xff]  ;;  %v1708_v32 = vld [vmem:[%s8672_s11 + $0x28] sm:$0xff] }
 0x40e   :  { %v4937_v17 = vpack.c.bf16 %v1535_v16, %v1533_v15  ;;  %v1707_v31 = vld [vmem:[%s8672_s11 + $0x20] sm:$0xff]  ;;  %v1368_v15 = vld [vmem:[#allocation4 + $0x70] sm:$0xff]  ;;  %v1371_v16 = vld [vmem:[#allocation4 + $0x88] sm:$0xff] }
 0x40f   :  { %4297 = vmatmul.mubr.msk.f32.vlgmr.msra.gmra.mrb[14].mxu1 %vm1086_vm4, %v1081_v36  ;;  %v4907_v36 = vpack.c.bf16 %v1508_v34, %v1506_v33  ;;  %v6844_v33 = vpack.c.bf16 %v1708_v32, %v1707_v31  ;;  %v1709_v34 = vld [vmem:[%s8672_s11 + $0x30] sm:$0xff]  ;;  %v1374_v32 = vld [vmem:[#allocation4 + $0xa0] sm:$0xff] }
 0x410   :  { %1341 = vmatprep.mubr.f32.mxu1 %v6070_v1 }
 0x4de   :  { %v1156_v41 = vpop.f32.mrb[12].mxu1 }
 0x4df   :  { %v1238_v43 = vrot.slane %v1156_v41, %v6788_v40  ;;  %v1158_v44 = vpop.f32.mrb[13].mxu1  ;;  %v1507_v41 = vld [vmem:[#allocation4 + $0x210] sm:$0xff] }
 0x4e0   :  { %v1242_v45 = vrot.slane %v1158_v44, %v6788_v40  ;;  %v1512_v44 = vld [vmem:[#allocation4 + $0x238] sm:$0xff] }
 0x4e1   :  { %v1243_v46 = vmul.f32 %v1238_v43, %v6718_v23  ;;  %v1245_v47 = vmul.f32 %v1238_v43, %v6724_v26  ;;  %v1247_v48 = vmul.f32 %v1238_v43, %v6742_v38  ;;  %v1510_v43 = vld [vmem:[#allocation4 + $0x228] sm:$0xff] }
 0x4e2   :  { %v1244_v49 = vmul.f32 %v1242_v45, %v6720_v24  ;;  %v1246_v50 = vmul.f32 %v1242_v45, %v6732_v30  ;;  %v1248_v52 = vmul.f32 %v1242_v45, %v6747_v42  ;;  %v1230_v53 = vpop.f32.mrb[14].mxu1  ;;  %v4909_v45 = vpack.c.bf16 %v1507_v41, %v1505_v37  ;;  %v1711_v37 = vld [vmem:[%s8672_s11 + $0x40] sm:$0xff]  ;;  %v1712_v41 = vld [vmem:[%s8672_s11 + $0x48] sm:$0xff] }
 0x4e3   :  { %v1252_v55 = vrot.slane %v1230_v53, %v6788_v40  ;;  %v1232_v56 = vpop.f32.mrb[15].mxu1 }
 0x4e4   :  { %v1256_v58 = vrot.slane %v1232_v56, %v6788_v40  ;;  %v1515_v56 = vld [vmem:[#allocation4 + $0x250] sm:$0xff] }
 0x4e5   :  { %v1257_v59 = vadd.f32 %v1252_v55, %v1243_v46  ;;  %v1259_v61 = vadd.f32 %v1252_v55, %v1245_v47  ;;  %v1261_v62 = vadd.f32 %v1252_v55, %v1247_v48  ;;  %v4911_v46 = vpack.c.bf16 %v1512_v44, %v1510_v43  ;;  %v1509_v47 = vld [vmem:[#allocation4 + $0x220] sm:$0xff]  ;;  %v1511_v48 = vld [vmem:[#allocation4 + $0x230] sm:$0xff]  ;;  %v1713_v44 = vld [vmem:[%s8672_s11 + $0x50] sm:$0xff] }
 0x4e6   :  { %v1258_v23 = vadd.f32 %v1256_v58, %v1244_v49  ;;  %v1260_v2 = vadd.f32 %v1256_v58, %v1246_v50  ;;  %v1262_v26 = vadd.f32 %v1256_v58, %v1248_v52  ;;  %v1514_v49 = vld [vmem:[#allocation4 + $0x248] sm:$0xff]  ;;  %v1516_v50 = vld [vmem:[#allocation4 + $0x258] sm:$0xff]  ;;  %v4913_v52 = vpack.c.bf16 %v1511_v48, %v1509_v47  ;;  %v1513_v55 = vld [vmem:[#allocation4 + $0x240] sm:$0xff] }
 0x4e7   :  { %v1263_v3 = vmax.f32 %v1257_v59, 0.0  ;;  %v1265_v38 = vmax.f32 %v1259_v61, 0.0  ;;  %v1267_v8 = vmax.f32 %v1261_v62, 0.0  ;;  %v4915_v53 = vpack.c.bf16 %v1516_v50, %v1514_v49  ;;  %v1518_v58 = vld [vmem:[#allocation4 + $0x268] sm:$0xff]  ;;  %v1520_v59 = vld [vmem:[#allocation4 + $0x278] sm:$0xff]  ;;  %v1716_v48 = vld [vmem:[%s8672_s11 + $0x68] sm:$0xff] }
 0x4e8   :  { %v1264_v5 = vmax.f32 %v1258_v23, 0.0  ;;  %v1266_v24 = vmax.f32 %v1260_v2, 0.0  ;;  %v1268_v42 = vmax.f32 %v1262_v26, 0.0  ;;  %v4917_v61 = vpack.c.bf16 %v1515_v56, %v1513_v55  ;;  %v1517_v23 = vld [vmem:[#allocation4 + $0x260] sm:$0xff]  ;;  %v1519_v2 = vld [vmem:[#allocation4 + $0x270] sm:$0xff]  ;;  %v1522_v26 = vld [vmem:[#allocation4 + $0x288] sm:$0xff] }
 0x4e9   :  { %v4885_v6 = vpack.c.bf16 %v1265_v38, %v1263_v3  ;;  %v4919_v62 = vpack.c.bf16 %v1520_v59, %v1518_v58  ;;  %v1524_v3 = vld [vmem:[#allocation4 + $0x298] sm:$0xff]  ;;  %v4921_v38 = vpack.c.bf16 %v1519_v2, %v1517_v23  ;;  %v6864_v43 = vpack.c.bf16 %v1712_v41, %v1711_v37  ;;  %v1717_v50 = vld [vmem:[%s8672_s11 + $0x70] sm:$0xff]  ;;  %v1720_v56 = vld [vmem:[%s8672_s11 + $0x88] sm:$0xff] }
 0x4ea   :  { %v4883_v30 = vpack.c.bf16 %v1266_v24, %v1264_v5  ;;  %v4923_v5 = vpack.c.bf16 %v1524_v3, %v1522_v26  ;;  %v1521_v24 = vld [vmem:[#allocation4 + $0x280] sm:$0xff]  ;;  %v1715_v47 = vld [vmem:[%s8672_s11 + $0x60] sm:$0xff]  ;;  %v1356_v26 = vld [vmem:[#allocation4 + $0x10] sm:$0xff] }
 0x4eb   :  { %v6884_v49 = vpack.c.bf16 %v1716_v48, %v1715_v47  ;;  %v1719_v55 = vld [vmem:[%s8672_s11 + $0x80] sm:$0xff]  ;;  %v1354_v2 = vld [vmem:[#allocation4] sm:$0xff]  ;;  %v1359_v3 = vld [vmem:[#allocation4 + $0x28] sm:$0xff] }
 0x4ec   :  { %4884 = vmatprep.subr.bf16.mxu1 %v4883_v30  ;;  %v6904_v58 = vpack.c.bf16 %v1720_v56, %v1719_v55  ;;  %v1381_v37 = vld [vmem:[#allocation4 + $0xd8] sm:$0xff]  ;;  %v1380_v47 = vld [vmem:[#allocation4 + $0xd0] sm:$0xff]  ;;  %v1383_v48 = vld [vmem:[#allocation4 + $0xe8] sm:$0xff] }
 0x4ed   :  { %4886 = vmatpush1.bf16.msra.mxu1 %v4885_v6  ;;  %v1382_v56 = vld [vmem:[#allocation4 + $0xe0] sm:$0xff] }
 0x4ee   :  { %1281 = vmatprep.subr.mxu1 %v1268_v42 }
 0x4f1   :  { %1282 = vmatpush1.msra.mxu1 %v1267_v8 }
 0x4f2   :  { %4298 = vmatmul.mubr.msk.f32.vlgmr.msra.gmra.mrb[16].mxu1 %vm240_vm1, %v1269_v9  ;;  %4888 = vmatprep.subr.bf16.mxu1 %v4883_v30  ;;  %v1526_v30 = vld [vmem:[#allocation4 + $0x2a8] sm:$0xff] }
 0x4f3   :  { %4890 = vmatpush1.bf16.msra.mxu1 %v4885_v6  ;;  %1347 = vmatprep.mubr.f32.mxu1 %v6070_v1  ;;  %v1523_v6 = vld [vmem:[#allocation4 + $0x290] sm:$0xff] }
 0x4f4   :  { %1415 = vmatprep.subr.mxu1 %v1268_v42  ;;  %v1528_v42 = vld [vmem:[#allocation4 + $0x2b8] sm:$0xff] }
 0x4f5   :  { %v4927_v9 = vpack.c.bf16 %v1528_v42, %v1526_v30  ;;  %v1358_v42 = vld [vmem:[#allocation4 + $0x20] sm:$0xff] }
 0x4f6   :  { %4299 = vmatmul.mubr.msk.f32.gmra.mrb[18].mxu1 %vm240_vm1, %v1270_v51  ;;  %v4929_v51 = vpack.c.bf16 %v1527_v12, %v1525_v11  ;;  %v1365_v11 = vld [vmem:[#allocation4 + $0x58] sm:$0xff] }
 0x4f7   :  { %1416 = vmatpush1.msra.mxu1 %v1267_v8  ;;  %1475 = vmatprep.mubr.f32.mxu1 %v6070_v1  ;;  %v4925_v8 = vpack.c.bf16 %v1523_v6, %v1521_v24  ;;  %v4941_v24 = vpack.c.bf16 %v1356_v26, %v1354_v2  ;;  %v1387_v2 = vld [vmem:[#allocation4 + $0x108] sm:$0xff]  ;;  %v1389_v26 = vld [vmem:[#allocation4 + $0x118] sm:$0xff] }
 0x4f8   :  { %4892 = vmatprep.subr.bf16.mxu1 %v4891_v54  ;;  %v1530_v54 = vld [vmem:[#allocation4 + $0x2c8] sm:$0xff] }
 0x4f9   :  { %v4931_v60 = vpack.c.bf16 %v1532_v57, %v1530_v54 }
 0x4fa   :  { %4302 = vmatmul.mubr.msk.f32.vlgmr.msra.gmra.mrb[20].mxu1 %vm240_vm1, %v4300_v7  ;;  %v4933_v7 = vpack.c.bf16 %v1531_v4, %v1529_v63  ;;  %v1364_v63 = vld [vmem:[#allocation4 + $0x50] sm:$0xff]  ;;  %v1367_v4 = vld [vmem:[#allocation4 + $0x68] sm:$0xff] }
 0x4fb   :  { %1481 = vmatprep.mubr.f32.mxu1 %v6070_v1  ;;  %4894 = vmatpush1.bf16.msra.mxu1 %v4893_v10  ;;  %v1534_v10 = vld [vmem:[#allocation4 + $0x2e8] sm:$0xff] }
 0x4fc   :  { %4896 = vmatprep.subr.bf16.mxu1 %v4895_v13  ;;  %v1536_v13 = vld [vmem:[#allocation4 + $0x2f8] sm:$0xff] }
 0x4fd   :  { %v4935_v14 = vpack.c.bf16 %v1536_v13, %v1534_v10 }
 0x4fe   :  { %4303 = vmatmul.mubr.msk.f32.gmra.mrb[22].mxu1 %vm240_vm1, %v4301_v18  ;;  %v1355_v18 = vld [vmem:[#allocation4 + $0x8] sm:$0xff]  ;;  %vm4227_vm1 = vmor %vm4226_vm0, %vm4225_vm15 }
 0x4ff   :  { %4898 = vmatpush1.bf16.msra.mxu1 %v4897_v19  ;;  %v1357_v19 = vld [vmem:[#allocation4 + $0x18] sm:$0xff] }
 0x500   :  { %4900 = vmatprep.subr.bf16.mxu1 %v4899_v20  ;;  %v4939_v20 = vpack.c.bf16 %v1357_v19, %v1355_v18 }
 0x503   :  { %4902 = vmatpush1.bf16.msra.mxu1 %v4901_v28  ;;  %v1706_v28 = vld [vmem:[%s8672_s11 + $0x18] sm:$0xff] }
 0x504   :  { %4904 = vmatprep.subr.bf16.mxu1 %v4903_v29  ;;  %v6834_v29 = vpack.c.bf16 %v1706_v28, %v1705_v22  ;;  %v1377_v22 = vld [vmem:[#allocation4 + $0xb8] sm:$0xff] }
 0x505   :  { %v4959_v31 = vpack.c.bf16 %v1377_v22, %v1375_v25  ;;  %v1727_v22 = vld [vmem:[%s8672_s11 + $0xc0] sm:$0xff] }
 0x506   :  { %4992 = vmatpush1.bf16.msra.mxu0 %v6834_v29 }
 0x507   :  { %4906 = vmatpush1.bf16.msra.mxu1 %v4905_v35  ;;  %4993 = vmatprep.subr.bf16.mxu0 %v6068_v0  ;;  %v1710_v35 = vld [vmem:[%s8672_s11 + $0x38] sm:$0xff] }
 0x508   :  { %4908 = vmatprep.subr.bf16.mxu1 %v4907_v36  ;;  %v6854_v36 = vpack.c.bf16 %v1710_v35, %v1709_v34  ;;  %v1376_v34 = vld [vmem:[#allocation4 + $0xb0] sm:$0xff]  ;;  %v1379_v35 = vld [vmem:[#allocation4 + $0xc8] sm:$0xff] }
 0x509   :  { %v4961_v41 = vpack.c.bf16 %v1376_v34, %v1374_v32  ;;  %v1729_v32 = vld [vmem:[%s8672_s11 + $0xd0] sm:$0xff]  ;;  %v1730_v34 = vld [vmem:[%s8672_s11 + $0xd8] sm:$0xff] }
 0x50a   :  { %4995 = vmatpush1.bf16.msra.mxu0 %v6844_v33 }
 0x50b   :  { %4910 = vmatpush1.bf16.msra.mxu1 %v4909_v45  ;;  %4996 = vmatprep.subr.bf16.mxu0 %v6068_v0  ;;  %v1714_v45 = vld [vmem:[%s8672_s11 + $0x58] sm:$0xff] }
 0x50c   :  { %4912 = vmatprep.subr.bf16.mxu1 %v4911_v46  ;;  %v6874_v46 = vpack.c.bf16 %v1714_v45, %v1713_v44  ;;  %v4963_v44 = vpack.c.bf16 %v1381_v37, %v1379_v35  ;;  %v1378_v45 = vld [vmem:[#allocation4 + $0xc0] sm:$0xff]  ;;  %v6969_v35 = vpack.c.bf16 %v1730_v34, %v1729_v32 }
 0x50e   :  { %4998 = vmatpush1.bf16.msra.mxu0 %v6854_v36 }
 0x50f   :  { %4914 = vmatpush1.bf16.msra.mxu1 %v4913_v52  ;;  %4999 = vmatprep.subr.bf16.mxu0 %v6068_v0  ;;  %v1718_v52 = vld [vmem:[%s8672_s11 + $0x78] sm:$0xff] }
 0x510   :  { %4916 = vmatprep.subr.bf16.mxu1 %v4915_v53  ;;  %v6894_v53 = vpack.c.bf16 %v1718_v52, %v1717_v50  ;;  %v1385_v50 = vld [vmem:[#allocation4 + $0xf8] sm:$0xff]  ;;  %v4965_v52 = vpack.c.bf16 %v1380_v47, %v1378_v45 }
 0x511   :  { %v4967_v55 = vpack.c.bf16 %v1385_v50, %v1383_v48 }
 0x512   :  { %5001 = vmatpush1.bf16.msra.mxu0 %v6864_v43 }
 0x513   :  { %4918 = vmatpush1.bf16.msra.mxu1 %v4917_v61  ;;  %5002 = vmatprep.subr.bf16.mxu0 %v6068_v0 }
 0x514   :  { %4920 = vmatprep.subr.bf16.mxu1 %v4919_v62 }
 0x516   :  { %5004 = vmatpush1.bf16.msra.mxu0 %v6874_v46 }
 0x517   :  { %4922 = vmatpush1.bf16.msra.mxu1 %v4921_v38  ;;  %5005 = vmatprep.subr.bf16.mxu0 %v6068_v0  ;;  %v1361_v38 = vld [vmem:[#allocation4 + $0x38] sm:$0xff] }
 0x518   :  { %4924 = vmatprep.subr.bf16.mxu1 %v4923_v5  ;;  %v4943_v30 = vpack.c.bf16 %v1361_v38, %v1359_v3  ;;  %v4971_v38 = vpack.c.bf16 %v1389_v26, %v1387_v2 }
 0x51a   :  { %5007 = vmatpush1.bf16.msra.mxu0 %v6884_v49 }
 0x51b   :  { %4926 = vmatpush1.bf16.msra.mxu1 %v4925_v8  ;;  %5008 = vmatprep.subr.bf16.mxu0 %v6068_v0  ;;  %v1360_v8 = vld [vmem:[#allocation4 + $0x30] sm:$0xff] }
 0x51c   :  { %4928 = vmatprep.subr.bf16.mxu1 %v4927_v9  ;;  %v1363_v9 = vld [vmem:[#allocation4 + $0x48] sm:$0xff] }
 0x51d   :  { %v4947_v57 = vpack.c.bf16 %v1365_v11, %v1363_v9  ;;  %v1390_v9 = vld [vmem:[#allocation4 + $0x120] sm:$0xff]  ;;  %v1392_v11 = vld [vmem:[#allocation4 + $0x130] sm:$0xff] }
 0x51e   :  { %5010 = vmatpush1.bf16.msra.mxu0 %v6894_v53 }
 0x51f   :  { %4930 = vmatpush1.bf16.msra.mxu1 %v4929_v51  ;;  %5011 = vmatprep.subr.bf16.mxu0 %v6068_v0  ;;  %v4945_v51 = vpack.c.bf16 %v1360_v8, %v1358_v42 }
 0x520   :  { %4932 = vmatprep.subr.bf16.mxu1 %v4931_v60  ;;  %v1362_v60 = vld [vmem:[#allocation4 + $0x40] sm:$0xff] }
 0x521   :  { %v4949_v10 = vpack.c.bf16 %v1364_v63, %v1362_v60  ;;  %v1394_v60 = vld [vmem:[#allocation4 + $0x140] sm:$0xff]  ;;  %v1396_v63 = vld [vmem:[#allocation4 + $0x150] sm:$0xff] }
 0x522   :  { %5013 = vmatpush1.bf16.msra.mxu0 %v6904_v58 }
 0x523   :  { %4934 = vmatpush1.bf16.msra.mxu1 %v4933_v7  ;;  %5014 = vmatprep.subr.bf16.mxu0 %v6068_v0  ;;  %v1369_v7 = vld [vmem:[#allocation4 + $0x78] sm:$0xff] }
 0x524   :  { %4936 = vmatprep.subr.bf16.mxu1 %v4935_v14  ;;  %v4951_v13 = vpack.c.bf16 %v1369_v7, %v1367_v4  ;;  %v1366_v14 = vld [vmem:[#allocation4 + $0x60] sm:$0xff]  ;;  %v1399_v4 = vld [vmem:[#allocation4 + $0x168] sm:$0xff]  ;;  %v1401_v7 = vld [vmem:[#allocation4 + $0x178] sm:$0xff] }
 0x525   :  { %v4953_v18 = vpack.c.bf16 %v1368_v15, %v1366_v14  ;;  %v1398_v14 = vld [vmem:[#allocation4 + $0x160] sm:$0xff]  ;;  %v1400_v15 = vld [vmem:[#allocation4 + $0x170] sm:$0xff] }
 0x527   :  { %4938 = vmatpush1.bf16.msra.mxu1 %v4937_v17  ;;  %v1373_v17 = vld [vmem:[#allocation4 + $0x98] sm:$0xff] }
 0x528   :  { %4940 = vmatprep.subr.bf16.mxu1 %v4939_v20  ;;  %v4955_v19 = vpack.c.bf16 %v1373_v17, %v1371_v16  ;;  %v1370_v20 = vld [vmem:[#allocation4 + $0x80] sm:$0xff]  ;;  %v4985_v16 = vpack.c.bf16 %v1400_v15, %v1398_v14  ;;  %v1721_v17 = vld [vmem:[%s8672_s11 + $0x90] sm:$0xff] }
 0x529   :  { %v4957_v28 = vpack.c.bf16 %v1372_v21, %v1370_v20  ;;  %v1725_v20 = vld [vmem:[%s8672_s11 + $0xb0] sm:$0xff]  ;;  %v1726_v21 = vld [vmem:[%s8672_s11 + $0xb8] sm:$0xff] }
 0x52a   :  { %v6949_v25 = vpack.c.bf16 %v1726_v21, %v1725_v20  ;;  %v1934_v20 = vld [vmem:[#allocation9 + $0x20] sm:$0xff]  ;;  %v1936_v21 = vld [vmem:[#allocation9 + $0x30] sm:$0xff] }
 0x5c5   :  { %v6909_v59 = vpop.f32.mrb[16].mxu1 }
 0x5c6   :  { %v1345_v61 = vpop.f32.mrb[17].mxu1 }
 0x5c9   :  { %v6911_v62 = vpop.f32.mrb[18].mxu1 }
 0x5ca   :  { %v6913_v23 = vpop.f32.mrb[19].mxu1 }
 0x5cd   :  { %v1477_v5 = vpop.f32.mrb[20].mxu1 }
 0x5ce   :  { %v1479_v6 = vpop.f32.mrb[21].mxu1 }
 0x5cf   :  { %4304 = vmatprep.mubr.msk.f32.mxu1 %vm887_vm3, %v1479_v6  ;;  %v1391_v6 = vld [vmem:[#allocation4 + $0x128] sm:$0xff] }
 0x5d0   :  { %1608 = vmatmul.mubr.f32.vlgmr.msra.gmra.mrb[24].mxu1 %v1477_v5  ;;  %v1386_v5 = vld [vmem:[#allocation4 + $0x100] sm:$0xff] }
 0x5d1   :  { %4942 = vmatpush1.bf16.msra.mxu1 %v4941_v24  ;;  %v1483_v12 = vpop.f32.mrb[22].mxu1  ;;  %v1388_v24 = vld [vmem:[#allocation4 + $0x110] sm:$0xff] }
 0x5d2   :  { %v1485_v54 = vpop.f32.mrb[23].mxu1  ;;  %4944 = vmatprep.subr.bf16.mxu1 %v4943_v30  ;;  %v1393_v30 = vld [vmem:[#allocation4 + $0x138] sm:$0xff]  ;;  %v4973_v42 = vpack.c.bf16 %v1388_v24, %v1386_v5 }
 0x5d3   :  { %4305 = vmatprep.mubr.msk.f32.mxu1 %vm887_vm3, %v1485_v54  ;;  %v4975_v8 = vpack.c.bf16 %v1393_v30, %v1391_v6  ;;  %v4977_v54 = vpack.c.bf16 %v1392_v11, %v1390_v9 }
 0x5d4   :  { %1614 = vmatmul.mubr.f32.gmra.mrb[26].mxu1 %v1483_v12  ;;  %v1395_v12 = vld [vmem:[#allocation4 + $0x148] sm:$0xff] }
 0x5d5   :  { %4946 = vmatpush1.bf16.msra.mxu1 %v4945_v51  ;;  %4306 = vmatprep.mubr.msk.f32.mxu1 %vm887_vm3, %v1345_v61  ;;  %v1384_v61 = vld [vmem:[#allocation4 + $0xf0] sm:$0xff]  ;;  %v1397_v51 = vld [vmem:[#allocation4 + $0x158] sm:$0xff] }
 0x5d6   :  { %4948 = vmatprep.subr.bf16.mxu1 %v4947_v57  ;;  %v4969_v3 = vpack.c.bf16 %v1384_v61, %v1382_v56  ;;  %v4979_v57 = vpack.c.bf16 %v1397_v51, %v1395_v12 }
 0x5d9   :  { %4950 = vmatpush1.bf16.msra.mxu1 %v4949_v10  ;;  %v4981_v10 = vpack.c.bf16 %v1396_v63, %v1394_v60 }
 0x5da   :  { %4952 = vmatprep.subr.bf16.mxu1 %v4951_v13  ;;  %v4983_v13 = vpack.c.bf16 %v1401_v7, %v1399_v4 }
 0x5dd   :  { %4954 = vmatpush1.bf16.msra.mxu1 %v4953_v18  ;;  %v1722_v18 = vld [vmem:[%s8672_s11 + $0x98] sm:$0xff] }
 0x5de   :  { %4956 = vmatprep.subr.bf16.mxu1 %v4955_v19  ;;  %v6929_v19 = vpack.c.bf16 %v1722_v18, %v1721_v17  ;;  %v1930_v17 = vld [vmem:[#allocation9] sm:$0xff]  ;;  %v1932_v18 = vld [vmem:[#allocation9 + $0x10] sm:$0xff] }
 0x5e0   :  { %5016 = vmatpush1.bf16.msra.mxu0 %v6929_v19 }
 0x5e1   :  { %4958 = vmatpush1.bf16.msra.mxu1 %v4957_v28  ;;  %5017 = vmatprep.subr.bf16.mxu0 %v6068_v0  ;;  %v1728_v28 = vld [vmem:[%s8672_s11 + $0xc8] sm:$0xff] }
 0x5e2   :  { %4960 = vmatprep.subr.bf16.mxu1 %v4959_v31  ;;  %v6959_v31 = vpack.c.bf16 %v1728_v28, %v1727_v22 }
 0x5e5   :  { %4962 = vmatpush1.bf16.msra.mxu1 %v4961_v41 }
 0x5e6   :  { %4964 = vmatprep.subr.bf16.mxu1 %v4963_v44 }
 0x5e9   :  { %4966 = vmatpush1.bf16.msra.mxu1 %v4965_v52 }
 0x5ea   :  { %4968 = vmatprep.subr.bf16.mxu1 %v4967_v55 }
 0x5ed   :  { %4970 = vmatpush1.bf16.msra.mxu1 %v4969_v3 }
 0x5ee   :  { %4972 = vmatprep.subr.bf16.mxu1 %v4971_v38 }
 0x5f1   :  { %4974 = vmatpush1.bf16.msra.mxu1 %v4973_v42 }
 0x5f2   :  { %4976 = vmatprep.subr.bf16.mxu1 %v4975_v8 }
 0x5f5   :  { %4978 = vmatpush1.bf16.msra.mxu1 %v4977_v54 }
 0x5f6   :  { %4980 = vmatprep.subr.bf16.mxu1 %v4979_v57 }
 0x5f9   :  { %4982 = vmatpush1.bf16.msra.mxu1 %v4981_v10 }
 0x5fa   :  { %4984 = vmatprep.subr.bf16.mxu1 %v4983_v13 }
 0x5fd   :  { %4986 = vmatpush1.bf16.msra.mxu1 %v4985_v16 }
 0x600   :  { %1691 = vmatmul.mubr.f32.vlgmr.msra.gmra.mrb[24].mxu1 %v6909_v59  ;;  %v1723_v59 = vld [vmem:[%s8672_s11 + $0xa0] sm:$0xff] }
 0x601   :  { %4307 = vmatprep.mubr.msk.f32.mxu1 %vm887_vm3, %v6913_v23 }
 0x604   :  { %1697 = vmatmul.mubr.f32.gmra.mrb[26].mxu1 %v6911_v62  ;;  %v1724_v62 = vld [vmem:[%s8672_s11 + $0xa8] sm:$0xff] }
 0x605   :  { %2006 = vmatprep.mubr.f32.mxu1 %v6070_v1  ;;  %v6939_v23 = vpack.c.bf16 %v1724_v62, %v1723_v59  ;;  %v1935_v59 = vld [vmem:[#allocation9 + $0x28] sm:$0xff]  ;;  %v1937_v62 = vld [vmem:[#allocation9 + $0x38] sm:$0xff] }
 0x607   :  { %5019 = vmatpush1.bf16.msra.mxu0 %v6939_v23 }
 0x608   :  { %5020 = vmatprep.subr.bf16.mxu0 %v6068_v0 }
 0x60b   :  { %5022 = vmatpush1.bf16.msra.mxu0 %v6949_v25 }
 0x60c   :  { %5023 = vmatprep.subr.bf16.mxu0 %v6068_v0 }
 0x60f   :  { %5025 = vmatpush1.bf16.msra.mxu0 %v6959_v31 }
 0x610   :  { %5026 = vmatprep.subr.bf16.mxu0 %v6068_v0 }
 0x613   :  { %5028 = vmatpush1.bf16.msra.mxu0 %v6969_v35 }
 0x614   :  { %5029 = vmatprep.subr.bf16.mxu0 %v6068_v0 }
 0x6d3   :  { %v6973_v37 = vpop.f32.mrb[24].mxu1 }
 0x6d4   :  { %v6975_v41 = vpop.f32.mrb[25].mxu1  ;;  %v1824_v47 = vmul.f32 %v6973_v37, %v6973_v37 }
 0x6d5   :  { %v1825_v44 = vmul.f32 %v6975_v41, %v6975_v41  ;;  %v1741_v55 = vsel %vm1740_vm6, %v6975_v41, 0.0 }
 0x6d7   :  { %v6979_v45 = vpop.f32.mrb[26].mxu1  ;;  %v1836_v38 = vsel %vm1740_vm6, %v1825_v44, 0.0 }
 0x6d8   :  { %v1732_v48 = vsel %vm1731_vm5, %v6979_v45, 0.0  ;;  %v1826_v50 = vmul.f32 %v6979_v45, %v6979_v45  ;;  %v6987_v52 = vpop.f32.mrb[27].mxu1 }
 0x6d9   :  { %v1733_v56 = vadd.f32 %v1732_v48, %v6973_v37  ;;  %v1743_v61 = vsel %vm1742_vm7, %v6987_v52, 0.0  ;;  %v1827_v2 = vmul.f32 %v6987_v52, %v6987_v52 }
 0x6da   :  { %v1828_v26 = vsel %vm1731_vm5, %v1826_v50, 0.0  ;;  %v1744_v3 = vadd.f32 %v1743_v61, %v1741_v55  ;;  %v1923_v50 = vld [vmem:[#allocation10] sm:$0x1] }
 0x6db   :  { %v1734_v5 = vrot.slane %v1733_v56, 4  ;;  %v1829_v24 = vadd.f32 %v1828_v26, %v1824_v47  ;;  %v1837_v6 = vsel %vm1742_vm7, %v1827_v2, 0.0  ;;  %v1927_v2 = vld [vmem:[#allocation12] sm:$0x1] }
 0x6dc   :  { %v1745_v30 = vrot.slane %v1744_v3, 4  ;;  %v1838_v42 = vadd.f32 %v1837_v6, %v1836_v38 }
 0x6dd   :  { %v1735_v8 = vadd.f32 %v1734_v5, %v1733_v56 }
 0x6de   :  { %v1746_v9 = vadd.f32 %v1745_v30, %v1744_v3  ;;  %v1839_v11 = vrot.slane %v1838_v42, 4 }
 0x6df   :  { %v1736_v12 = vrot.slane %v1735_v8, 2 }
 0x6e0   :  { %v1747_v51 = vrot.slane %v1746_v9, 2  ;;  %v1840_v54 = vadd.f32 %v1839_v11, %v1838_v42 }
 0x6e1   :  { %v1737_v57 = vadd.f32 %v1736_v12, %v1735_v8 }
 0x6e2   :  { %v1748_v60 = vadd.f32 %v1747_v51, %v1746_v9  ;;  %v1841_v63 = vrot.slane %v1840_v54, 2 }
 0x6e3   :  { %v1738_v4 = vrot.slane %v1737_v57, 1 }
 0x6e4   :  { %v1749_v7 = vrot.slane %v1748_v60, 1  ;;  %v1842_v10 = vadd.f32 %v1841_v63, %v1840_v54 }
 0x6e5   :  { %v1739_v15 = vadd.f32 %v1738_v4, %v1737_v57 }
 0x6e6   :  { %v1750_v13 = vadd.f32 %v1749_v7, %v1748_v60  ;;  %v1843_v14 = vrot.slane %v1842_v10, 1 }
 0x6e8   :  { %4308 = vmatprep.mubr.msk.f32.mxu0 %vm1740_vm6, %v1750_v13  ;;  %v1844_v16 = vadd.f32 %v1843_v14, %v1842_v10  ;;  %v2115_v14 = vld [vmem:[%s8722_s21] sm:$0xff] }
 0x6e9   :  { %1819 = vmatmul.mubr.f32.vlgmr.msra.gmra.mrb[16].mxu0 %v1739_v15 }
 0x6ea   :  { %5031 = vmatpush1.bf16.msra.mxu0 %v6828_v27  ;;  %4309 = vmatprep.mubr.msk.f32.mxu0 %vm1740_vm6, %v1844_v16  ;;  %v1830_v27 = vrot.slane %v1829_v24, 4  ;;  %v4319_v16 = vld [vmem:[%s8721_s18 + $0x1c0] sm:$0xff] }
 0x6eb   :  { %5032 = vmatprep.subr.bf16.mxu0 %v6068_v0 }
 0x6ee   :  { %5034 = vmatpush1.bf16.msra.mxu0 %v6834_v29  ;;  %v1831_v29 = vadd.f32 %v1830_v27, %v1829_v24  ;;  %v4321_v27 = vld [vmem:[%s8721_s18 + $0x1d0] sm:$0xff] }
 0x6ef   :  { %5035 = vmatprep.subr.bf16.mxu0 %v6068_v0 }
 0x6f2   :  { %5037 = vmatpush1.bf16.msra.mxu0 %v6844_v33  ;;  %v1832_v33 = vrot.slane %v1831_v29, 2 }
 0x6f3   :  { %5038 = vmatprep.subr.bf16.mxu0 %v6068_v0 }
 0x6f6   :  { %5040 = vmatpush1.bf16.msra.mxu0 %v6854_v36  ;;  %v1833_v36 = vadd.f32 %v1832_v33, %v1831_v29  ;;  %v4324_v29 = vld [vmem:[%s8721_s18 + $0x1e8] sm:$0xff]  ;;  %v4326_v33 = vld [vmem:[%s8721_s18 + $0x1f8] sm:$0xff] }
 0x6f7   :  { %5041 = vmatprep.subr.bf16.mxu0 %v6068_v0 }
 0x6fa   :  { %5043 = vmatpush1.bf16.msra.mxu0 %v6864_v43  ;;  %v1834_v43 = vrot.slane %v1833_v36, 1 }
 0x6fb   :  { %5044 = vmatprep.subr.bf16.mxu0 %v6068_v0 }
 0x6fe   :  { %5046 = vmatpush1.bf16.msra.mxu0 %v6874_v46  ;;  %v1835_v46 = vadd.f32 %v1834_v43, %v1833_v36  ;;  %v4315_v36 = vld [vmem:[%s8722_s21 + $0x8] sm:$0xff]  ;;  %v5101_v43 = vpack.c.bf16 %v4321_v27, %v4319_v16  ;;  %v4359_v16 = vld [vmem:[%s8721_s18 + $0x300] sm:$0xff]  ;;  %v4361_v27 = vld [vmem:[%s8721_s18 + $0x310] sm:$0xff] }
 0x6ff   :  { %5047 = vmatprep.subr.bf16.mxu0 %v6068_v0 }
 0x702   :  { %5049 = vmatpush1.bf16.msra.mxu0 %v6884_v49  ;;  %v1931_v49 = vld [vmem:[#allocation9 + $0x8] sm:$0xff] }
 0x703   :  { %5050 = vmatprep.subr.bf16.mxu0 %v6068_v0 }
 0x706   :  { %5052 = vmatpush1.bf16.msra.mxu0 %v6894_v53  ;;  %v1933_v53 = vld [vmem:[#allocation9 + $0x18] sm:$0xff] }
 0x707   :  { %5053 = vmatprep.subr.bf16.mxu0 %v6068_v0 }
 0x70a   :  { %5055 = vmatpush1.bf16.msra.mxu0 %v6904_v58  ;;  %v5071_v58 = vpack.c.bf16 %v1933_v53, %v1931_v49  ;;  %v4323_v49 = vld [vmem:[%s8721_s18 + $0x1e0] sm:$0xff]  ;;  %v4325_v53 = vld [vmem:[%s8721_s18 + $0x1f0] sm:$0xff] }
 0x70b   :  { %5056 = vmatprep.subr.bf16.mxu0 %v6068_v0 }
 0x70c   :  { %5072 = vmatprep.subr.bf16.mxu1 %v5071_v58 }
 0x70e   :  { %5058 = vmatpush1.bf16.msra.mxu0 %v6929_v19  ;;  %v5073_v19 = vpack.c.bf16 %v1932_v18, %v1930_v17  ;;  %v4330_v17 = vld [vmem:[%s8721_s18 + $0x218] sm:$0xff]  ;;  %v5105_v18 = vpack.c.bf16 %v4325_v53, %v4323_v49  ;;  %v4365_v49 = vld [vmem:[%s8721_s18 + $0x330] sm:$0xff]  ;;  %v4368_v53 = vld [vmem:[%s8721_s18 + $0x348] sm:$0xff] }
 0x70f   :  { %5059 = vmatprep.subr.bf16.mxu0 %v6068_v0 }
 0x710   :  { %5074 = vmatpush1.bf16.msra.mxu1 %v5073_v19 }
 0x712   :  { %5061 = vmatpush1.bf16.msra.mxu0 %v6939_v23  ;;  %v5075_v23 = vpack.c.bf16 %v1937_v62, %v1935_v59  ;;  %v4327_v59 = vld [vmem:[%s8721_s18 + $0x200] sm:$0xff]  ;;  %v4329_v62 = vld [vmem:[%s8721_s18 + $0x210] sm:$0xff] }
 0x713   :  { %5062 = vmatprep.subr.bf16.mxu0 %v6068_v0 }
 0x714   :  { %5076 = vmatprep.subr.bf16.mxu1 %v5075_v23 }
 0x716   :  { %5064 = vmatpush1.bf16.msra.mxu0 %v6949_v25  ;;  %v5077_v25 = vpack.c.bf16 %v1936_v21, %v1934_v20  ;;  %v4334_v20 = vld [vmem:[%s8721_s18 + $0x238] sm:$0xff]  ;;  %v5109_v21 = vpack.c.bf16 %v4329_v62, %v4327_v59  ;;  %v4369_v59 = vld [vmem:[%s8721_s18 + $0x350] sm:$0xff] }
 0x717   :  { %5065 = vmatprep.subr.bf16.mxu0 %v6068_v0 }
 0x718   :  { %5078 = vmatpush1.bf16.msra.mxu1 %v5077_v25 }
 0x719   :  { %5080 = vmatprep.subr.bf16.mxu1 %v5071_v58  ;;  %v4328_v58 = vld [vmem:[%s8721_s18 + $0x208] sm:$0xff] }
 0x71a   :  { %5067 = vmatpush1.bf16.msra.mxu0 %v6959_v31 }
 0x71b   :  { %5068 = vmatprep.subr.bf16.mxu0 %v6068_v0 }
 0x71e   :  { %5070 = vmatpush1.bf16.msra.mxu0 %v6969_v35 }
 0x721   :  { %1913 = vmatmul.mubr.f32.vlgmr.msra.gmra.mrb[18].mxu0 %v1835_v46  ;;  %v5103_v46 = vpack.c.bf16 %v4326_v33, %v4324_v29  ;;  %v4364_v29 = vld [vmem:[%s8721_s18 + $0x328] sm:$0xff]  ;;  %v4366_v33 = vld [vmem:[%s8721_s18 + $0x338] sm:$0xff] }
 0x7bc   :  { %v1820_v0 = vpop.f32.mrb[16].mxu0 }
 0x7bd   :  { %v1822_v22 = vpop.f32.mrb[17].mxu0  ;;  %v1918_v28 = vmul.f32 0.010204081, %v1820_v0  ;;  %v4331_v0 = vld [vmem:[%s8721_s18 + $0x220] sm:$0xff] }
 0x7be   :  { %v4333_v22 = vld [vmem:[%s8721_s18 + $0x230] sm:$0xff] }
 0x7bf   :  { %v1920_v32 = vmul.f32 %v1918_v28, %v1918_v28 }
 0x7f4   :  { %v1914_v31 = vpop.f32.mrb[18].mxu0 }
 0x7f5   :  { %v1919_v34 = vmul.f32 0.010204081, %v1914_v31  ;;  %v1916_v35 = vpop.f32.mrb[19].mxu0  ;;  %v4338_v31 = vld [vmem:[%s8721_s18 + $0x258] sm:$0xff] }
 0x7f6   :  { %v4335_v35 = vld [vmem:[%s8721_s18 + $0x240] sm:$0xff] }
 0x7f7   :  { %v1921_v44 = vsub.f32 %v1919_v34, %v1920_v32  ;;  %v5113_v32 = vpack.c.bf16 %v4333_v22, %v4331_v0  ;;  %v4373_v0 = vld [vmem:[%s8721_s18 + $0x370] sm:$0xff] }
 0x7f9   :  { %v1922_v47 = vmax.f32 %v1921_v44, 0.0  ;;  %v4337_v44 = vld [vmem:[%s8721_s18 + $0x250] sm:$0xff] }
 0x7fb   :  { %v1924_v48 = vadd.f32 1e-05, %v1922_v47  ;;  %v4340_v47 = vld [vmem:[%s8721_s18 + $0x268] sm:$0xff] }
 0x7fd   :  { %5770 = vrsqrt.f32 %v1924_v48  ;;  %v4342_v48 = vld [vmem:[%s8721_s18 + $0x278] sm:$0xff] }
 0x807   :  { %v5771_v55 = vpop.eup %5770 }
 0x808   :  { %v1926_v56 = vmul.f32 %v5771_v55, %v1923_v50  ;;  %v5117_v50 = vpack.c.bf16 %v4337_v44, %v4335_v35  ;;  %v5119_v55 = vpack.c.bf16 %v4342_v48, %v4340_v47  ;;  %v2551_v35 = vld [vmem:[%s8676_s15 + $0x88] sm:$0xff]  ;;  %v2534_v44 = vld [vmem:[%s8676_s15] sm:$0xff] }
 0x809   :  { %v2535_v48 = vld [vmem:[%s8676_s15 + $0x8] sm:$0xff] }
 0x80a   :  { %4310 = vmatmul.mubr.msk.f32.vlgmr.msra.gmra.mrb[28].mxu1 %vm1938_vm8, %v1926_v56  ;;  %v1928_v61 = vmul.f32 %v1926_v56, %v1918_v28  ;;  %v4336_v28 = vld [vmem:[%s8721_s18 + $0x248] sm:$0xff]  ;;  %v4339_v56 = vld [vmem:[%s8721_s18 + $0x260] sm:$0xff] }
 0x80b   :  { %5082 = vmatpush1.bf16.msra.mxu1 %v5073_v19  ;;  %2080 = vmatprep.mubr.f32.mxu1 %v6070_v1  ;;  %v5107_v19 = vpack.c.bf16 %v4330_v17, %v4328_v58  ;;  %v5115_v34 = vpack.c.bf16 %v4338_v31, %v4336_v28  ;;  %v4370_v58 = vld [vmem:[%s8721_s18 + $0x358] sm:$0xff]  ;;  %v2198_v28 = vld [vmem:[%s8721_s18 + $0x8] sm:$0xff] }
 0x80c   :  { %5084 = vmatprep.subr.bf16.mxu1 %v5075_v23  ;;  %v1929_v26 = vsub.f32 %v1927_v2, %v1928_v61  ;;  %v4332_v23 = vld [vmem:[%s8721_s18 + $0x228] sm:$0xff]  ;;  %v4341_v61 = vld [vmem:[%s8721_s18 + $0x270] sm:$0xff]  ;;  %v2200_v31 = vld [vmem:[%s8721_s18 + $0x18] sm:$0xff] }
 0x80d   :  { %v4344_v2 = vld [vmem:[%s8721_s18 + $0x288] sm:$0xff] }
 0x80f   :  { %5086 = vmatpush1.bf16.msra.mxu1 %v5077_v25  ;;  %v5111_v25 = vpack.c.bf16 %v4334_v20, %v4332_v23  ;;  %v4372_v23 = vld [vmem:[%s8721_s18 + $0x368] sm:$0xff]  ;;  %v4374_v20 = vld [vmem:[%s8721_s18 + $0x378] sm:$0xff] }
 0x812   :  { %4311 = vmatmul.mubr.msk.f32.vlgmr.msra.gmra.mrb[30].mxu1 %vm1938_vm8, %v1929_v26  ;;  %v4346_v26 = vld [vmem:[%s8721_s18 + $0x298] sm:$0xff] }
 0x813   :  { %2190 = vmatprep.mubr.f32.mxu1 %v6070_v1 }
 0x8dd   :  { %v2008_v3 = vpop.f32.mrb[28].mxu1 }
 0x8de   :  { %v2090_v38 = vrot.slane %v2008_v3, %v6788_v40  ;;  %v2010_v5 = vpop.f32.mrb[29].mxu1  ;;  %v5121_v3 = vpack.c.bf16 %v4341_v61, %v4339_v56  ;;  %v7242_v56 = vpack.c.bf16 %v2535_v48, %v2534_v44  ;;  %v2217_v48 = vld [vmem:[%s8721_s18 + $0xa0] sm:$0xff] }
 0x8df   :  { %v2094_v24 = vrot.slane %v2010_v5, %v6788_v40  ;;  %v4343_v5 = vld [vmem:[%s8721_s18 + $0x280] sm:$0xff] }
 0x8e0   :  { %v2095_v6 = vmul.f32 %v2090_v38, %v6973_v37  ;;  %v2097_v30 = vmul.f32 %v2090_v38, %v6979_v45  ;;  %v4320_v45 = vld [vmem:[%s8721_s18 + $0x1c8] sm:$0xff]  ;;  %v5123_v38 = vpack.c.bf16 %v4346_v26, %v4344_v2  ;;  %v2536_v2 = vld [vmem:[%s8676_s15 + $0x10] sm:$0xff]  ;;  %v2537_v26 = vld [vmem:[%s8676_s15 + $0x18] sm:$0xff] }
 0x8e1   :  { %v2096_v42 = vmul.f32 %v2094_v24, %v6975_v41  ;;  %v2098_v8 = vmul.f32 %v2094_v24, %v6987_v52  ;;  %v4322_v52 = vld [vmem:[%s8721_s18 + $0x1d8] sm:$0xff]  ;;  %v4345_v24 = vld [vmem:[%s8721_s18 + $0x290] sm:$0xff] }
 0x8e2   :  { %v5099_v15 = vpack.c.bf16 %v4322_v52, %v4320_v45  ;;  %v4360_v45 = vld [vmem:[%s8721_s18 + $0x308] sm:$0xff]  ;;  %v4362_v52 = vld [vmem:[%s8721_s18 + $0x318] sm:$0xff] }
 0x8e5   :  { %v2082_v9 = vpop.f32.mrb[30].mxu1 }
 0x8e6   :  { %v2102_v11 = vrot.slane %v2082_v9, %v6788_v40  ;;  %v2084_v12 = vpop.f32.mrb[31].mxu1  ;;  %v4347_v9 = vld [vmem:[%s8721_s18 + $0x2a0] sm:$0xff] }
 0x8e7   :  { %v2106_v51 = vrot.slane %v2084_v12, %v6788_v40  ;;  %v4352_v12 = vld [vmem:[%s8721_s18 + $0x2c8] sm:$0xff] }
 0x8e8   :  { %v2107_v54 = vadd.f32 %v2102_v11, %v2095_v6  ;;  %v2109_v57 = vadd.f32 %v2102_v11, %v2097_v30  ;;  %v4348_v6 = vld [vmem:[%s8721_s18 + $0x2a8] sm:$0xff]  ;;  %v4350_v30 = vld [vmem:[%s8721_s18 + $0x2b8] sm:$0xff]  ;;  %v4349_v11 = vld [vmem:[%s8721_s18 + $0x2b0] sm:$0xff] }
 0x8e9   :  { %v2108_v60 = vadd.f32 %v2106_v51, %v2096_v42  ;;  %v2110_v63 = vadd.f32 %v2106_v51, %v2098_v8  ;;  %v5125_v42 = vpack.c.bf16 %v4345_v24, %v4343_v5  ;;  %v5127_v8 = vpack.c.bf16 %v4350_v30, %v4348_v6  ;;  %v4354_v51 = vld [vmem:[%s8721_s18 + $0x2d8] sm:$0xff]  ;;  %v2538_v6 = vld [vmem:[%s8676_s15 + $0x20] sm:$0xff]  ;;  %v2539_v30 = vld [vmem:[%s8676_s15 + $0x28] sm:$0xff] }
 0x8ea   :  { %v2111_v4 = vmax.f32 %v2107_v54, 0.0  ;;  %v2113_v7 = vmax.f32 %v2109_v57, 0.0  ;;  %v5129_v54 = vpack.c.bf16 %v4349_v11, %v4347_v9  ;;  %v5131_v57 = vpack.c.bf16 %v4354_v51, %v4352_v12  ;;  %v2540_v12 = vld [vmem:[%s8676_s15 + $0x30] sm:$0xff]  ;;  %v2541_v51 = vld [vmem:[%s8676_s15 + $0x38] sm:$0xff] }
 0x8eb   :  { %v2112_v10 = vmax.f32 %v2108_v60, 0.0  ;;  %v2114_v37 = vmax.f32 %v2110_v63, 0.0  ;;  %v4351_v60 = vld [vmem:[%s8721_s18 + $0x2c0] sm:$0xff]  ;;  %v4353_v63 = vld [vmem:[%s8721_s18 + $0x2d0] sm:$0xff]  ;;  %v7260_v5 = vpack.c.bf16 %v2537_v26, %v2536_v2  ;;  %v7278_v9 = vpack.c.bf16 %v2539_v30, %v2538_v6  ;;  %v2224_v2 = vld [vmem:[%s8721_s18 + $0xd8] sm:$0xff] }
 0x8ec   :  { %v5090_v13 = vpack.c.bf16 %v2113_v7, %v2111_v4  ;;  %v4356_v4 = vld [vmem:[%s8721_s18 + $0x2e8] sm:$0xff]  ;;  %v4358_v7 = vld [vmem:[%s8721_s18 + $0x2f8] sm:$0xff]  ;;  %v2223_v6 = vld [vmem:[%s8721_s18 + $0xd0] sm:$0xff] }
 0x8ed   :  { %v5087_v41 = vpack.c.bf16 %v2114_v37, %v2112_v10  ;;  %v5133_v10 = vpack.c.bf16 %v4353_v63, %v4351_v60  ;;  %v5135_v37 = vpack.c.bf16 %v4358_v7, %v4356_v4  ;;  %v7296_v60 = vpack.c.bf16 %v2541_v51, %v2540_v12  ;;  %v2542_v4 = vld [vmem:[%s8676_s15 + $0x40] sm:$0xff]  ;;  %v2543_v7 = vld [vmem:[%s8676_s15 + $0x48] sm:$0xff] }
 0x8ee   :  { %v2226_v30 = vld [vmem:[%s8721_s18 + $0xe8] sm:$0xff]  ;;  %v2225_v51 = vld [vmem:[%s8721_s18 + $0xe0] sm:$0xff] }
 0x8ef   :  { %5089 = vmatprep.subr.msk.bf16.mxu1 %vm5088_vm10, %v5087_v41 }
 0x8f0   :  { %5092 = vmatpush1.bf16.msk.msra.mxu1 %vm5088_vm10, %v5090_v13 }
 0x8f1   :  { %5095 = vmatprep.subr.msk.bf16.mxu1 %vm5088_vm10, %v5087_v41  ;;  %v4357_v41 = vld [vmem:[%s8721_s18 + $0x2f0] sm:$0xff] }
 0x8f3   :  { %4314 = vmatmul.mubr.msk.f32.vlgmr.msra.gmra.mrb[32].mxu1 %vm2116_vm11, %v2115_v14 }
 0x8f4   :  { %5098 = vmatpush1.bf16.msk.msra.mxu1 %vm5088_vm10, %v5090_v13  ;;  %2322 = vmatprep.mubr.f32.mxu1 %v6070_v1  ;;  %v4355_v13 = vld [vmem:[%s8721_s18 + $0x2e0] sm:$0xff] }
 0x8f5   :  { %5100 = vmatprep.subr.bf16.mxu1 %v5099_v15  ;;  %v5137_v14 = vpack.c.bf16 %v4357_v41, %v4355_v13  ;;  %v5139_v15 = vpack.c.bf16 %v4362_v52, %v4360_v45  ;;  %v2197_v41 = vld [vmem:[%s8721_s18] sm:$0xff]  ;;  %v2199_v45 = vld [vmem:[%s8721_s18 + $0x10] sm:$0xff]  ;;  %v2202_v52 = vld [vmem:[%s8721_s18 + $0x28] sm:$0xff] }
 0x8f7   :  { %4318 = vmatmul.mubr.msk.f32.vlgmr.msra.gmra.mrb[34].mxu1 %vm2116_vm11, %v4315_v36  ;;  %v5141_v36 = vpack.c.bf16 %v4361_v27, %v4359_v16  ;;  %v5157_v16 = vpack.c.bf16 %v2199_v45, %v2197_v41  ;;  %v2229_v41 = vld [vmem:[%s8721_s18 + $0x100] sm:$0xff]  ;;  %v2231_v45 = vld [vmem:[%s8721_s18 + $0x110] sm:$0xff] }
 0x8f8   :  { %5102 = vmatpush1.bf16.msra.mxu1 %v5101_v43  ;;  %v5143_v43 = vpack.c.bf16 %v4366_v33, %v4364_v29  ;;  %v2201_v33 = vld [vmem:[%s8721_s18 + $0x20] sm:$0xff] }
 0x8f9   :  { %5104 = vmatprep.subr.bf16.mxu1 %v5103_v46  ;;  %v4363_v46 = vld [vmem:[%s8721_s18 + $0x320] sm:$0xff] }
 0x8fa   :  { %v5145_v17 = vpack.c.bf16 %v4365_v49, %v4363_v46  ;;  %v2208_v46 = vld [vmem:[%s8721_s18 + $0x58] sm:$0xff] }
 0x8fc   :  { %5106 = vmatpush1.bf16.msra.mxu1 %v5105_v18  ;;  %v5147_v18 = vpack.c.bf16 %v4370_v58, %v4368_v53  ;;  %v2205_v58 = vld [vmem:[%s8721_s18 + $0x40] sm:$0xff] }
 0x8fd   :  { %5108 = vmatprep.subr.bf16.mxu1 %v5107_v19  ;;  %v4367_v19 = vld [vmem:[%s8721_s18 + $0x340] sm:$0xff] }
 0x8fe   :  { %v5149_v62 = vpack.c.bf16 %v4369_v59, %v4367_v19  ;;  %v2212_v19 = vld [vmem:[%s8721_s18 + $0x78] sm:$0xff] }
 0x900   :  { %5110 = vmatpush1.bf16.msra.mxu1 %v5109_v21  ;;  %v5151_v21 = vpack.c.bf16 %v4374_v20, %v4372_v23  ;;  %v2209_v23 = vld [vmem:[%s8721_s18 + $0x60] sm:$0xff]  ;;  %v2211_v20 = vld [vmem:[%s8721_s18 + $0x70] sm:$0xff] }
 0x901   :  { %5112 = vmatprep.subr.bf16.mxu1 %v5111_v25  ;;  %v4371_v25 = vld [vmem:[%s8721_s18 + $0x360] sm:$0xff] }
 0x902   :  { %v5153_v22 = vpack.c.bf16 %v4373_v0, %v4371_v25  ;;  %v2216_v25 = vld [vmem:[%s8721_s18 + $0x98] sm:$0xff]  ;;  %v5169_v0 = vpack.c.bf16 %v2211_v20, %v2209_v23  ;;  %v2246_v23 = vld [vmem:[%s8721_s18 + $0x188] sm:$0xff] }
 0x903   :  { %v2248_v20 = vld [vmem:[%s8721_s18 + $0x198] sm:$0xff] }
 0x904   :  { %5114 = vmatpush1.bf16.msra.mxu1 %v5113_v32  ;;  %v5155_v32 = vpack.c.bf16 %v2200_v31, %v2198_v28  ;;  %v2213_v28 = vld [vmem:[%s8721_s18 + $0x80] sm:$0xff]  ;;  %v2215_v31 = vld [vmem:[%s8721_s18 + $0x90] sm:$0xff] }
 0x905   :  { %5116 = vmatprep.subr.bf16.mxu1 %v5115_v34  ;;  %v2550_v34 = vld [vmem:[%s8676_s15 + $0x80] sm:$0xff] }
 0x906   :  { %v7231_v47 = vpack.c.bf16 %v2551_v35, %v2550_v34  ;;  %v2220_v34 = vld [vmem:[%s8721_s18 + $0xb8] sm:$0xff]  ;;  %v5173_v35 = vpack.c.bf16 %v2215_v31, %v2213_v28  ;;  %v2250_v28 = vld [vmem:[%s8721_s18 + $0x1a8] sm:$0xff] }
 0x907   :  { %v2252_v31 = vld [vmem:[%s8721_s18 + $0x1b8] sm:$0xff] }
 0x908   :  { %5118 = vmatpush1.bf16.msra.mxu1 %v5117_v50  ;;  %v2552_v50 = vld [vmem:[%s8676_s15 + $0x90] sm:$0xff]  ;;  %5212 = vmatprep.subr.bf16.mxu0 %v7231_v47 }
 0x909   :  { %5120 = vmatprep.subr.bf16.mxu1 %v5119_v55  ;;  %v2553_v55 = vld [vmem:[%s8676_s15 + $0x98] sm:$0xff]  ;;  %5214 = vmatpush3.bf16.msra.mxu0 %v7242_v56 }
 0x90a   :  { %v7244_v61 = vpack.c.bf16 %v2553_v55, %v2552_v50  ;;  %v2219_v50 = vld [vmem:[%s8721_s18 + $0xb0] sm:$0xff]  ;;  %v2222_v55 = vld [vmem:[%s8721_s18 + $0xc8] sm:$0xff] }
 0x90b   :  { %v5177_v26 = vpack.c.bf16 %v2219_v50, %v2217_v48  ;;  %v2560_v50 = vld [vmem:[%s8676_s15 + $0xd0] sm:$0xff] }
 0x90c   :  { %5122 = vmatpush1.bf16.msra.mxu1 %v5121_v3  ;;  %v2554_v3 = vld [vmem:[%s8676_s15 + $0xa0] sm:$0xff]  ;;  %5216 = vmatprep.subr.bf16.mxu0 %v7244_v61 }
 0x90d   :  { %5124 = vmatprep.subr.bf16.mxu1 %v5123_v38  ;;  %v2555_v38 = vld [vmem:[%s8676_s15 + $0xa8] sm:$0xff]  ;;  %5218 = vmatpush3.bf16.msra.mxu0 %v7260_v5 }
 0x90e   :  { %v7263_v24 = vpack.c.bf16 %v2555_v38, %v2554_v3  ;;  %v5179_v3 = vpack.c.bf16 %v2224_v2, %v2222_v55  ;;  %v2221_v38 = vld [vmem:[%s8721_s18 + $0xc0] sm:$0xff]  ;;  %v2561_v55 = vld [vmem:[%s8676_s15 + $0xd8] sm:$0xff] }
 0x90f   :  { %v5231_v2 = vpack.c.bf16 %v2561_v55, %v2560_v50  ;;  %v2754_v55 = vld [vmem:[#allocation13 + $0x50] sm:$0xff] }
 0x910   :  { %5126 = vmatpush1.bf16.msra.mxu1 %v5125_v42  ;;  %v2556_v42 = vld [vmem:[%s8676_s15 + $0xb0] sm:$0xff]  ;;  %5220 = vmatprep.subr.bf16.mxu0 %v7263_v24 }
 0x911   :  { %5128 = vmatprep.subr.bf16.mxu1 %v5127_v8  ;;  %v2557_v8 = vld [vmem:[%s8676_s15 + $0xb8] sm:$0xff]  ;;  %5222 = vmatpush3.bf16.msra.mxu0 %v7278_v9 }
 0x912   :  { %v7281_v11 = vpack.c.bf16 %v2557_v8, %v2556_v42  ;;  %v2228_v42 = vld [vmem:[%s8721_s18 + $0xf8] sm:$0xff]  ;;  %v5181_v8 = vpack.c.bf16 %v2223_v6, %v2221_v38  ;;  %v2563_v6 = vld [vmem:[%s8676_s15 + $0xe8] sm:$0xff] }
 0x913   :  { %v5183_v12 = vpack.c.bf16 %v2228_v42, %v2226_v30  ;;  %v2546_v42 = vld [vmem:[%s8676_s15 + $0x60] sm:$0xff] }
 0x914   :  { %5130 = vmatpush1.bf16.msra.mxu1 %v5129_v54  ;;  %v2558_v54 = vld [vmem:[%s8676_s15 + $0xc0] sm:$0xff]  ;;  %5224 = vmatprep.subr.bf16.mxu0 %v7281_v11 }
 0x915   :  { %5132 = vmatprep.subr.bf16.mxu1 %v5131_v57  ;;  %v2559_v57 = vld [vmem:[%s8676_s15 + $0xc8] sm:$0xff]  ;;  %5226 = vmatpush3.bf16.msra.mxu0 %v7296_v60 }
 0x916   :  { %v7299_v63 = vpack.c.bf16 %v2559_v57, %v2558_v54  ;;  %v2227_v54 = vld [vmem:[%s8721_s18 + $0xf0] sm:$0xff]  ;;  %v2230_v57 = vld [vmem:[%s8721_s18 + $0x108] sm:$0xff] }
 0x918   :  { %5134 = vmatpush1.bf16.msra.mxu1 %v5133_v10  ;;  %v7308_v10 = vpack.c.bf16 %v2543_v7, %v2542_v4  ;;  %5228 = vmatprep.subr.bf16.mxu0 %v7299_v63  ;;  %v2232_v4 = vld [vmem:[%s8721_s18 + $0x118] sm:$0xff]  ;;  %v5185_v7 = vpack.c.bf16 %v2227_v54, %v2225_v51  ;;  %v2564_v51 = vld [vmem:[%s8676_s15 + $0xf0] sm:$0xff] }
 0x919   :  { %5136 = vmatprep.subr.bf16.mxu1 %v5135_v37  ;;  %v2565_v54 = vld [vmem:[%s8676_s15 + $0xf8] sm:$0xff] }
 0x91a   :  { %5230 = vmatpush3.bf16.msra.mxu0 %v7308_v10 }
 0x91b   :  { %5232 = vmatprep.subr.bf16.mxu0 %v5231_v2 }
 0x91c   :  { %5138 = vmatpush1.bf16.msra.mxu1 %v5137_v14  ;;  %v2204_v14 = vld [vmem:[%s8721_s18 + $0x38] sm:$0xff] }
 0x91d   :  { %5140 = vmatprep.subr.bf16.mxu1 %v5139_v15  ;;  %v5159_v29 = vpack.c.bf16 %v2204_v14, %v2202_v52  ;;  %v2234_v52 = vld [vmem:[%s8721_s18 + $0x128] sm:$0xff]  ;;  %v2236_v14 = vld [vmem:[%s8721_s18 + $0x138] sm:$0xff] }
 0x920   :  { %5142 = vmatpush1.bf16.msra.mxu1 %v5141_v36  ;;  %v2203_v36 = vld [vmem:[%s8721_s18 + $0x30] sm:$0xff] }
 0x921   :  { %5144 = vmatprep.subr.bf16.mxu1 %v5143_v43  ;;  %v2206_v43 = vld [vmem:[%s8721_s18 + $0x48] sm:$0xff]  ;;  %v5161_v49 = vpack.c.bf16 %v2203_v36, %v2201_v33  ;;  %v2240_v36 = vld [vmem:[%s8721_s18 + $0x158] sm:$0xff] }
 0x922   :  { %v5163_v53 = vpack.c.bf16 %v2208_v46, %v2206_v43  ;;  %v2238_v33 = vld [vmem:[%s8721_s18 + $0x148] sm:$0xff] }
 0x923   :  { %v5195_v46 = vpack.c.bf16 %v2240_v36, %v2238_v33 }
 0x924   :  { %5146 = vmatpush1.bf16.msra.mxu1 %v5145_v17  ;;  %v2207_v17 = vld [vmem:[%s8721_s18 + $0x50] sm:$0xff] }
 0x925   :  { %5148 = vmatprep.subr.bf16.mxu1 %v5147_v18  ;;  %v2210_v18 = vld [vmem:[%s8721_s18 + $0x68] sm:$0xff]  ;;  %v5165_v59 = vpack.c.bf16 %v2207_v17, %v2205_v58  ;;  %v2244_v17 = vld [vmem:[%s8721_s18 + $0x178] sm:$0xff] }
 0x926   :  { %v2242_v58 = vld [vmem:[%s8721_s18 + $0x168] sm:$0xff] }
 0x928   :  { %5150 = vmatpush1.bf16.msra.mxu1 %v5149_v62  ;;  %v5167_v62 = vpack.c.bf16 %v2212_v19, %v2210_v18  ;;  %v5199_v19 = vpack.c.bf16 %v2244_v17, %v2242_v58 }
 0x929   :  { %5152 = vmatprep.subr.bf16.mxu1 %v5151_v21  ;;  %v2214_v21 = vld [vmem:[%s8721_s18 + $0x88] sm:$0xff] }
 0x92c   :  { %5154 = vmatpush1.bf16.msra.mxu1 %v5153_v22  ;;  %v5171_v22 = vpack.c.bf16 %v2216_v25, %v2214_v21  ;;  %v5203_v25 = vpack.c.bf16 %v2248_v20, %v2246_v23 }
 0x92d   :  { %5156 = vmatprep.subr.bf16.mxu1 %v5155_v32  ;;  %v2218_v32 = vld [vmem:[%s8721_s18 + $0xa8] sm:$0xff] }
 0x92e   :  { %v5175_v44 = vpack.c.bf16 %v2220_v34, %v2218_v32  ;;  %v5207_v34 = vpack.c.bf16 %v2252_v31, %v2250_v28  ;;  %v2748_v31 = vld [vmem:[#allocation13 + $0x20] sm:$0xff] }
 0x9c6   :  { %v7312_v37 = vpop.f32.mrb[32].mxu1 }
 0x9c7   :  { %v2194_v13 = vpop.f32.mrb[33].mxu1 }
 0x9ca   :  { %v2324_v15 = vpop.f32.mrb[34].mxu1 }
 0x9cb   :  { %v2326_v27 = vpop.f32.mrb[35].mxu1 }
 0x9cc   :  { %4375 = vmatprep.mubr.msk.f32.mxu1 %vm1740_vm6, %v2326_v27  ;;  %v2233_v27 = vld [vmem:[%s8721_s18 + $0x120] sm:$0xff] }
 0x9cd   :  { %2454 = vmatmul.mubr.f32.vlgmr.msra.gmra.mrb[36].mxu1 %v2324_v15  ;;  %v5189_v15 = vpack.c.bf16 %v2231_v45, %v2229_v41 }
 0x9ce   :  { %5158 = vmatpush1.bf16.msra.mxu1 %v5157_v16  ;;  %4376 = vmatprep.mubr.msk.f32.mxu1 %vm1740_vm6, %v2194_v13  ;;  %v5187_v13 = vpack.c.bf16 %v2232_v4, %v2230_v57  ;;  %v5191_v16 = vpack.c.bf16 %v2236_v14, %v2234_v52  ;;  %v2548_v57 = vld [vmem:[%s8676_s15 + $0x70] sm:$0xff]  ;;  %v5239_v4 = vpack.c.bf16 %v2565_v54, %v2564_v51 }
 0x9cf   :  { %5160 = vmatprep.subr.bf16.mxu1 %v5159_v29  ;;  %v2235_v29 = vld [vmem:[%s8721_s18 + $0x130] sm:$0xff] }
 0x9d0   :  { %v5193_v43 = vpack.c.bf16 %v2235_v29, %v2233_v27 }
 0x9d2   :  { %5162 = vmatpush1.bf16.msra.mxu1 %v5161_v49  ;;  %v2237_v49 = vld [vmem:[%s8721_s18 + $0x140] sm:$0xff] }
 0x9d3   :  { %5164 = vmatprep.subr.bf16.mxu1 %v5163_v53  ;;  %v2239_v53 = vld [vmem:[%s8721_s18 + $0x150] sm:$0xff] }
 0x9d4   :  { %v5197_v18 = vpack.c.bf16 %v2239_v53, %v2237_v49 }
 0x9d6   :  { %5166 = vmatpush1.bf16.msra.mxu1 %v5165_v59  ;;  %v2241_v59 = vld [vmem:[%s8721_s18 + $0x160] sm:$0xff] }
 0x9d7   :  { %5168 = vmatprep.subr.bf16.mxu1 %v5167_v62  ;;  %v2243_v62 = vld [vmem:[%s8721_s18 + $0x170] sm:$0xff] }
 0x9d8   :  { %v5201_v21 = vpack.c.bf16 %v2243_v62, %v2241_v59 }
 0x9da   :  { %5170 = vmatpush1.bf16.msra.mxu1 %v5169_v0  ;;  %v2245_v0 = vld [vmem:[%s8721_s18 + $0x180] sm:$0xff] }
 0x9db   :  { %5172 = vmatprep.subr.bf16.mxu1 %v5171_v22  ;;  %v2247_v22 = vld [vmem:[%s8721_s18 + $0x190] sm:$0xff] }
 0x9dc   :  { %v5205_v32 = vpack.c.bf16 %v2247_v22, %v2245_v0  ;;  %v2751_v22 = vld [vmem:[#allocation13 + $0x38] sm:$0xff] }
 0x9de   :  { %5174 = vmatpush1.bf16.msra.mxu1 %v5173_v35  ;;  %v2249_v35 = vld [vmem:[%s8721_s18 + $0x1a0] sm:$0xff] }
 0x9df   :  { %5176 = vmatprep.subr.bf16.mxu1 %v5175_v44  ;;  %v2251_v44 = vld [vmem:[%s8721_s18 + $0x1b0] sm:$0xff] }
 0x9e0   :  { %v5209_v48 = vpack.c.bf16 %v2251_v44, %v2249_v35  ;;  %v2753_v35 = vld [vmem:[#allocation13 + $0x48] sm:$0xff]  ;;  %v2755_v44 = vld [vmem:[#allocation13 + $0x58] sm:$0xff] }
 0x9e1   :  { %v5283_v50 = vpack.c.bf16 %v2755_v44, %v2753_v35  ;;  %v4403_v35 = vld [vmem:[%s8681_s20 + $0x2a8] sm:$0xff]  ;;  %v4405_v44 = vld [vmem:[%s8681_s20 + $0x2b8] sm:$0xff] }
 0x9e2   :  { %5178 = vmatpush1.bf16.msra.mxu1 %v5177_v26  ;;  %v2544_v26 = vld [vmem:[%s8676_s15 + $0x50] sm:$0xff] }
 0x9e3   :  { %5180 = vmatprep.subr.bf16.mxu1 %v5179_v3  ;;  %v2545_v3 = vld [vmem:[%s8676_s15 + $0x58] sm:$0xff] }
 0x9e4   :  { %v5233_v38 = vpack.c.bf16 %v2545_v3, %v2544_v26  ;;  %v2759_v26 = vld [vmem:[#allocation13 + $0x78] sm:$0xff] }
 0x9e6   :  { %5182 = vmatpush1.bf16.msra.mxu1 %v5181_v8  ;;  %5234 = vmatpush3.bf16.msra.mxu0 %v5233_v38  ;;  %v2547_v8 = vld [vmem:[%s8676_s15 + $0x68] sm:$0xff] }
 0x9e7   :  { %5184 = vmatprep.subr.bf16.mxu1 %v5183_v12  ;;  %v5237_v12 = vpack.c.bf16 %v2547_v8, %v2546_v42 }
 0x9ea   :  { %5186 = vmatpush1.bf16.msra.mxu1 %v5185_v7  ;;  %v2549_v7 = vld [vmem:[%s8676_s15 + $0x78] sm:$0xff] }
 0x9eb   :  { %5188 = vmatprep.subr.bf16.mxu1 %v5187_v13  ;;  %v5241_v13 = vpack.c.bf16 %v2549_v7, %v2548_v57 }
 0x9ee   :  { %5190 = vmatpush1.bf16.msra.mxu1 %v5189_v15 }
 0x9ef   :  { %5192 = vmatprep.subr.bf16.mxu1 %v5191_v16 }
 0x9f2   :  { %5194 = vmatpush1.bf16.msra.mxu1 %v5193_v43 }
 0x9f3   :  { %5196 = vmatprep.subr.bf16.mxu1 %v5195_v46 }
 0x9f6   :  { %5198 = vmatpush1.bf16.msra.mxu1 %v5197_v18 }
 0x9f7   :  { %5200 = vmatprep.subr.bf16.mxu1 %v5199_v19 }
 0x9fa   :  { %5202 = vmatpush1.bf16.msra.mxu1 %v5201_v21 }
 0x9fb   :  { %5204 = vmatprep.subr.bf16.mxu1 %v5203_v25  ;;  %v2744_v25 = vld [vmem:[#allocation13] sm:$0xff] }
 0x9fe   :  { %5206 = vmatpush1.bf16.msra.mxu1 %v5205_v32  ;;  %v2750_v32 = vld [vmem:[#allocation13 + $0x30] sm:$0xff] }
 0x9ff   :  { %5208 = vmatprep.subr.bf16.mxu1 %v5207_v34  ;;  %v5281_v34 = vpack.c.bf16 %v2750_v32, %v2748_v31  ;;  %v4398_v32 = vld [vmem:[%s8681_s20 + $0x280] sm:$0xff] }
 0xa02   :  { %5210 = vmatpush1.bf16.msra.mxu1 %v5209_v48  ;;  %v2752_v48 = vld [vmem:[#allocation13 + $0x40] sm:$0xff] }
 0xa03   :  { %v5285_v3 = vpack.c.bf16 %v2754_v55, %v2752_v48  ;;  %v4402_v55 = vld [vmem:[%s8681_s20 + $0x2a0] sm:$0xff] }
 0xa05   :  { %2528 = vmatmul.mubr.f32.vlgmr.msra.gmra.mrb[36].mxu1 %v7312_v37  ;;  %v2562_v37 = vld [vmem:[%s8676_s15 + $0xe0] sm:$0xff] }
 0xa06   :  { %v5235_v30 = vpack.c.bf16 %v2563_v6, %v2562_v37  ;;  %v2756_v37 = vld [vmem:[#allocation13 + $0x60] sm:$0xff]  ;;  %v2758_v6 = vld [vmem:[#allocation13 + $0x70] sm:$0xff] }
 0xa08   :  { %5236 = vmatprep.subr.bf16.mxu0 %v5235_v30 }
 0xa09   :  { %5238 = vmatpush3.bf16.msra.mxu0 %v5237_v12 }
 0xa0a   :  { %5240 = vmatprep.subr.bf16.mxu0 %v5239_v4 }
 0xa0d   :  { %5242 = vmatpush3.bf16.msra.mxu0 %v5241_v13 }
 0xa0e   :  { %5244 = vmatprep.subr.bf16.mxu0 %v7231_v47 }
 0xad8   :  { %v7516_v41 = vpop.f32.mrb[36].mxu1 }
 0xad9   :  { %v2566_v45 = vrot.slane %v7516_v41, 4  ;;  %v7519_v52 = vpop.f32.mrb[37].mxu1  ;;  %v2648_v23 = vmul.f32 %v7516_v41, %v7516_v41 }
 0xada   :  { %v2572_v14 = vrot.slane %v7519_v52, 4  ;;  %v2649_v15 = vmul.f32 %v7519_v52, %v7519_v52 }
 0xadb   :  { %v2567_v16 = vadd.f32 %v2566_v45, %v7516_v41  ;;  %v2650_v20 = vrot.slane %v2648_v23, 4 }
 0xadc   :  { %v2573_v27 = vadd.f32 %v2572_v14, %v7519_v52  ;;  %v2656_v29 = vrot.slane %v2649_v15, 4 }
 0xadd   :  { %v2568_v33 = vrot.slane %v2567_v16, 2  ;;  %v2651_v21 = vadd.f32 %v2650_v20, %v2648_v23  ;;  %v4388_v23 = vld [vmem:[%s8681_s20 + $0x230] sm:$0xff]  ;;  %v4391_v20 = vld [vmem:[%s8681_s20 + $0x248] sm:$0xff] }
 0xade   :  { %v2574_v36 = vrot.slane %v2573_v27, 2  ;;  %v2657_v43 = vadd.f32 %v2656_v29, %v2649_v15 }
 0xadf   :  { %v2569_v47 = vadd.f32 %v2568_v33, %v2567_v16  ;;  %v2737_v16 = vld [vmem:[#allocation15] sm:$0x1] }
 0xae0   :  { %v2575_v46 = vadd.f32 %v2574_v36, %v2573_v27  ;;  %v2658_v49 = vrot.slane %v2657_v43, 2  ;;  %v2741_v36 = vld [vmem:[#allocation16] sm:$0x1] }
 0xae1   :  { %v2570_v53 = vrot.slane %v2569_v47, 1 }
 0xae2   :  { %v2576_v58 = vrot.slane %v2575_v46, 1  ;;  %v2659_v17 = vadd.f32 %v2658_v49, %v2657_v43  ;;  %v4382_v49 = vld [vmem:[%s8681_s20 + $0x200] sm:$0xff] }
 0xae3   :  { %v2571_v59 = vadd.f32 %v2570_v53, %v2569_v47  ;;  %v4383_v47 = vld [vmem:[%s8681_s20 + $0x208] sm:$0xff] }
 0xae4   :  { %v2577_v18 = vadd.f32 %v2576_v58, %v2575_v46  ;;  %v2660_v19 = vrot.slane %v2659_v17, 1  ;;  %v4385_v46 = vld [vmem:[%s8681_s20 + $0x218] sm:$0xff]  ;;  %v4384_v58 = vld [vmem:[%s8681_s20 + $0x210] sm:$0xff] }
 0xae5   :  { %v5307_v53 = vpack.c.bf16 %v4385_v46, %v4383_v47  ;;  %v4423_v47 = vld [vmem:[%s8681_s20 + $0x348] sm:$0xff]  ;;  %v4425_v46 = vld [vmem:[%s8681_s20 + $0x358] sm:$0xff] }
 0xae6   :  { %2642 = vmatprep.mubr.f32.mxu0 %v2577_v18  ;;  %v2661_v62 = vadd.f32 %v2660_v19, %v2659_v17  ;;  %v4387_v17 = vld [vmem:[%s8681_s20 + $0x228] sm:$0xff]  ;;  %v4389_v18 = vld [vmem:[%s8681_s20 + $0x238] sm:$0xff]  ;;  %v5309_v19 = vpack.c.bf16 %v4384_v58, %v4382_v49  ;;  %v4422_v58 = vld [vmem:[%s8681_s20 + $0x340] sm:$0xff] }
 0xae7   :  { %2643 = vmatmul.mubr.f32.vlgmr.msra.gmra.mrb[20].mxu0 %v2571_v59  ;;  %v5311_v59 = vpack.c.bf16 %v4389_v18, %v4387_v17  ;;  %5308 = vmatprep.subr.bf16.mxu1 %v5307_v53  ;;  %v5347_v53 = vpack.c.bf16 %v4425_v46, %v4423_v47  ;;  %v4424_v17 = vld [vmem:[%s8681_s20 + $0x350] sm:$0xff]  ;;  %v4427_v18 = vld [vmem:[%s8681_s20 + $0x368] sm:$0xff]  ;;  %v3013_v46 = vld [vmem:[%s8681_s20 + $0x38] sm:$0xff] }
 0xae8   :  { %5246 = vmatpush3.bf16.msra.mxu0 %v7242_v56  ;;  %2726 = vmatprep.mubr.f32.mxu0 %v2661_v62  ;;  %v2652_v56 = vrot.slane %v2651_v21, 2  ;;  %v4386_v62 = vld [vmem:[%s8681_s20 + $0x220] sm:$0xff]  ;;  %v3011_v47 = vld [vmem:[%s8681_s20 + $0x28] sm:$0xff] }
 0xae9   :  { %5248 = vmatprep.subr.bf16.mxu0 %v7244_v61  ;;  %5310 = vmatpush1.bf16.msra.mxu1 %v5309_v19  ;;  %v4429_v19 = vld [vmem:[%s8681_s20 + $0x378] sm:$0xff] }
 0xaea   :  { %v2653_v61 = vadd.f32 %v2652_v56, %v2651_v21  ;;  %v4393_v21 = vld [vmem:[%s8681_s20 + $0x258] sm:$0xff]  ;;  %v5313_v56 = vpack.c.bf16 %v4388_v23, %v4386_v62  ;;  %5312 = vmatprep.subr.bf16.mxu1 %v5311_v59  ;;  %v5349_v59 = vpack.c.bf16 %v4424_v17, %v4422_v58  ;;  %v5351_v62 = vpack.c.bf16 %v4429_v19, %v4427_v18  ;;  %v4426_v23 = vld [vmem:[%s8681_s20 + $0x360] sm:$0xff]  ;;  %v3012_v19 = vld [vmem:[%s8681_s20 + $0x30] sm:$0xff] }
 0xaeb   :  { %v5375_v17 = vpack.c.bf16 %v3013_v46, %v3011_v47  ;;  %v3010_v18 = vld [vmem:[%s8681_s20 + $0x20] sm:$0xff] }
 0xaec   :  { %5250 = vmatpush3.bf16.msra.mxu0 %v7260_v5  ;;  %v2654_v5 = vrot.slane %v2653_v61, 1  ;;  %v3046_v46 = vld [vmem:[%s8681_s20 + $0x140] sm:$0xff] }
 0xaed   :  { %5252 = vmatprep.subr.bf16.mxu0 %v7263_v24  ;;  %5314 = vmatpush1.bf16.msra.mxu1 %v5313_v56  ;;  %v4433_v56 = vld [vmem:[%s8681_s20 + $0x398] sm:$0xff] }
 0xaee   :  { %v2655_v24 = vadd.f32 %v2654_v5, %v2653_v61  ;;  %v5315_v61 = vpack.c.bf16 %v4393_v21, %v4391_v20  ;;  %v4390_v5 = vld [vmem:[%s8681_s20 + $0x240] sm:$0xff]  ;;  %v4428_v20 = vld [vmem:[%s8681_s20 + $0x370] sm:$0xff]  ;;  %v4431_v21 = vld [vmem:[%s8681_s20 + $0x388] sm:$0xff] }
 0xaf0   :  { %5254 = vmatpush3.bf16.msra.mxu0 %v7278_v9  ;;  %v2745_v9 = vld [vmem:[#allocation13 + $0x8] sm:$0xff]  ;;  %5316 = vmatprep.subr.bf16.mxu1 %v5315_v61  ;;  %v5353_v61 = vpack.c.bf16 %v4428_v20, %v4426_v23  ;;  %v5377_v23 = vpack.c.bf16 %v3012_v19, %v3010_v18  ;;  %v3050_v19 = vld [vmem:[%s8681_s20 + $0x160] sm:$0xff] }
 0xaf1   :  { %5256 = vmatprep.subr.bf16.mxu0 %v7281_v11  ;;  %v2747_v11 = vld [vmem:[#allocation13 + $0x18] sm:$0xff] }
 0xaf4   :  { %5258 = vmatpush3.bf16.msra.mxu0 %v7296_v60  ;;  %v5275_v60 = vpack.c.bf16 %v2747_v11, %v2745_v9  ;;  %v4395_v9 = vld [vmem:[%s8681_s20 + $0x268] sm:$0xff]  ;;  %v4397_v11 = vld [vmem:[%s8681_s20 + $0x278] sm:$0xff] }
 0xaf5   :  { %5260 = vmatprep.subr.bf16.mxu0 %v7299_v63  ;;  %v2746_v63 = vld [vmem:[#allocation13 + $0x10] sm:$0xff] }
 0xaf6   :  { %v5277_v0 = vpack.c.bf16 %v2746_v63, %v2744_v25  ;;  %v5319_v25 = vpack.c.bf16 %v4397_v11, %v4395_v9  ;;  %v4394_v63 = vld [vmem:[%s8681_s20 + $0x260] sm:$0xff]  ;;  %v4432_v9 = vld [vmem:[%s8681_s20 + $0x390] sm:$0xff]  ;;  %v4435_v11 = vld [vmem:[%s8681_s20 + $0x3a8] sm:$0xff] }
 0xaf8   :  { %5262 = vmatpush3.bf16.msra.mxu0 %v7308_v10  ;;  %v2749_v10 = vld [vmem:[#allocation13 + $0x28] sm:$0xff] }
 0xaf9   :  { %5264 = vmatprep.subr.bf16.mxu0 %v5231_v2  ;;  %v5279_v28 = vpack.c.bf16 %v2751_v22, %v2749_v10  ;;  %v2757_v2 = vld [vmem:[#allocation13 + $0x68] sm:$0xff]  ;;  %v4399_v10 = vld [vmem:[%s8681_s20 + $0x288] sm:$0xff] }
 0xafa   :  { %v4401_v22 = vld [vmem:[%s8681_s20 + $0x298] sm:$0xff] }
 0xafb   :  { %v5323_v31 = vpack.c.bf16 %v4401_v22, %v4399_v10  ;;  %v4436_v10 = vld [vmem:[%s8681_s20 + $0x3b0] sm:$0xff]  ;;  %v4439_v22 = vld [vmem:[%s8681_s20 + $0x3c8] sm:$0xff] }
 0xafc   :  { %5266 = vmatpush3.bf16.msra.mxu0 %v5233_v38  ;;  %v5287_v38 = vpack.c.bf16 %v2759_v26, %v2757_v2  ;;  %v4404_v2 = vld [vmem:[%s8681_s20 + $0x2b0] sm:$0xff]  ;;  %v4407_v26 = vld [vmem:[%s8681_s20 + $0x2c8] sm:$0xff] }
 0xafd   :  { %5268 = vmatprep.subr.bf16.mxu0 %v5235_v30  ;;  %v5289_v30 = vpack.c.bf16 %v2758_v6, %v2756_v37  ;;  %v4406_v6 = vld [vmem:[%s8681_s20 + $0x2c0] sm:$0xff] }
 0xb00   :  { %5270 = vmatpush3.bf16.msra.mxu0 %v5237_v12 }
 0xb01   :  { %5272 = vmatprep.subr.bf16.mxu0 %v5239_v4 }
 0xb04   :  { %5274 = vmatpush3.bf16.msra.mxu0 %v5241_v13 }
 0xb05   :  { %5276 = vmatprep.subr.bf16.mxu0 %v5275_v60 }
 0xb07   :  { %2727 = vmatmul.mubr.f32.vlgmr.msra.gmra.mrb[22].mxu0 %v2655_v24  ;;  %v4392_v24 = vld [vmem:[%s8681_s20 + $0x250] sm:$0xff] }
 0xb08   :  { %2827 = vmatprep.mubr.f32.mxu0 %v6070_v1  ;;  %5278 = vmatpush1.bf16.msra.mxu0 %v5277_v0 }
 0xb09   :  { %5280 = vmatprep.subr.bf16.mxu0 %v5279_v28 }
 0xb0c   :  { %5282 = vmatpush1.bf16.msra.mxu0 %v5281_v34 }
 0xb0d   :  { %5284 = vmatprep.subr.bf16.mxu0 %v5283_v50 }
 0xb10   :  { %5286 = vmatpush1.bf16.msra.mxu0 %v5285_v3 }
 0xb11   :  { %5288 = vmatprep.subr.bf16.mxu0 %v5287_v38 }
 0xb14   :  { %5290 = vmatpush1.bf16.msra.mxu0 %v5289_v30 }
 0xb15   :  { %5292 = vmatprep.subr.bf16.mxu0 %v5275_v60  ;;  %v5317_v60 = vpack.c.bf16 %v4392_v24, %v4390_v5  ;;  %v5355_v5 = vpack.c.bf16 %v4433_v56, %v4431_v21  ;;  %v4430_v24 = vld [vmem:[%s8681_s20 + $0x380] sm:$0xff] }
 0xb16   :  { %v3014_v56 = vld [vmem:[%s8681_s20 + $0x40] sm:$0xff] }
 0xb17   :  { %5318 = vmatpush1.bf16.msra.mxu1 %v5317_v60  ;;  %v4437_v60 = vld [vmem:[%s8681_s20 + $0x3b8] sm:$0xff] }
 0xb18   :  { %5320 = vmatprep.subr.bf16.mxu1 %v5319_v25  ;;  %v5357_v25 = vpack.c.bf16 %v4432_v9, %v4430_v24  ;;  %v3019_v24 = vld [vmem:[%s8681_s20 + $0x68] sm:$0xff]  ;;  %v3021_v9 = vld [vmem:[%s8681_s20 + $0x78] sm:$0xff] }
 0xbba   :  { %v4628_v42 = vpop.f32.mrb[20].mxu0 }
 0xbbb   :  { %v4629_v8 = vpop.f32.mrb[21].mxu0 }
 0xbbc   :  { %v4630_v12 = vadd.f32 %v4629_v8, %v4628_v42  ;;  %v4411_v42 = vld [vmem:[%s8681_s20 + $0x2e8] sm:$0xff]  ;;  %v4413_v8 = vld [vmem:[%s8681_s20 + $0x2f8] sm:$0xff] }
 0xbbe   :  { %v2732_v51 = vmul.f32 0.03125, %v4630_v12 }
 0xbc0   :  { %v2734_v7 = vmul.f32 %v2732_v51, %v2732_v51 }
 0xbda   :  { %v4663_v54 = vpop.f32.mrb[22].mxu0 }
 0xbdb   :  { %v4664_v57 = vpop.f32.mrb[23].mxu0 }
 0xbdc   :  { %v4665_v4 = vadd.f32 %v4664_v57, %v4663_v54  ;;  %v4410_v54 = vld [vmem:[%s8681_s20 + $0x2e0] sm:$0xff]  ;;  %v4412_v57 = vld [vmem:[%s8681_s20 + $0x2f0] sm:$0xff] }
 0xbde   :  { %v2733_v13 = vmul.f32 0.03125, %v4665_v4  ;;  %v4415_v4 = vld [vmem:[%s8681_s20 + $0x308] sm:$0xff] }
 0xbe0   :  { %v2735_v45 = vsub.f32 %v2733_v13, %v2734_v7  ;;  %v4417_v7 = vld [vmem:[%s8681_s20 + $0x318] sm:$0xff]  ;;  %v5337_v13 = vpack.c.bf16 %v4412_v57, %v4410_v54  ;;  %v2930_v54 = vld [vmem:[%s8680_s19] sm:$0x3]  ;;  %v4512_v57 = vld [vmem:[%s8680_s19 + $0x6] sm:$0x3] }
 0xbe2   :  { %v2736_v14 = vmax.f32 %v2735_v45, 0.0  ;;  %v5339_v45 = vpack.c.bf16 %v4417_v7, %v4415_v4  ;;  %v4443_v4 = vld [vmem:[%s8681_s20 + $0x3e8] sm:$0xff]  ;;  %v4445_v7 = vld [vmem:[%s8681_s20 + $0x3f8] sm:$0xff] }
 0xbe4   :  { %v2738_v15 = vadd.f32 1e-05, %v2736_v14  ;;  %v4414_v14 = vld [vmem:[%s8681_s20 + $0x300] sm:$0xff] }
 0xbe6   :  { %5772 = vrsqrt.f32 %v2738_v15  ;;  %v4416_v15 = vld [vmem:[%s8681_s20 + $0x310] sm:$0xff] }
 0xbf0   :  { %v5773_v27 = vpop.eup %5772 }
 0xbf1   :  { %v2740_v29 = vmul.f32 %v5773_v27, %v2737_v16  ;;  %v4419_v16 = vld [vmem:[%s8681_s20 + $0x328] sm:$0xff]  ;;  %v4421_v27 = vld [vmem:[%s8681_s20 + $0x338] sm:$0xff] }
 0xbf3   :  { %4377 = vmatmul.mubr.msk.f32.vlgmr.msra.gmra.mrb[24].mxu0 %vm887_vm3, %v2740_v29  ;;  %v2742_v33 = vmul.f32 %v2740_v29, %v2732_v51  ;;  %v5335_v51 = vpack.c.bf16 %v4413_v8, %v4411_v42  ;;  %v5341_v29 = vpack.c.bf16 %v4416_v15, %v4414_v14  ;;  %v3007_v15 = vld [vmem:[%s8681_s20 + $0x8] sm:$0xff] }
 0xbf4   :  { %5294 = vmatpush1.bf16.msra.mxu0 %v5277_v0  ;;  %2901 = vmatprep.mubr.f32.mxu0 %v6070_v1  ;;  %v4396_v0 = vld [vmem:[%s8681_s20 + $0x270] sm:$0xff] }
 0xbf5   :  { %5296 = vmatprep.subr.bf16.mxu0 %v5279_v28  ;;  %v2743_v43 = vsub.f32 %v2741_v36, %v2742_v33  ;;  %v5321_v28 = vpack.c.bf16 %v4396_v0, %v4394_v63  ;;  %v5343_v33 = vpack.c.bf16 %v4421_v27, %v4419_v16  ;;  %v4418_v36 = vld [vmem:[%s8681_s20 + $0x320] sm:$0xff]  ;;  %v5359_v63 = vpack.c.bf16 %v4437_v60, %v4435_v11  ;;  %v3009_v16 = vld [vmem:[%s8681_s20 + $0x18] sm:$0xff] }
 0xbf6   :  { %v4434_v0 = vld [vmem:[%s8681_s20 + $0x3a0] sm:$0xff]  ;;  %v5371_v27 = vpack.c.bf16 %v3009_v16, %v3007_v15  ;;  %v5383_v60 = vpack.c.bf16 %v3021_v9, %v3019_v24  ;;  %v3056_v24 = vld [vmem:[%s8681_s20 + $0x190] sm:$0xff]  ;;  %v3059_v9 = vld [vmem:[%s8681_s20 + $0x1a8] sm:$0xff] }
 0xbf7   :  { %5322 = vmatpush1.bf16.msra.mxu1 %v5321_v28  ;;  %v4441_v28 = vld [vmem:[%s8681_s20 + $0x3d8] sm:$0xff]  ;;  %v3042_v16 = vld [vmem:[%s8681_s20 + $0x120] sm:$0xff] }
 0xbf8   :  { %5298 = vmatpush1.bf16.msra.mxu0 %v5281_v34  ;;  %v4400_v34 = vld [vmem:[%s8681_s20 + $0x290] sm:$0xff]  ;;  %5324 = vmatprep.subr.bf16.mxu1 %v5323_v31  ;;  %v5361_v31 = vpack.c.bf16 %v4436_v10, %v4434_v0  ;;  %v3023_v0 = vld [vmem:[%s8681_s20 + $0x88] sm:$0xff]  ;;  %v3025_v10 = vld [vmem:[%s8681_s20 + $0x98] sm:$0xff] }
 0xbf9   :  { %5300 = vmatprep.subr.bf16.mxu0 %v5283_v50  ;;  %v5325_v48 = vpack.c.bf16 %v4400_v34, %v4398_v32  ;;  %v5327_v50 = vpack.c.bf16 %v4405_v44, %v4403_v35  ;;  %v5363_v32 = vpack.c.bf16 %v4441_v28, %v4439_v22  ;;  %v4438_v34 = vld [vmem:[%s8681_s20 + $0x3c0] sm:$0xff]  ;;  %v4440_v35 = vld [vmem:[%s8681_s20 + $0x3d0] sm:$0xff]  ;;  %v5387_v28 = vpack.c.bf16 %v3025_v10, %v3023_v0  ;;  %v3063_v10 = vld [vmem:[%s8681_s20 + $0x1c8] sm:$0xff] }
 0xbfa   :  { %v5365_v44 = vpack.c.bf16 %v4440_v35, %v4438_v34  ;;  %v3027_v34 = vld [vmem:[%s8681_s20 + $0xa8] sm:$0xff]  ;;  %v3029_v35 = vld [vmem:[%s8681_s20 + $0xb8] sm:$0xff]  ;;  %v3060_v0 = vld [vmem:[%s8681_s20 + $0x1b0] sm:$0xff] }
 0xbfb   :  { %5326 = vmatpush1.bf16.msra.mxu1 %v5325_v48 }
 0xbfc   :  { %5302 = vmatpush1.bf16.msra.mxu0 %v5285_v3  ;;  %v4409_v3 = vld [vmem:[%s8681_s20 + $0x2d8] sm:$0xff]  ;;  %5328 = vmatprep.subr.bf16.mxu1 %v5327_v50 }
 0xbfd   :  { %5304 = vmatprep.subr.bf16.mxu0 %v5287_v38  ;;  %v5329_v38 = vpack.c.bf16 %v4404_v2, %v4402_v55  ;;  %v5331_v37 = vpack.c.bf16 %v4409_v3, %v4407_v26 }
 0xbff   :  { %5330 = vmatpush1.bf16.msra.mxu1 %v5329_v38 }
 0xc00   :  { %5306 = vmatpush1.bf16.msra.mxu0 %v5289_v30  ;;  %v4408_v30 = vld [vmem:[%s8681_s20 + $0x2d0] sm:$0xff]  ;;  %5332 = vmatprep.subr.bf16.mxu1 %v5331_v37 }
 0xc01   :  { %v5333_v12 = vpack.c.bf16 %v4408_v30, %v4406_v6 }
 0xc03   :  { %4378 = vmatmul.mubr.msk.f32.vlgmr.msra.gmra.mrb[26].mxu0 %vm887_vm3, %v2743_v43  ;;  %5334 = vmatpush1.bf16.msra.mxu1 %v5333_v12  ;;  %v4420_v43 = vld [vmem:[%s8681_s20 + $0x330] sm:$0xff] }
 0xc04   :  { %2999 = vmatprep.mubr.f32.mxu0 %v6070_v1  ;;  %5336 = vmatprep.subr.bf16.mxu1 %v5335_v51  ;;  %v5345_v49 = vpack.c.bf16 %v4420_v43, %v4418_v36  ;;  %v3006_v36 = vld [vmem:[%s8681_s20] sm:$0xff]  ;;  %v3008_v43 = vld [vmem:[%s8681_s20 + $0x10] sm:$0xff] }
 0xc07   :  { %5338 = vmatpush1.bf16.msra.mxu1 %v5337_v13  ;;  %v5367_v13 = vpack.c.bf16 %v4445_v7, %v4443_v4  ;;  %v3038_v7 = vld [vmem:[%s8681_s20 + $0x100] sm:$0xff] }
 0xc08   :  { %5340 = vmatprep.subr.bf16.mxu1 %v5339_v45  ;;  %v4442_v45 = vld [vmem:[%s8681_s20 + $0x3e0] sm:$0xff] }
 0xc0b   :  { %5342 = vmatpush1.bf16.msra.mxu1 %v5341_v29 }
 0xc0c   :  { %5344 = vmatprep.subr.bf16.mxu1 %v5343_v33 }
 0xc0f   :  { %5346 = vmatpush1.bf16.msra.mxu1 %v5345_v49 }
 0xc10   :  { %5348 = vmatprep.subr.bf16.mxu1 %v5347_v53  ;;  %v5373_v53 = vpack.c.bf16 %v3008_v43, %v3006_v36  ;;  %v3049_v36 = vld [vmem:[%s8681_s20 + $0x158] sm:$0xff] }
 0xc13   :  { %5350 = vmatpush1.bf16.msra.mxu1 %v5349_v59  ;;  %v3015_v59 = vld [vmem:[%s8681_s20 + $0x48] sm:$0xff] }
 0xc14   :  { %5352 = vmatprep.subr.bf16.mxu1 %v5351_v62  ;;  %v3017_v62 = vld [vmem:[%s8681_s20 + $0x58] sm:$0xff] }
 0xc15   :  { %v5379_v21 = vpack.c.bf16 %v3017_v62, %v3015_v59  ;;  %v3052_v59 = vld [vmem:[%s8681_s20 + $0x170] sm:$0xff]  ;;  %v3055_v62 = vld [vmem:[%s8681_s20 + $0x188] sm:$0xff] }
 0xc17   :  { %5354 = vmatpush1.bf16.msra.mxu1 %v5353_v61  ;;  %v3016_v61 = vld [vmem:[%s8681_s20 + $0x50] sm:$0xff] }
 0xc18   :  { %5356 = vmatprep.subr.bf16.mxu1 %v5355_v5  ;;  %v5381_v11 = vpack.c.bf16 %v3016_v61, %v3014_v56  ;;  %v3054_v61 = vld [vmem:[%s8681_s20 + $0x180] sm:$0xff] }
 0xc1b   :  { %5358 = vmatpush1.bf16.msra.mxu1 %v5357_v25  ;;  %v3018_v25 = vld [vmem:[%s8681_s20 + $0x60] sm:$0xff] }
 0xc1c   :  { %5360 = vmatprep.subr.bf16.mxu1 %v5359_v63  ;;  %v3020_v63 = vld [vmem:[%s8681_s20 + $0x70] sm:$0xff] }
 0xc1d   :  { %v5385_v22 = vpack.c.bf16 %v3020_v63, %v3018_v25  ;;  %v3058_v63 = vld [vmem:[%s8681_s20 + $0x1a0] sm:$0xff] }
 0xc1f   :  { %5362 = vmatpush1.bf16.msra.mxu1 %v5361_v31  ;;  %v3022_v31 = vld [vmem:[%s8681_s20 + $0x80] sm:$0xff] }
 0xc20   :  { %5364 = vmatprep.subr.bf16.mxu1 %v5363_v32  ;;  %v3024_v32 = vld [vmem:[%s8681_s20 + $0x90] sm:$0xff] }
 0xc23   :  { %5366 = vmatpush1.bf16.msra.mxu1 %v5365_v44  ;;  %v5389_v44 = vpack.c.bf16 %v3024_v32, %v3022_v31  ;;  %v3062_v32 = vld [vmem:[%s8681_s20 + $0x1c0] sm:$0xff] }
 0xc24   :  { %5368 = vmatprep.subr.bf16.mxu1 %v5367_v13  ;;  %v3040_v13 = vld [vmem:[%s8681_s20 + $0x110] sm:$0xff] }
 0xcc6   :  { %v2829_v48 = vpop.f32.mrb[24].mxu0 }
 0xcc7   :  { %v2911_v50 = vrot.slane %v2829_v48, %v6788_v40  ;;  %v2831_v55 = vpop.f32.mrb[25].mxu0  ;;  %v5391_v48 = vpack.c.bf16 %v3029_v35, %v3027_v34  ;;  %v3064_v34 = vld [vmem:[%s8681_s20 + $0x1d0] sm:$0xff]  ;;  %v3067_v35 = vld [vmem:[%s8681_s20 + $0x1e8] sm:$0xff] }
 0xcc8   :  { %v2915_v2 = vrot.slane %v2831_v55, %v6788_v40  ;;  %v3028_v55 = vld [vmem:[%s8681_s20 + $0xb0] sm:$0xff] }
 0xcc9   :  { %v2916_v26 = vmul.f32 %v2911_v50, %v7516_v41  ;;  %v4380_v41 = vld [vmem:[%s8680_s19 + $0x2] sm:$0x3] }
 0xcca   :  { %v2917_v3 = vmul.f32 %v2915_v2, %v7519_v52  ;;  %v4446_v52 = vld [vmem:[%s8680_s19 + $0x4] sm:$0x3]  ;;  %v3031_v2 = vld [vmem:[%s8681_s20 + $0xc8] sm:$0xff] }
 0xccb   :  { %v3026_v50 = vld [vmem:[%s8681_s20 + $0xa0] sm:$0xff] }
 0xcd6   :  { %v2903_v38 = vpop.f32.mrb[26].mxu0 }
 0xcd7   :  { %v2921_v37 = vrot.slane %v2903_v38, %v6788_v40  ;;  %v2905_v6 = vpop.f32.mrb[27].mxu0 }
 0xcd8   :  { %v2925_v30 = vrot.slane %v2905_v6, %v6788_v40  ;;  %v3032_v6 = vld [vmem:[%s8681_s20 + $0xd0] sm:$0xff] }
 0xcd9   :  { %v2926_v42 = vadd.f32 %v2921_v37, %v2916_v26  ;;  %v3033_v26 = vld [vmem:[%s8681_s20 + $0xd8] sm:$0xff]  ;;  %v3030_v37 = vld [vmem:[%s8681_s20 + $0xc0] sm:$0xff] }
 0xcda   :  { %v2927_v8 = vadd.f32 %v2925_v30, %v2917_v3  ;;  %v5393_v3 = vpack.c.bf16 %v3028_v55, %v3026_v50  ;;  %v5395_v38 = vpack.c.bf16 %v3033_v26, %v3031_v2  ;;  %v3035_v30 = vld [vmem:[%s8681_s20 + $0xe8] sm:$0xff]  ;;  %v3066_v55 = vld [vmem:[%s8681_s20 + $0x1e0] sm:$0xff]  ;;  %v3068_v2 = vld [vmem:[%s8681_s20 + $0x1f0] sm:$0xff] }
 0xcdb   :  { %v2928_v51 = vmax.f32 %v2926_v42, 0.0  ;;  %v3037_v42 = vld [vmem:[%s8681_s20 + $0xf8] sm:$0xff]  ;;  %v4449_v26 = vld [vmem:[%s8681_s20 + $0x408] sm:$0xff] }
 0xcdc   :  { %v2929_v12 = vmax.f32 %v2927_v8, 0.0  ;;  %v5397_v8 = vpack.c.bf16 %v3032_v6, %v3030_v37  ;;  %v4448_v6 = vld [vmem:[%s8681_s20 + $0x400] sm:$0xff] }
 0xcde   :  { %2935 = vmatprep.subr.mxu0 %v2929_v12 }
 0xcdf   :  { %2936 = vmatpush1.msra.mxu0 %v2928_v51 }
 0xce0   :  { %4379 = vmatmul.mubr.msk.f32.vlgmr.msra.gmra.mrb[28].mxu0 %vm2931_vm12, %v2930_v54  ;;  %3075 = vmatprep.subr.mxu0 %v2929_v12  ;;  %v3036_v54 = vld [vmem:[%s8681_s20 + $0xf0] sm:$0xff] }
 0xce1   :  { %3076 = vmatpush1.msra.mxu0 %v2928_v51  ;;  %3139 = vmatprep.mubr.f32.mxu0 %v6070_v1 }
 0xce2   :  { %3358 = vmatprep.subr.mxu0 %v2929_v12 }
 0xce4   :  { %4381 = vmatmul.mubr.msk.f32.vlgmr.msra.gmra.mrb[30].mxu0 %vm2931_vm12, %v4380_v41  ;;  %v3039_v41 = vld [vmem:[%s8681_s20 + $0x108] sm:$0xff] }
 0xce5   :  { %3359 = vmatpush1.msra.mxu0 %v2928_v51  ;;  %3422 = vmatprep.mubr.f32.mxu0 %v6070_v1 }
 0xce6   :  { %3572 = vmatprep.subr.mxu0 %v2929_v12  ;;  %v5399_v12 = vpack.c.bf16 %v3037_v42, %v3035_v30  ;;  %v4450_v30 = vld [vmem:[%s8681_s20 + $0x410] sm:$0xff] }
 0xce8   :  { %4447 = vmatmul.mubr.msk.f32.vlgmr.msra.gmra.mrb[32].mxu0 %vm2931_vm12, %v4446_v52  ;;  %v3041_v52 = vld [vmem:[%s8681_s20 + $0x118] sm:$0xff] }
 0xce9   :  { %3573 = vmatpush1.msra.mxu0 %v2928_v51  ;;  %3636 = vmatprep.mubr.f32.mxu0 %v6070_v1  ;;  %v4444_v1 = vld [vmem:[%s8681_s20 + $0x3f0] sm:$0xff]  ;;  %v3034_v51 = vld [vmem:[%s8681_s20 + $0xe0] sm:$0xff]  ;;  %v5403_v4 = vpack.c.bf16 %v3041_v52, %v3039_v41 }
 0xcea   :  { %v5369_v14 = vpack.c.bf16 %v4444_v1, %v4442_v45  ;;  %v3043_v45 = vld [vmem:[%s8681_s20 + $0x128] sm:$0xff]  ;;  %v3045_v1 = vld [vmem:[%s8681_s20 + $0x138] sm:$0xff]  ;;  %v4452_v52 = vld [vmem:[%s8681_s20 + $0x420] sm:$0xff] }
 0xceb   :  { %v5407_v15 = vpack.c.bf16 %v3045_v1, %v3043_v45  ;;  %v4458_v45 = vld [vmem:[%s8681_s20 + $0x450] sm:$0xff]  ;;  %v3798_v1 = vld [vmem:[#allocation18 + $0x8] sm:$0xff] }
 0xcec   :  { %4513 = vmatmul.mubr.msk.f32.vlgmr.msra.gmra.mrb[34].mxu0 %vm2931_vm12, %v4512_v57  ;;  %5370 = vmatpush1.bf16.msra.mxu1 %v5369_v14  ;;  %v5401_v57 = vpack.c.bf16 %v3036_v54, %v3034_v51  ;;  %v5405_v14 = vpack.c.bf16 %v3040_v13, %v3038_v7  ;;  %v5437_v51 = vpack.c.bf16 %v4450_v30, %v4448_v6  ;;  %v4459_v7 = vld [vmem:[%s8681_s20 + $0x458] sm:$0xff]  ;;  %v4456_v13 = vld [vmem:[%s8681_s20 + $0x440] sm:$0xff]  ;;  %v4470_v30 = vld [vmem:[%s8681_s20 + $0x4b0] sm:$0xff] }
 0xced   :  { %5372 = vmatprep.subr.bf16.mxu1 %v5371_v27  ;;  %v3044_v27 = vld [vmem:[%s8681_s20 + $0x130] sm:$0xff] }
 0xcee   :  { %v5409_v43 = vpack.c.bf16 %v3044_v27, %v3042_v16 }
 0xdb3   :  { %v7765_v29 = vpop.f32.mrb[28].mxu0 }
 0xdb4   :  { %v3003_v33 = vpop.f32.mrb[29].mxu0 }
 0xdb7   :  { %v3141_v49 = vpop.f32.mrb[30].mxu0 }
 0xdb8   :  { %v3143_v58 = vpop.f32.mrb[31].mxu0 }
 0xdb9   :  { %3275 = vmatprep.mubr.f32.mxu1 %v3143_v58  ;;  %v3053_v58 = vld [vmem:[%s8681_s20 + $0x178] sm:$0xff] }
 0xdba   :  { %3276 = vmatmul.mubr.f32.vlgmr.msra.gmra.mrb[38].mxu1 %v3141_v49  ;;  %v3048_v49 = vld [vmem:[%s8681_s20 + $0x150] sm:$0xff] }
 0xdbb   :  { %5374 = vmatpush1.bf16.msra.mxu1 %v5373_v53  ;;  %3346 = vmatprep.mubr.f32.mxu1 %v3003_v33  ;;  %v7791_v20 = vpop.f32.mrb[32].mxu0  ;;  %v3047_v33 = vld [vmem:[%s8681_s20 + $0x148] sm:$0xff] }
 0xdbc   :  { %5376 = vmatprep.subr.bf16.mxu1 %v5375_v17  ;;  %v7799_v5 = vpop.f32.mrb[33].mxu0  ;;  %v5411_v47 = vpack.c.bf16 %v3049_v36, %v3047_v33  ;;  %v3051_v53 = vld [vmem:[%s8681_s20 + $0x168] sm:$0xff]  ;;  %v5413_v17 = vpack.c.bf16 %v3048_v49, %v3046_v46  ;;  %v3802_v36 = vld [vmem:[#allocation18 + $0x28] sm:$0xff]  ;;  %v3801_v49 = vld [vmem:[#allocation18 + $0x20] sm:$0xff] }
 0xdbd   :  { %v5415_v18 = vpack.c.bf16 %v3053_v58, %v3051_v53  ;;  %v3799_v33 = vld [vmem:[#allocation18 + $0x10] sm:$0xff]  ;;  %v3806_v58 = vld [vmem:[#allocation18 + $0x48] sm:$0xff] }
 0xdbe   :  { %v3803_v53 = vld [vmem:[#allocation18 + $0x30] sm:$0xff] }
 0xdbf   :  { %5378 = vmatpush1.bf16.msra.mxu1 %v5377_v23  ;;  %v3057_v23 = vld [vmem:[%s8681_s20 + $0x198] sm:$0xff]  ;;  %v7969_v42 = vpop.f32.mrb[34].mxu0 }
 0xdc0   :  { %5380 = vmatprep.subr.bf16.mxu1 %v5379_v21  ;;  %v5417_v21 = vpack.c.bf16 %v3052_v59, %v3050_v19  ;;  %v5419_v56 = vpack.c.bf16 %v3057_v23, %v3055_v62  ;;  %v7977_v54 = vpop.f32.mrb[35].mxu0  ;;  %v5569_v19 = vpack.c.bf16 %v3803_v53, %v3801_v49  ;;  %v5445_v59 = vpack.c.bf16 %v4458_v45, %v4456_v13  ;;  %v4460_v62 = vld [vmem:[%s8681_s20 + $0x460] sm:$0xff]  ;;  %v3817_v13 = vld [vmem:[#allocation18 + $0xa0] sm:$0xff] }
 0xdc1   :  { %v3819_v45 = vld [vmem:[#allocation18 + $0xb0] sm:$0xff] }
 0xdc2   :  { %v3823_v49 = vld [vmem:[#allocation18 + $0xd0] sm:$0xff] }
 0xdc3   :  { %5382 = vmatpush1.bf16.msra.mxu1 %v5381_v11  ;;  %v3061_v11 = vld [vmem:[%s8681_s20 + $0x1b8] sm:$0xff] }
 0xdc4   :  { %5384 = vmatprep.subr.bf16.mxu1 %v5383_v60  ;;  %v5421_v60 = vpack.c.bf16 %v3056_v24, %v3054_v61  ;;  %v5423_v25 = vpack.c.bf16 %v3061_v11, %v3059_v9  ;;  %v4462_v24 = vld [vmem:[%s8681_s20 + $0x470] sm:$0xff]  ;;  %v3810_v9 = vld [vmem:[#allocation18 + $0x68] sm:$0xff] }
 0xdc5   :  { %v3812_v11 = vld [vmem:[#allocation18 + $0x78] sm:$0xff] }
 0xdc7   :  { %5386 = vmatpush1.bf16.msra.mxu1 %v5385_v22  ;;  %v3065_v22 = vld [vmem:[%s8681_s20 + $0x1d8] sm:$0xff] }
 0xdc8   :  { %5388 = vmatprep.subr.bf16.mxu1 %v5387_v28  ;;  %v5425_v28 = vpack.c.bf16 %v3060_v0, %v3058_v63  ;;  %v5427_v31 = vpack.c.bf16 %v3065_v22, %v3063_v10  ;;  %v5449_v0 = vpack.c.bf16 %v4462_v24, %v4460_v62  ;;  %v4464_v10 = vld [vmem:[%s8681_s20 + $0x480] sm:$0xff]  ;;  %v5575_v22 = vpack.c.bf16 %v3812_v11, %v3810_v9  ;;  %v4482_v9 = vld [vmem:[%s8681_s20 + $0x510] sm:$0xff] }
 0xdc9   :  { %v3830_v11 = vld [vmem:[#allocation18 + $0x108] sm:$0xff] }
 0xdcb   :  { %5390 = vmatpush1.bf16.msra.mxu1 %v5389_v44  ;;  %v3069_v44 = vld [vmem:[%s8681_s20 + $0x1f8] sm:$0xff] }
 0xdcc   :  { %5392 = vmatprep.subr.bf16.mxu1 %v5391_v48  ;;  %v5429_v48 = vpack.c.bf16 %v3064_v34, %v3062_v32  ;;  %v5431_v50 = vpack.c.bf16 %v3069_v44, %v3067_v35  ;;  %v4466_v34 = vld [vmem:[%s8681_s20 + $0x490] sm:$0xff]  ;;  %v3814_v35 = vld [vmem:[#allocation18 + $0x88] sm:$0xff] }
 0xdcd   :  { %v3816_v44 = vld [vmem:[#allocation18 + $0x98] sm:$0xff] }
 0xdcf   :  { %5394 = vmatpush1.bf16.msra.mxu1 %v5393_v3  ;;  %v4451_v3 = vld [vmem:[%s8681_s20 + $0x418] sm:$0xff] }
 0xdd0   :  { %5396 = vmatprep.subr.bf16.mxu1 %v5395_v38  ;;  %v5433_v38 = vpack.c.bf16 %v3068_v2, %v3066_v55  ;;  %v5435_v37 = vpack.c.bf16 %v4451_v3, %v4449_v26  ;;  %v5453_v2 = vpack.c.bf16 %v4466_v34, %v4464_v10  ;;  %v4468_v26 = vld [vmem:[%s8681_s20 + $0x4a0] sm:$0xff]  ;;  %v5579_v3 = vpack.c.bf16 %v3816_v44, %v3814_v35  ;;  %v4486_v35 = vld [vmem:[%s8681_s20 + $0x530] sm:$0xff] }
 0xdd1   :  { %v3834_v44 = vld [vmem:[#allocation18 + $0x128] sm:$0xff] }
 0xdd3   :  { %5398 = vmatpush1.bf16.msra.mxu1 %v5397_v8  ;;  %v4453_v8 = vld [vmem:[%s8681_s20 + $0x428] sm:$0xff] }
 0xdd4   :  { %5400 = vmatprep.subr.bf16.mxu1 %v5399_v12  ;;  %v4455_v12 = vld [vmem:[%s8681_s20 + $0x438] sm:$0xff] }
 0xdd5   :  { %v5439_v41 = vpack.c.bf16 %v4455_v12, %v4453_v8  ;;  %v3818_v8 = vld [vmem:[#allocation18 + $0xa8] sm:$0xff]  ;;  %v3820_v12 = vld [vmem:[#allocation18 + $0xb8] sm:$0xff] }
 0xdd7   :  { %5402 = vmatpush1.bf16.msra.mxu1 %v5401_v57  ;;  %v4454_v57 = vld [vmem:[%s8681_s20 + $0x430] sm:$0xff] }
 0xdd8   :  { %5404 = vmatprep.subr.bf16.mxu1 %v5403_v4  ;;  %v4457_v4 = vld [vmem:[%s8681_s20 + $0x448] sm:$0xff]  ;;  %v5441_v16 = vpack.c.bf16 %v4454_v57, %v4452_v52  ;;  %v5457_v57 = vpack.c.bf16 %v4470_v30, %v4468_v26 }
 0xddb   :  { %5406 = vmatpush1.bf16.msra.mxu1 %v5405_v14  ;;  %v3800_v14 = vld [vmem:[#allocation18 + $0x18] sm:$0xff] }
 0xddc   :  { %5408 = vmatprep.subr.bf16.mxu1 %v5407_v15  ;;  %v3797_v15 = vld [vmem:[#allocation18] sm:$0xff]  ;;  %v5563_v27 = vpack.c.bf16 %v3800_v14, %v3798_v1 }
 0xddd   :  { %v4474_v14 = vld [vmem:[%s8681_s20 + $0x4d0] sm:$0xff] }
 0xdde   :  { %5564 = vmatprep.subr.bf16.mxu0 %v5563_v27  ;;  %v4477_v27 = vld [vmem:[%s8681_s20 + $0x4e8] sm:$0xff] }
 0xddf   :  { %5410 = vmatpush1.bf16.msra.mxu1 %v5409_v43  ;;  %v3804_v43 = vld [vmem:[#allocation18 + $0x38] sm:$0xff] }
 0xde0   :  { %5412 = vmatprep.subr.bf16.mxu1 %v5411_v47  ;;  %v5565_v47 = vpack.c.bf16 %v3799_v33, %v3797_v15  ;;  %v5567_v46 = vpack.c.bf16 %v3804_v43, %v3802_v36  ;;  %v3822_v15 = vld [vmem:[#allocation18 + $0xc8] sm:$0xff]  ;;  %v5585_v36 = vpack.c.bf16 %v3819_v45, %v3817_v13  ;;  %v3837_v45 = vld [vmem:[#allocation18 + $0x140] sm:$0xff] }
 0xde1   :  { %v4479_v33 = vld [vmem:[%s8681_s20 + $0x4f8] sm:$0xff] }
 0xde2   :  { %5566 = vmatpush1.bf16.msra.mxu0 %v5565_v47  ;;  %v5463_v53 = vpack.c.bf16 %v4479_v33, %v4477_v27  ;;  %v3844_v27 = vld [vmem:[#allocation18 + $0x178] sm:$0xff] }
 0xde3   :  { %5414 = vmatpush1.bf16.msra.mxu1 %v5413_v17  ;;  %v4461_v17 = vld [vmem:[%s8681_s20 + $0x468] sm:$0xff]  ;;  %5568 = vmatprep.subr.bf16.mxu0 %v5567_v46  ;;  %v3821_v46 = vld [vmem:[#allocation18 + $0xc0] sm:$0xff] }
 0xde4   :  { %5416 = vmatprep.subr.bf16.mxu1 %v5415_v18  ;;  %v4463_v18 = vld [vmem:[%s8681_s20 + $0x478] sm:$0xff]  ;;  %v4497_v33 = vld [vmem:[%s8681_s20 + $0x588] sm:$0xff] }
 0xde5   :  { %v5447_v61 = vpack.c.bf16 %v4463_v18, %v4461_v17  ;;  %v3826_v17 = vld [vmem:[#allocation18 + $0xe8] sm:$0xff]  ;;  %v3828_v18 = vld [vmem:[#allocation18 + $0xf8] sm:$0xff] }
 0xde6   :  { %5570 = vmatpush1.bf16.msra.mxu0 %v5569_v19  ;;  %v4483_v19 = vld [vmem:[%s8681_s20 + $0x518] sm:$0xff] }
 0xde7   :  { %5418 = vmatpush1.bf16.msra.mxu1 %v5417_v21  ;;  %v3805_v21 = vld [vmem:[#allocation18 + $0x40] sm:$0xff] }
 0xde8   :  { %5420 = vmatprep.subr.bf16.mxu1 %v5419_v56  ;;  %v3807_v56 = vld [vmem:[#allocation18 + $0x50] sm:$0xff] }
 0xde9   :  { %v5573_v63 = vpack.c.bf16 %v3807_v56, %v3805_v21  ;;  %v5591_v21 = vpack.c.bf16 %v3828_v18, %v3826_v17  ;;  %v3825_v56 = vld [vmem:[#allocation18 + $0xe0] sm:$0xff]  ;;  %v3846_v18 = vld [vmem:[#allocation18 + $0x188] sm:$0xff] }
 0xdea   :  { %v4498_v17 = vld [vmem:[%s8681_s20 + $0x590] sm:$0xff] }
 0xdeb   :  { %5422 = vmatpush1.bf16.msra.mxu1 %v5421_v60  ;;  %v4465_v60 = vld [vmem:[%s8681_s20 + $0x488] sm:$0xff] }
 0xdec   :  { %5424 = vmatprep.subr.bf16.mxu1 %v5423_v25  ;;  %v4467_v25 = vld [vmem:[%s8681_s20 + $0x498] sm:$0xff] }
 0xded   :  { %v5451_v32 = vpack.c.bf16 %v4467_v25, %v4465_v60  ;;  %v3832_v60 = vld [vmem:[#allocation18 + $0x118] sm:$0xff] }
 0xdee   :  { %v4485_v25 = vld [vmem:[%s8681_s20 + $0x528] sm:$0xff] }
 0xdef   :  { %5426 = vmatpush1.bf16.msra.mxu1 %v5425_v28  ;;  %v3809_v28 = vld [vmem:[#allocation18 + $0x60] sm:$0xff] }
 0xdf0   :  { %5428 = vmatprep.subr.bf16.mxu1 %v5427_v31  ;;  %v3811_v31 = vld [vmem:[#allocation18 + $0x70] sm:$0xff] }
 0xdf1   :  { %v5577_v55 = vpack.c.bf16 %v3811_v31, %v3809_v28  ;;  %v5595_v28 = vpack.c.bf16 %v3832_v60, %v3830_v11  ;;  %v3829_v31 = vld [vmem:[#allocation18 + $0x100] sm:$0xff]  ;;  %v3850_v60 = vld [vmem:[#allocation18 + $0x1a8] sm:$0xff] }
 0xdf2   :  { %v4502_v11 = vld [vmem:[%s8681_s20 + $0x5b0] sm:$0xff] }
 0xdf3   :  { %5430 = vmatpush1.bf16.msra.mxu1 %v5429_v48  ;;  %v4469_v48 = vld [vmem:[%s8681_s20 + $0x4a8] sm:$0xff] }
 0xdf4   :  { %5432 = vmatprep.subr.bf16.mxu1 %v5431_v50  ;;  %v4471_v50 = vld [vmem:[%s8681_s20 + $0x4b8] sm:$0xff] }
 0xdf5   :  { %v5455_v6 = vpack.c.bf16 %v4471_v50, %v4469_v48  ;;  %v3836_v48 = vld [vmem:[#allocation18 + $0x138] sm:$0xff] }
 0xdf6   :  { %v4489_v50 = vld [vmem:[%s8681_s20 + $0x548] sm:$0xff] }
 0xdf7   :  { %5434 = vmatpush1.bf16.msra.mxu1 %v5433_v38  ;;  %v3813_v38 = vld [vmem:[#allocation18 + $0x80] sm:$0xff] }
 0xdf8   :  { %5436 = vmatprep.subr.bf16.mxu1 %v5435_v37  ;;  %v3815_v37 = vld [vmem:[#allocation18 + $0x90] sm:$0xff] }
 0xdf9   :  { %v5581_v52 = vpack.c.bf16 %v3815_v37, %v3813_v38  ;;  %v5599_v38 = vpack.c.bf16 %v3836_v48, %v3834_v44  ;;  %v3833_v37 = vld [vmem:[#allocation18 + $0x120] sm:$0xff]  ;;  %v3854_v48 = vld [vmem:[#allocation18 + $0x1c8] sm:$0xff] }
 0xdfa   :  { %3347 = vmatmul.mubr.f32.vlgmr.msra.gmra.mrb[38].mxu1 %v7765_v29  ;;  %v5443_v29 = vpack.c.bf16 %v4459_v7, %v4457_v4  ;;  %v4472_v4 = vld [vmem:[%s8681_s20 + $0x4c0] sm:$0xff]  ;;  %v5583_v7 = vpack.c.bf16 %v3820_v12, %v3818_v8  ;;  %v4490_v8 = vld [vmem:[%s8681_s20 + $0x550] sm:$0xff] }
 0xdfb   :  { %5438 = vmatpush1.bf16.msra.mxu1 %v5437_v51  ;;  %3558 = vmatprep.mubr.f32.mxu1 %v7799_v5  ;;  %v3808_v5 = vld [vmem:[#allocation18 + $0x58] sm:$0xff]  ;;  %v5461_v43 = vpack.c.bf16 %v4474_v14, %v4472_v4  ;;  %v3838_v12 = vld [vmem:[#allocation18 + $0x148] sm:$0xff] }
 0xdfc   :  { %5440 = vmatprep.subr.bf16.mxu1 %v5439_v41  ;;  %v5571_v23 = vpack.c.bf16 %v3808_v5, %v3806_v58  ;;  %v4473_v51 = vld [vmem:[%s8681_s20 + $0x4c8] sm:$0xff]  ;;  %v4475_v41 = vld [vmem:[%s8681_s20 + $0x4d8] sm:$0xff]  ;;  %v4478_v58 = vld [vmem:[%s8681_s20 + $0x4f0] sm:$0xff] }
 0xdfd   :  { %v5459_v1 = vpack.c.bf16 %v4475_v41, %v4473_v51  ;;  %v4481_v5 = vld [vmem:[%s8681_s20 + $0x508] sm:$0xff]  ;;  %v4506_v44 = vld [vmem:[%s8681_s20 + $0x5d0] sm:$0xff] }
 0xdfe   :  { %5572 = vmatprep.subr.bf16.mxu0 %v5571_v23  ;;  %v4480_v23 = vld [vmem:[%s8681_s20 + $0x500] sm:$0xff]  ;;  %v5467_v24 = vpack.c.bf16 %v4483_v19, %v4481_v5  ;;  %v3840_v51 = vld [vmem:[#allocation18 + $0x158] sm:$0xff] }
 0xdff   :  { %5442 = vmatpush1.bf16.msra.mxu1 %v5441_v16  ;;  %5574 = vmatpush1.bf16.msra.mxu0 %v5573_v63  ;;  %v3824_v16 = vld [vmem:[#allocation18 + $0xd8] sm:$0xff]  ;;  %v4487_v63 = vld [vmem:[%s8681_s20 + $0x538] sm:$0xff]  ;;  %v5469_v10 = vpack.c.bf16 %v4482_v9, %v4480_v23  ;;  %v5603_v13 = vpack.c.bf16 %v3840_v51, %v3838_v12 }
 0xe00   :  { %5444 = vmatprep.subr.bf16.mxu1 %v5443_v29  ;;  %5576 = vmatprep.subr.bf16.mxu0 %v5575_v22  ;;  %v4476_v29 = vld [vmem:[%s8681_s20 + $0x4e0] sm:$0xff]  ;;  %v5587_v47 = vpack.c.bf16 %v3824_v16, %v3822_v15  ;;  %v5471_v34 = vpack.c.bf16 %v4487_v63, %v4485_v25  ;;  %v4493_v41 = vld [vmem:[%s8681_s20 + $0x568] sm:$0xff]  ;;  %v4494_v15 = vld [vmem:[%s8681_s20 + $0x570] sm:$0xff] }
 0xe01   :  { %v5465_v62 = vpack.c.bf16 %v4478_v58, %v4476_v29  ;;  %v4484_v22 = vld [vmem:[%s8681_s20 + $0x520] sm:$0xff]  ;;  %v3848_v5 = vld [vmem:[#allocation18 + $0x198] sm:$0xff]  ;;  %v4517_v12 = vld [vmem:[%s8681_s20 + $0x618] sm:$0xff] }
 0xe02   :  { %v5473_v26 = vpack.c.bf16 %v4486_v35, %v4484_v22  ;;  %v3842_v16 = vld [vmem:[#allocation18 + $0x168] sm:$0xff]  ;;  %v4501_v19 = vld [vmem:[%s8681_s20 + $0x5a8] sm:$0xff] }
 0xe03   :  { %5446 = vmatpush1.bf16.msra.mxu1 %v5445_v59  ;;  %5578 = vmatpush1.bf16.msra.mxu0 %v5577_v55  ;;  %v5589_v59 = vpack.c.bf16 %v3823_v49, %v3821_v46  ;;  %v4491_v55 = vld [vmem:[%s8681_s20 + $0x558] sm:$0xff]  ;;  %v5607_v46 = vpack.c.bf16 %v3844_v27, %v3842_v16  ;;  %v3852_v25 = vld [vmem:[#allocation18 + $0x1b8] sm:$0xff] }
 0xe04   :  { %5448 = vmatprep.subr.bf16.mxu1 %v5447_v61  ;;  %5580 = vmatprep.subr.bf16.mxu0 %v5579_v3  ;;  %v3827_v61 = vld [vmem:[#allocation18 + $0xf0] sm:$0xff]  ;;  %v5475_v30 = vpack.c.bf16 %v4491_v55, %v4489_v50  ;;  %v3841_v49 = vld [vmem:[#allocation18 + $0x160] sm:$0xff]  ;;  %v3856_v50 = vld [vmem:[#allocation18 + $0x1d8] sm:$0xff] }
 0xe05   :  { %v4488_v3 = vld [vmem:[%s8681_s20 + $0x540] sm:$0xff]  ;;  %v4505_v63 = vld [vmem:[%s8681_s20 + $0x5c8] sm:$0xff]  ;;  %v4525_v16 = vld [vmem:[%s8681_s20 + $0x658] sm:$0xff] }
 0xe06   :  { %v5477_v4 = vpack.c.bf16 %v4490_v8, %v4488_v3  ;;  %v4509_v55 = vld [vmem:[%s8681_s20 + $0x5e8] sm:$0xff] }
 0xe07   :  { %5450 = vmatpush1.bf16.msra.mxu1 %v5449_v0  ;;  %5582 = vmatpush1.bf16.msra.mxu0 %v5581_v52  ;;  %v5593_v0 = vpack.c.bf16 %v3827_v61, %v3825_v56  ;;  %v4495_v52 = vld [vmem:[%s8681_s20 + $0x578] sm:$0xff]  ;;  %v5611_v56 = vpack.c.bf16 %v3848_v5, %v3846_v18  ;;  %v4515_v8 = vld [vmem:[%s8681_s20 + $0x608] sm:$0xff]  ;;  %v4530_v5 = vld [vmem:[%s8681_s20 + $0x680] sm:$0xff] }
 0xe08   :  { %5452 = vmatprep.subr.bf16.mxu1 %v5451_v32  ;;  %5584 = vmatprep.subr.bf16.mxu0 %v5583_v7  ;;  %v3831_v32 = vld [vmem:[#allocation18 + $0x110] sm:$0xff]  ;;  %v5479_v14 = vpack.c.bf16 %v4495_v52, %v4493_v41  ;;  %v3845_v61 = vld [vmem:[#allocation18 + $0x180] sm:$0xff]  ;;  %v5499_v41 = vpack.c.bf16 %v4517_v12, %v4515_v8 }
 0xe09   :  { %v4492_v7 = vld [vmem:[%s8681_s20 + $0x560] sm:$0xff]  ;;  %v4557_v8 = vld [vmem:[%s8681_s20 + $0x758] sm:$0xff] }
 0xe0a   :  { %v5481_v29 = vpack.c.bf16 %v4494_v15, %v4492_v7  ;;  %v4514_v52 = vld [vmem:[%s8681_s20 + $0x600] sm:$0xff]  ;;  %v4521_v7 = vld [vmem:[%s8681_s20 + $0x638] sm:$0xff]  ;;  %v4523_v15 = vld [vmem:[%s8681_s20 + $0x648] sm:$0xff] }
 0xe0b   :  { %5454 = vmatpush1.bf16.msra.mxu1 %v5453_v2  ;;  %5586 = vmatpush1.bf16.msra.mxu0 %v5585_v36  ;;  %v5597_v2 = vpack.c.bf16 %v3831_v32, %v3829_v31  ;;  %v4499_v36 = vld [vmem:[%s8681_s20 + $0x598] sm:$0xff]  ;;  %v5615_v31 = vpack.c.bf16 %v3852_v25, %v3850_v60  ;;  %v4538_v25 = vld [vmem:[%s8681_s20 + $0x6c0] sm:$0xff] }
 0xe0c   :  { %5456 = vmatprep.subr.bf16.mxu1 %v5455_v6  ;;  %5588 = vmatprep.subr.bf16.mxu0 %v5587_v47  ;;  %v3835_v6 = vld [vmem:[#allocation18 + $0x130] sm:$0xff]  ;;  %v5483_v58 = vpack.c.bf16 %v4499_v36, %v4497_v33  ;;  %v3849_v32 = vld [vmem:[#allocation18 + $0x1a0] sm:$0xff]  ;;  %v5507_v33 = vpack.c.bf16 %v4525_v16, %v4523_v15 }
 0xe0d   :  { %v4496_v47 = vld [vmem:[%s8681_s20 + $0x580] sm:$0xff]  ;;  %v4565_v15 = vld [vmem:[%s8681_s20 + $0x798] sm:$0xff] }
 0xe0e   :  { %v5485_v23 = vpack.c.bf16 %v4498_v17, %v4496_v47  ;;  %v4522_v36 = vld [vmem:[%s8681_s20 + $0x640] sm:$0xff] }
 0xe0f   :  { %5458 = vmatpush1.bf16.msra.mxu1 %v5457_v57  ;;  %5590 = vmatpush1.bf16.msra.mxu0 %v5589_v59  ;;  %v5601_v57 = vpack.c.bf16 %v3835_v6, %v3833_v37  ;;  %v4503_v59 = vld [vmem:[%s8681_s20 + $0x5b8] sm:$0xff]  ;;  %v4508_v6 = vld [vmem:[%s8681_s20 + $0x5e0] sm:$0xff] }
 0xe10   :  { %5460 = vmatprep.subr.bf16.mxu1 %v5459_v1  ;;  %5592 = vmatprep.subr.bf16.mxu0 %v5591_v21  ;;  %v3839_v1 = vld [vmem:[#allocation18 + $0x150] sm:$0xff]  ;;  %v5487_v9 = vpack.c.bf16 %v4503_v59, %v4501_v19  ;;  %v4532_v19 = vld [vmem:[%s8681_s20 + $0x690] sm:$0xff] }
 0xe11   :  { %v4500_v21 = vld [vmem:[%s8681_s20 + $0x5a0] sm:$0xff]  ;;  %v4535_v59 = vld [vmem:[%s8681_s20 + $0x6a8] sm:$0xff] }
 0xe12   :  { %v5489_v22 = vpack.c.bf16 %v4502_v11, %v4500_v21 }
 0xe13   :  { %5462 = vmatpush1.bf16.msra.mxu1 %v5461_v43  ;;  %5594 = vmatpush1.bf16.msra.mxu0 %v5593_v0  ;;  %v5605_v43 = vpack.c.bf16 %v3839_v1, %v3837_v45  ;;  %v4507_v0 = vld [vmem:[%s8681_s20 + $0x5d8] sm:$0xff]  ;;  %v4518_v1 = vld [vmem:[%s8681_s20 + $0x620] sm:$0xff] }
 0xe14   :  { %5464 = vmatprep.subr.bf16.mxu1 %v5463_v53  ;;  %5596 = vmatprep.subr.bf16.mxu0 %v5595_v28  ;;  %v3843_v53 = vld [vmem:[#allocation18 + $0x170] sm:$0xff]  ;;  %v5491_v35 = vpack.c.bf16 %v4507_v0, %v4505_v63  ;;  %v4540_v63 = vld [vmem:[%s8681_s20 + $0x6d0] sm:$0xff] }
 0xe15   :  { %v4504_v28 = vld [vmem:[%s8681_s20 + $0x5c0] sm:$0xff]  ;;  %v4543_v0 = vld [vmem:[%s8681_s20 + $0x6e8] sm:$0xff] }
 0xe16   :  { %v5493_v3 = vpack.c.bf16 %v4506_v44, %v4504_v28 }
 0xe17   :  { %5466 = vmatpush1.bf16.msra.mxu1 %v5465_v62  ;;  %5598 = vmatpush1.bf16.msra.mxu0 %v5597_v2  ;;  %v5609_v62 = vpack.c.bf16 %v3843_v53, %v3841_v49  ;;  %v4511_v2 = vld [vmem:[%s8681_s20 + $0x5f8] sm:$0xff]  ;;  %v4528_v49 = vld [vmem:[%s8681_s20 + $0x670] sm:$0xff]  ;;  %v4531_v53 = vld [vmem:[%s8681_s20 + $0x688] sm:$0xff] }
 0xe18   :  { %5468 = vmatprep.subr.bf16.mxu1 %v5467_v24  ;;  %5600 = vmatprep.subr.bf16.mxu0 %v5599_v38  ;;  %v3847_v24 = vld [vmem:[#allocation18 + $0x190] sm:$0xff]  ;;  %v5619_v38 = vpack.c.bf16 %v3856_v50, %v3854_v48  ;;  %v5495_v37 = vpack.c.bf16 %v4511_v2, %v4509_v55  ;;  %v4548_v55 = vld [vmem:[%s8681_s20 + $0x710] sm:$0xff] }
 0xe19   :  { %v4546_v50 = vld [vmem:[%s8681_s20 + $0x700] sm:$0xff]  ;;  %v4551_v2 = vld [vmem:[%s8681_s20 + $0x728] sm:$0xff] }
 0xe1b   :  { %5470 = vmatpush1.bf16.msra.mxu1 %v5469_v10  ;;  %5602 = vmatpush1.bf16.msra.mxu0 %v5601_v57  ;;  %v5613_v10 = vpack.c.bf16 %v3847_v24, %v3845_v61  ;;  %v4516_v57 = vld [vmem:[%s8681_s20 + $0x610] sm:$0xff]  ;;  %v4539_v24 = vld [vmem:[%s8681_s20 + $0x6c8] sm:$0xff] }
 0xe1c   :  { %5472 = vmatprep.subr.bf16.mxu1 %v5471_v34  ;;  %5604 = vmatprep.subr.bf16.mxu0 %v5603_v13  ;;  %v3851_v34 = vld [vmem:[#allocation18 + $0x1b0] sm:$0xff]  ;;  %v5501_v13 = vpack.c.bf16 %v4516_v57, %v4514_v52  ;;  %v4536_v61 = vld [vmem:[%s8681_s20 + $0x6b0] sm:$0xff] }
 0xe1d   :  { %v4556_v52 = vld [vmem:[%s8681_s20 + $0x750] sm:$0xff]  ;;  %v4559_v57 = vld [vmem:[%s8681_s20 + $0x768] sm:$0xff] }
 0xe1f   :  { %5474 = vmatpush1.bf16.msra.mxu1 %v5473_v26  ;;  %5606 = vmatpush1.bf16.msra.mxu0 %v5605_v43  ;;  %v5617_v26 = vpack.c.bf16 %v3851_v34, %v3849_v32  ;;  %v4524_v43 = vld [vmem:[%s8681_s20 + $0x650] sm:$0xff]  ;;  %v4547_v34 = vld [vmem:[%s8681_s20 + $0x708] sm:$0xff] }
 0xe20   :  { %5476 = vmatprep.subr.bf16.mxu1 %v5475_v30  ;;  %5608 = vmatprep.subr.bf16.mxu0 %v5607_v46  ;;  %v4510_v30 = vld [vmem:[%s8681_s20 + $0x5f0] sm:$0xff]  ;;  %v4526_v46 = vld [vmem:[%s8681_s20 + $0x660] sm:$0xff] }
 0xe21   :  { %v5497_v51 = vpack.c.bf16 %v4510_v30, %v4508_v6  ;;  %v5513_v17 = vpack.c.bf16 %v4528_v49, %v4526_v46  ;;  %v4544_v32 = vld [vmem:[%s8681_s20 + $0x6f0] sm:$0xff]  ;;  %v4555_v30 = vld [vmem:[%s8681_s20 + $0x748] sm:$0xff] }
 0xe22   :  { %v4552_v6 = vld [vmem:[%s8681_s20 + $0x730] sm:$0xff]  ;;  %v4571_v49 = vld [vmem:[%s8681_s20 + $0x7c8] sm:$0xff] }
 0xe23   :  { %5478 = vmatpush1.bf16.msra.mxu1 %v5477_v4  ;;  %5610 = vmatpush1.bf16.msra.mxu0 %v5609_v62  ;;  %v4519_v4 = vld [vmem:[%s8681_s20 + $0x628] sm:$0xff]  ;;  %v4537_v62 = vld [vmem:[%s8681_s20 + $0x6b8] sm:$0xff]  ;;  %v4568_v46 = vld [vmem:[%s8681_s20 + $0x7b0] sm:$0xff] }
 0xe24   :  { %5480 = vmatprep.subr.bf16.mxu1 %v5479_v14  ;;  %5612 = vmatprep.subr.bf16.mxu0 %v5611_v56  ;;  %v5503_v45 = vpack.c.bf16 %v4521_v7, %v4519_v4  ;;  %v4520_v14 = vld [vmem:[%s8681_s20 + $0x630] sm:$0xff]  ;;  %v5519_v21 = vpack.c.bf16 %v4537_v62, %v4535_v59  ;;  %v4534_v56 = vld [vmem:[%s8681_s20 + $0x6a0] sm:$0xff]  ;;  %v4561_v4 = vld [vmem:[%s8681_s20 + $0x778] sm:$0xff] }
 0xe25   :  { %v5505_v27 = vpack.c.bf16 %v4520_v14, %v4518_v1  ;;  %v5521_v11 = vpack.c.bf16 %v4536_v61, %v4534_v56  ;;  %v4560_v1 = vld [vmem:[%s8681_s20 + $0x770] sm:$0xff]  ;;  %v4563_v14 = vld [vmem:[%s8681_s20 + $0x788] sm:$0xff]  ;;  %v4577_v59 = vld [vmem:[%s8681_s20 + $0x7f8] sm:$0xff] }
 0xe26   :  { %v4576_v56 = vld [vmem:[%s8681_s20 + $0x7f0] sm:$0xff] }
 0xe27   :  { %5482 = vmatpush1.bf16.msra.mxu1 %v5481_v29  ;;  %5614 = vmatpush1.bf16.msra.mxu0 %v5613_v10  ;;  %v4527_v29 = vld [vmem:[%s8681_s20 + $0x668] sm:$0xff]  ;;  %v4545_v10 = vld [vmem:[%s8681_s20 + $0x6f8] sm:$0xff] }
 0xe28   :  { %5484 = vmatprep.subr.bf16.mxu1 %v5483_v58  ;;  %5616 = vmatprep.subr.bf16.mxu0 %v5615_v31  ;;  %v4533_v58 = vld [vmem:[%s8681_s20 + $0x698] sm:$0xff]  ;;  %v5527_v28 = vpack.c.bf16 %v4545_v10, %v4543_v0  ;;  %v4542_v31 = vld [vmem:[%s8681_s20 + $0x6e0] sm:$0xff] }
 0xe29   :  { %v5515_v18 = vpack.c.bf16 %v4533_v58, %v4531_v53  ;;  %v5529_v44 = vpack.c.bf16 %v4544_v32, %v4542_v31  ;;  %v4573_v53 = vld [vmem:[%s8681_s20 + $0x7d8] sm:$0xff]  ;;  %v3859_v10 = vld [vmem:[#allocation18 + $0x1f0] sm:$0xff]  ;;  %v3781_v32 = vld [vmem:[%s8723_s0] sm:$0x3] }
 0xe2a   :  { %v3857_v0 = vld [vmem:[#allocation18 + $0x1e0] sm:$0xff] }
 0xe2b   :  { %5486 = vmatpush1.bf16.msra.mxu1 %v5485_v23  ;;  %5618 = vmatpush1.bf16.msra.mxu0 %v5617_v26  ;;  %v5517_v23 = vpack.c.bf16 %v4532_v19, %v4530_v5  ;;  %v4553_v26 = vld [vmem:[%s8681_s20 + $0x738] sm:$0xff]  ;;  %v4572_v5 = vld [vmem:[%s8681_s20 + $0x7d0] sm:$0xff]  ;;  %v4575_v19 = vld [vmem:[%s8681_s20 + $0x7e8] sm:$0xff] }
 0xe2c   :  { %5488 = vmatprep.subr.bf16.mxu1 %v5487_v9  ;;  %5620 = vmatprep.subr.bf16.mxu0 %v5619_v38  ;;  %v4541_v9 = vld [vmem:[%s8681_s20 + $0x6d8] sm:$0xff]  ;;  %v5535_v38 = vpack.c.bf16 %v4553_v26, %v4551_v2  ;;  %v3946_v2 = vld [vmem:[%s8685_s24] sm:$0xff] }
 0xe2d   :  { %v5523_v60 = vpack.c.bf16 %v4541_v9, %v4539_v24  ;;  %v3853_v24 = vld [vmem:[#allocation18 + $0x1c0] sm:$0xff]  ;;  %v3855_v9 = vld [vmem:[#allocation18 + $0x1d0] sm:$0xff] }
 0xe2e   :  { %v3949_v26 = vld [vmem:[%s8685_s24 + $0x18] sm:$0xff] }
 0xe2f   :  { %5490 = vmatpush1.bf16.msra.mxu1 %v5489_v22  ;;  %v5525_v22 = vpack.c.bf16 %v4540_v63, %v4538_v25  ;;  %v3860_v25 = vld [vmem:[#allocation18 + $0x1f8] sm:$0xff] }
 0xe30   :  { %5492 = vmatprep.subr.bf16.mxu1 %v5491_v35  ;;  %v4549_v35 = vld [vmem:[%s8681_s20 + $0x718] sm:$0xff] }
 0xe31   :  { %v5531_v48 = vpack.c.bf16 %v4549_v35, %v4547_v34  ;;  %v8360_v34 = vsub.s32 1, %v6785_v39  ;;  %v3786_v35 = vrot.slane %v3781_v32, %v6788_v40 }
 0xe33   :  { %5494 = vmatpush1.bf16.msra.mxu1 %v5493_v3  ;;  %v5533_v3 = vpack.c.bf16 %v4548_v55, %v4546_v50 }
 0xe34   :  { %5496 = vmatprep.subr.bf16.mxu1 %v5495_v37  ;;  %v4550_v37 = vld [vmem:[%s8681_s20 + $0x720] sm:$0xff] }
 0xe35   :  { %v5537_v12 = vpack.c.bf16 %v4552_v6, %v4550_v37  ;;  %v3956_v37 = vld [vmem:[%s8685_s24 + $0x50] sm:$0xff] }
 0xe37   :  { %5498 = vmatpush1.bf16.msra.mxu1 %v5497_v51  ;;  %v5539_v51 = vpack.c.bf16 %v4557_v8, %v4555_v30  ;;  %v5629_v30 = vpack.c.bf16 %v3949_v26, %v3946_v2 }
 0xe38   :  { %5500 = vmatprep.subr.bf16.mxu1 %v5499_v41  ;;  %v4554_v41 = vld [vmem:[%s8681_s20 + $0x740] sm:$0xff] }
 0xe39   :  { %v5541_v7 = vpack.c.bf16 %v4556_v52, %v4554_v41  ;;  %v3955_v41 = vld [vmem:[%s8685_s24 + $0x48] sm:$0xff] }
 0xe3a   :  { %3559 = vmatmul.mubr.f32.vlgmr.msra.gmra.mrb[38].mxu1 %v7791_v20  ;;  %v4529_v20 = vld [vmem:[%s8681_s20 + $0x678] sm:$0xff]  ;;  %v3959_v52 = vld [vmem:[%s8685_s24 + $0x68] sm:$0xff] }
 0xe3b   :  { %5502 = vmatpush1.bf16.msra.mxu1 %v5501_v13  ;;  %3772 = vmatprep.mubr.f32.mxu1 %v7977_v54  ;;  %v5509_v54 = vpack.c.bf16 %v4524_v43, %v4522_v36  ;;  %v5511_v47 = vpack.c.bf16 %v4529_v20, %v4527_v29  ;;  %v5543_v13 = vpack.c.bf16 %v4561_v4, %v4559_v57  ;;  %v4564_v36 = vld [vmem:[%s8681_s20 + $0x790] sm:$0xff]  ;;  %v4567_v43 = vld [vmem:[%s8681_s20 + $0x7a8] sm:$0xff]  ;;  %v4569_v29 = vld [vmem:[%s8681_s20 + $0x7b8] sm:$0xff] }
 0xe3c   :  { %5504 = vmatprep.subr.bf16.mxu1 %v5503_v45  ;;  %v4558_v45 = vld [vmem:[%s8681_s20 + $0x760] sm:$0xff] }
 0xe3d   :  { %v5545_v16 = vpack.c.bf16 %v4560_v1, %v4558_v45  ;;  %v3962_v57 = vld [vmem:[%s8685_s24 + $0x80] sm:$0xff]  ;;  %v3961_v45 = vld [vmem:[%s8685_s24 + $0x78] sm:$0xff] }
 0xe3e   :  { %v3965_v1 = vld [vmem:[%s8685_s24 + $0x98] sm:$0xff] }
 0xe3f   :  { %5506 = vmatpush1.bf16.msra.mxu1 %v5505_v27  ;;  %v5547_v27 = vpack.c.bf16 %v4565_v15, %v4563_v14  ;;  %v3968_v14 = vld [vmem:[%s8685_s24 + $0xb0] sm:$0xff] }
 0xe40   :  { %5508 = vmatprep.subr.bf16.mxu1 %v5507_v33  ;;  %v4562_v33 = vld [vmem:[%s8681_s20 + $0x780] sm:$0xff] }
 0xe41   :  { %v5549_v20 = vpack.c.bf16 %v4564_v36, %v4562_v33  ;;  %v3967_v33 = vld [vmem:[%s8685_s24 + $0xa8] sm:$0xff] }
 0xe42   :  { %v3971_v36 = vld [vmem:[%s8685_s24 + $0xc8] sm:$0xff] }
 0xe43   :  { %5510 = vmatpush1.bf16.msra.mxu1 %v5509_v54  ;;  %v5551_v54 = vpack.c.bf16 %v4569_v29, %v4567_v43  ;;  %v3974_v43 = vld [vmem:[%s8685_s24 + $0xe0] sm:$0xff] }
 0xe44   :  { %5512 = vmatprep.subr.bf16.mxu1 %v5511_v47  ;;  %v4566_v47 = vld [vmem:[%s8681_s20 + $0x7a0] sm:$0xff] }
 0xe45   :  { %v5553_v58 = vpack.c.bf16 %v4568_v46, %v4566_v47  ;;  %v3973_v47 = vld [vmem:[%s8685_s24 + $0xd8] sm:$0xff] }
 0xe46   :  { %v3977_v46 = vld [vmem:[%s8685_s24 + $0xf8] sm:$0xff] }
 0xe47   :  { %5514 = vmatpush1.bf16.msra.mxu1 %v5513_v17  ;;  %v5555_v17 = vpack.c.bf16 %v4573_v53, %v4571_v49  ;;  %v3980_v49 = vld [vmem:[%s8685_s24 + $0x110] sm:$0xff] }
 0xe48   :  { %5516 = vmatprep.subr.bf16.mxu1 %v5515_v18  ;;  %v4570_v18 = vld [vmem:[%s8681_s20 + $0x7c0] sm:$0xff] }
 0xe49   :  { %v5557_v62 = vpack.c.bf16 %v4572_v5, %v4570_v18  ;;  %v3979_v18 = vld [vmem:[%s8685_s24 + $0x108] sm:$0xff] }
 0xe4a   :  { %v3983_v5 = vld [vmem:[%s8685_s24 + $0x128] sm:$0xff] }
 0xe4b   :  { %5518 = vmatpush1.bf16.msra.mxu1 %v5517_v23  ;;  %v5559_v23 = vpack.c.bf16 %v4577_v59, %v4575_v19  ;;  %v3986_v19 = vld [vmem:[%s8685_s24 + $0x140] sm:$0xff] }
 0xe4c   :  { %5520 = vmatprep.subr.bf16.mxu1 %v5519_v21  ;;  %v4574_v21 = vld [vmem:[%s8681_s20 + $0x7e0] sm:$0xff] }
 0xe4d   :  { %v5561_v61 = vpack.c.bf16 %v4576_v56, %v4574_v21  ;;  %v3985_v21 = vld [vmem:[%s8685_s24 + $0x138] sm:$0xff] }
 0xe4e   :  { %v3989_v56 = vld [vmem:[%s8685_s24 + $0x158] sm:$0xff] }
 0xe4f   :  { %5522 = vmatpush1.bf16.msra.mxu1 %v5521_v11  ;;  %v5621_v11 = vpack.c.bf16 %v3855_v9, %v3853_v24 }
 0xe50   :  { %5524 = vmatprep.subr.bf16.mxu1 %v5523_v60  ;;  %v3858_v60 = vld [vmem:[#allocation18 + $0x1e8] sm:$0xff] }
 0xe51   :  { %5622 = vmatpush1.bf16.msra.mxu0 %v5621_v11  ;;  %v5623_v63 = vpack.c.bf16 %v3860_v25, %v3858_v60  ;;  %v3988_v11 = vld [vmem:[%s8685_s24 + $0x150] sm:$0xff]  ;;  %v3991_v60 = vld [vmem:[%s8685_s24 + $0x168] sm:$0xff] }
 0xe52   :  { %v3995_v25 = vld [vmem:[%s8685_s24 + $0x188] sm:$0xff] }
 0xe53   :  { %5526 = vmatpush1.bf16.msra.mxu1 %v5525_v22  ;;  %v5625_v22 = vpack.c.bf16 %v3859_v10, %v3857_v0  ;;  %5624 = vmatprep.subr.bf16.mxu0 %v5623_v63  ;;  %v3998_v63 = vld [vmem:[%s8685_s24 + $0x1a0] sm:$0xff]  ;;  %v5657_v0 = vpack.c.bf16 %v3991_v60, %v3988_v11  ;;  %v3951_v11 = vld [vmem:[%s8685_s24 + $0x28] sm:$0xff] }
 0xe54   :  { %5528 = vmatprep.subr.bf16.mxu1 %v5527_v28  ;;  %v3947_v28 = vld [vmem:[%s8685_s24 + $0x8] sm:$0xff]  ;;  %v5659_v10 = vpack.c.bf16 %v3998_v63, %v3995_v25  ;;  %v4002_v25 = vld [vmem:[%s8685_s24 + $0x1c0] sm:$0xff]  ;;  %v4005_v63 = vld [vmem:[%s8685_s24 + $0x1d8] sm:$0xff] }
 0xe55   :  { %5626 = vmatpush1.bf16.msra.mxu0 %v5625_v22  ;;  %v3994_v22 = vld [vmem:[%s8685_s24 + $0x180] sm:$0xff] }
 0xe57   :  { %5530 = vmatpush1.bf16.msra.mxu1 %v5529_v44  ;;  %v3790_v44 = vrot.slane %v3781_v32, %v8360_v34 }
 0xe58   :  { %5532 = vmatprep.subr.bf16.mxu1 %v5531_v48 }
 0xe5b   :  { %5534 = vmatpush1.bf16.msra.mxu1 %v5533_v3 }
 0xe5c   :  { %5536 = vmatprep.subr.bf16.mxu1 %v5535_v38  ;;  %v3953_v38 = vld [vmem:[%s8685_s24 + $0x38] sm:$0xff] }
 0xe5f   :  { %5538 = vmatpush1.bf16.msra.mxu1 %v5537_v12  ;;  %v5631_v12 = vpack.c.bf16 %v3956_v37, %v3953_v38  ;;  %v4009_v38 = vld [vmem:[%s8685_s24 + $0x1f8] sm:$0xff] }
 0xe60   :  { %5540 = vmatprep.subr.bf16.mxu1 %v5539_v51  ;;  %v3952_v51 = vld [vmem:[%s8685_s24 + $0x30] sm:$0xff]  ;;  %v4013_v37 = vld [vmem:[%s8685_s24 + $0x218] sm:$0xff] }
 0xe61   :  { %v5633_v4 = vpack.c.bf16 %v3955_v41, %v3952_v51  ;;  %v4015_v51 = vld [vmem:[%s8685_s24 + $0x228] sm:$0xff] }
 0xe62   :  { %v4019_v41 = vld [vmem:[%s8685_s24 + $0x248] sm:$0xff] }
 0xe63   :  { %5542 = vmatpush1.bf16.msra.mxu1 %v5541_v7  ;;  %v5635_v7 = vpack.c.bf16 %v3962_v57, %v3959_v52  ;;  %v4022_v52 = vld [vmem:[%s8685_s24 + $0x260] sm:$0xff] }
 0xe64   :  { %5544 = vmatprep.subr.bf16.mxu1 %v5543_v13  ;;  %v3958_v13 = vld [vmem:[%s8685_s24 + $0x60] sm:$0xff] }
 0xe65   :  { %v5637_v15 = vpack.c.bf16 %v3961_v45, %v3958_v13  ;;  %v4021_v13 = vld [vmem:[%s8685_s24 + $0x258] sm:$0xff] }
 0xe66   :  { %v4025_v45 = vld [vmem:[%s8685_s24 + $0x278] sm:$0xff] }
 0xe67   :  { %5546 = vmatpush1.bf16.msra.mxu1 %v5545_v16  ;;  %v5639_v16 = vpack.c.bf16 %v3968_v14, %v3965_v1  ;;  %v4028_v1 = vld [vmem:[%s8685_s24 + $0x290] sm:$0xff] }
 0xe68   :  { %5548 = vmatprep.subr.bf16.mxu1 %v5547_v27  ;;  %v3964_v27 = vld [vmem:[%s8685_s24 + $0x90] sm:$0xff] }
 0xe69   :  { %v5641_v29 = vpack.c.bf16 %v3967_v33, %v3964_v27  ;;  %v4027_v27 = vld [vmem:[%s8685_s24 + $0x288] sm:$0xff] }
 0xe6a   :  { %v4031_v33 = vld [vmem:[%s8685_s24 + $0x2a8] sm:$0xff] }
 0xe6b   :  { %5550 = vmatpush1.bf16.msra.mxu1 %v5549_v20  ;;  %v5643_v20 = vpack.c.bf16 %v3974_v43, %v3971_v36  ;;  %v4034_v36 = vld [vmem:[%s8685_s24 + $0x2c0] sm:$0xff] }
 0xe6c   :  { %5552 = vmatprep.subr.bf16.mxu1 %v5551_v54  ;;  %v3970_v54 = vld [vmem:[%s8685_s24 + $0xc0] sm:$0xff] }
 0xe6d   :  { %v5645_v53 = vpack.c.bf16 %v3973_v47, %v3970_v54  ;;  %v4033_v54 = vld [vmem:[%s8685_s24 + $0x2b8] sm:$0xff] }
 0xe6f   :  { %5554 = vmatpush1.bf16.msra.mxu1 %v5553_v58  ;;  %v5647_v58 = vpack.c.bf16 %v3980_v49, %v3977_v46  ;;  %v4037_v46 = vld [vmem:[%s8685_s24 + $0x2d8] sm:$0xff]  ;;  %v4040_v49 = vld [vmem:[%s8685_s24 + $0x2f0] sm:$0xff] }
 0xe70   :  { %5556 = vmatprep.subr.bf16.mxu1 %v5555_v17  ;;  %v3976_v17 = vld [vmem:[%s8685_s24 + $0xf0] sm:$0xff] }
 0xe71   :  { %v5649_v59 = vpack.c.bf16 %v3979_v18, %v3976_v17  ;;  %v4039_v17 = vld [vmem:[%s8685_s24 + $0x2e8] sm:$0xff] }
 0xe73   :  { %5558 = vmatpush1.bf16.msra.mxu1 %v5557_v62  ;;  %v5651_v62 = vpack.c.bf16 %v3986_v19, %v3983_v5  ;;  %v3996_v5 = vld [vmem:[%s8685_s24 + $0x190] sm:$0xff]  ;;  %v3999_v19 = vld [vmem:[%s8685_s24 + $0x1a8] sm:$0xff] }
 0xe74   :  { %5560 = vmatprep.subr.bf16.mxu1 %v5559_v23  ;;  %v3982_v23 = vld [vmem:[%s8685_s24 + $0x120] sm:$0xff] }
 0xe75   :  { %v5653_v24 = vpack.c.bf16 %v3985_v21, %v3982_v23 }
 0xe77   :  { %5562 = vmatpush1.bf16.msra.mxu1 %v5561_v61  ;;  %v3992_v61 = vld [vmem:[%s8685_s24 + $0x170] sm:$0xff] }
 0xe78   :  { %v5655_v9 = vpack.c.bf16 %v3992_v61, %v3989_v56 }
 0xe7a   :  { %3773 = vmatmul.mubr.f32.vlgmr.msra.gmra.mrb[38].mxu1 %v7969_v42  ;;  %v3950_v42 = vld [vmem:[%s8685_s24 + $0x20] sm:$0xff] }
 0xe7b   :  { %v5627_v31 = vpack.c.bf16 %v3950_v42, %v3947_v28  ;;  %v3997_v28 = vld [vmem:[%s8685_s24 + $0x198] sm:$0xff] }
 0xe7c   :  { %v4001_v42 = vld [vmem:[%s8685_s24 + $0x1b8] sm:$0xff]  ;;  %v5661_v32 = vpack.c.bf16 %v3997_v28, %v3994_v22  ;;  %v5695_v28 = vpack.c.bf16 %v4005_v63, %v4002_v25 }
 0xe7d   :  { %5628 = vmatprep.subr.bf16.mxu0 %v5627_v31  ;;  %v4004_v31 = vld [vmem:[%s8685_s24 + $0x1d0] sm:$0xff] }
 0xf4d   :  { %v3774_v48 = vpop.f32.mrb[38].mxu1 }
 0xf4e   :  { %v3793_v50 = vadd.f32 %v3786_v35, %v3774_v48  ;;  %v3776_v55 = vpop.f32.mrb[39].mxu1  ;;  %v5663_v35 = vpack.c.bf16 %v4004_v31, %v4001_v42  ;;  %v4003_v48 = vld [vmem:[%s8685_s24 + $0x1c8] sm:$0xff]  ;;  %v3954_v42 = vld [vmem:[%s8685_s24 + $0x40] sm:$0xff]  ;;  %v3957_v31 = vld [vmem:[%s8685_s24 + $0x58] sm:$0xff] }
 0xf4f   :  { %v3794_v3 = vadd.f32 %v3790_v44, %v3776_v55  ;;  %v4000_v44 = vld [vmem:[%s8685_s24 + $0x1b0] sm:$0xff]  ;;  %v4010_v55 = vld [vmem:[%s8685_s24 + $0x200] sm:$0xff] }
 0xf50   :  { %v3795_v8 = vmax.f32 %v3793_v50, 0.0  ;;  %v4007_v50 = vld [vmem:[%s8685_s24 + $0x1e8] sm:$0xff]  ;;  %v5665_v2 = vpack.c.bf16 %v4003_v48, %v4000_v44  ;;  %v5697_v44 = vpack.c.bf16 %v3957_v31, %v3954_v42 }
 0xf51   :  { %v3796_v6 = vmax.f32 %v3794_v3, 0.0  ;;  %v5667_v26 = vpack.c.bf16 %v4010_v55, %v4007_v50  ;;  %v4006_v3 = vld [vmem:[%s8685_s24 + $0x1e0] sm:$0xff]  ;;  %v3960_v50 = vld [vmem:[%s8685_s24 + $0x70] sm:$0xff]  ;;  %v3963_v55 = vld [vmem:[%s8685_s24 + $0x88] sm:$0xff] }
 0xf53   :  { %3937 = vmatprep.mubr.f32.mxu0 %v3796_v6  ;;  %v4016_v6 = vld [vmem:[%s8685_s24 + $0x230] sm:$0xff] }
 0xf54   :  { %3938 = vmatmul.mubr.f32.vlgmr.msra.gmra.mrb[36].mxu0 %v3795_v8  ;;  %v5671_v8 = vpack.c.bf16 %v4016_v6, %v4013_v37  ;;  %v3966_v37 = vld [vmem:[%s8685_s24 + $0xa0] sm:$0xff]  ;;  %v3969_v6 = vld [vmem:[%s8685_s24 + $0xb8] sm:$0xff] }
 0xf55   :  { %5630 = vmatpush1.bf16.msra.mxu0 %v5629_v30  ;;  %v5669_v30 = vpack.c.bf16 %v4009_v38, %v4006_v3  ;;  %v5701_v3 = vpack.c.bf16 %v3963_v55, %v3960_v50 }
 0xf56   :  { %5632 = vmatprep.subr.bf16.mxu0 %v5631_v12  ;;  %v4012_v12 = vld [vmem:[%s8685_s24 + $0x210] sm:$0xff] }
 0xf57   :  { %v5673_v57 = vpack.c.bf16 %v4015_v51, %v4012_v12  ;;  %v5705_v12 = vpack.c.bf16 %v3969_v6, %v3966_v37 }
 0xf59   :  { %5634 = vmatpush1.bf16.msra.mxu0 %v5633_v4  ;;  %v5675_v4 = vpack.c.bf16 %v4022_v52, %v4019_v41  ;;  %v3972_v41 = vld [vmem:[%s8685_s24 + $0xd0] sm:$0xff]  ;;  %v3975_v52 = vld [vmem:[%s8685_s24 + $0xe8] sm:$0xff] }
 0xf5a   :  { %5636 = vmatprep.subr.bf16.mxu0 %v5635_v7  ;;  %v4018_v7 = vld [vmem:[%s8685_s24 + $0x240] sm:$0xff] }
 0xf5b   :  { %v5677_v14 = vpack.c.bf16 %v4021_v13, %v4018_v7  ;;  %v5709_v7 = vpack.c.bf16 %v3975_v52, %v3972_v41 }
 0xf5d   :  { %5638 = vmatpush1.bf16.msra.mxu0 %v5637_v15  ;;  %v5679_v15 = vpack.c.bf16 %v4028_v1, %v4025_v45  ;;  %v3978_v45 = vld [vmem:[%s8685_s24 + $0x100] sm:$0xff]  ;;  %v3981_v1 = vld [vmem:[%s8685_s24 + $0x118] sm:$0xff] }
 0xf5e   :  { %5640 = vmatprep.subr.bf16.mxu0 %v5639_v16  ;;  %v4024_v16 = vld [vmem:[%s8685_s24 + $0x270] sm:$0xff] }
 0xf5f   :  { %v5681_v43 = vpack.c.bf16 %v4027_v27, %v4024_v16  ;;  %v5713_v16 = vpack.c.bf16 %v3981_v1, %v3978_v45 }
 0xf61   :  { %5642 = vmatpush1.bf16.msra.mxu0 %v5641_v29  ;;  %v5683_v29 = vpack.c.bf16 %v4034_v36, %v4031_v33  ;;  %v3984_v33 = vld [vmem:[%s8685_s24 + $0x130] sm:$0xff]  ;;  %v3987_v36 = vld [vmem:[%s8685_s24 + $0x148] sm:$0xff] }
 0xf62   :  { %5644 = vmatprep.subr.bf16.mxu0 %v5643_v20  ;;  %v4030_v20 = vld [vmem:[%s8685_s24 + $0x2a0] sm:$0xff] }
 0xf63   :  { %v5685_v47 = vpack.c.bf16 %v4033_v54, %v4030_v20  ;;  %v5717_v20 = vpack.c.bf16 %v3987_v36, %v3984_v33 }
 0xf65   :  { %5646 = vmatpush1.bf16.msra.mxu0 %v5645_v53  ;;  %v5687_v53 = vpack.c.bf16 %v4040_v49, %v4037_v46  ;;  %v3993_v46 = vld [vmem:[%s8685_s24 + $0x178] sm:$0xff] }
 0xf66   :  { %5648 = vmatprep.subr.bf16.mxu0 %v5647_v58  ;;  %v4036_v58 = vld [vmem:[%s8685_s24 + $0x2d0] sm:$0xff] }
 0xf67   :  { %v5689_v18 = vpack.c.bf16 %v4039_v17, %v4036_v58 }
 0xf69   :  { %5650 = vmatpush1.bf16.msra.mxu0 %v5649_v59  ;;  %v5691_v59 = vpack.c.bf16 %v3999_v19, %v3996_v5 }
 0xf6a   :  { %5652 = vmatprep.subr.bf16.mxu0 %v5651_v62  ;;  %v3861_v62 = vld [vmem:[#allocation19] sm:$0x3] }
 0xf6b   :  { %v3866_v23 = vrot.slane %v3861_v62, %v6788_v40  ;;  %v3870_v21 = vrot.slane %v3861_v62, %v8360_v34 }
 0xf6d   :  { %5654 = vmatpush1.bf16.msra.mxu0 %v5653_v24 }
 0xf6e   :  { %5656 = vmatprep.subr.bf16.mxu0 %v5655_v9  ;;  %v3948_v9 = vld [vmem:[%s8685_s24 + $0x10] sm:$0xff] }
 0xf71   :  { %5658 = vmatpush1.bf16.msra.mxu0 %v5657_v0 }
 0xf72   :  { %5660 = vmatprep.subr.bf16.mxu0 %v5659_v10  ;;  %v5693_v10 = vpack.c.bf16 %v3951_v11, %v3948_v9 }
 0xf75   :  { %5662 = vmatpush1.bf16.msra.mxu0 %v5661_v32  ;;  %v4008_v32 = vld [vmem:[%s8685_s24 + $0x1f0] sm:$0xff] }
 0xf76   :  { %5664 = vmatprep.subr.bf16.mxu0 %v5663_v35  ;;  %v4011_v35 = vld [vmem:[%s8685_s24 + $0x208] sm:$0xff] }
 0xf77   :  { %v5699_v48 = vpack.c.bf16 %v4011_v35, %v4008_v32 }
 0xf79   :  { %5666 = vmatpush1.bf16.msra.mxu0 %v5665_v2  ;;  %v4014_v2 = vld [vmem:[%s8685_s24 + $0x220] sm:$0xff] }
 0xf7a   :  { %5668 = vmatprep.subr.bf16.mxu0 %v5667_v26  ;;  %v4017_v26 = vld [vmem:[%s8685_s24 + $0x238] sm:$0xff] }
 0xf7b   :  { %v5703_v38 = vpack.c.bf16 %v4017_v26, %v4014_v2 }
 0xf7d   :  { %5670 = vmatpush1.bf16.msra.mxu0 %v5669_v30  ;;  %v4020_v30 = vld [vmem:[%s8685_s24 + $0x250] sm:$0xff] }
 0xf7e   :  { %5672 = vmatprep.subr.bf16.mxu0 %v5671_v8  ;;  %v4023_v8 = vld [vmem:[%s8685_s24 + $0x268] sm:$0xff] }
 0xf7f   :  { %v5707_v51 = vpack.c.bf16 %v4023_v8, %v4020_v30 }
 0xf81   :  { %5674 = vmatpush1.bf16.msra.mxu0 %v5673_v57  ;;  %v4026_v57 = vld [vmem:[%s8685_s24 + $0x280] sm:$0xff] }
 0xf82   :  { %5676 = vmatprep.subr.bf16.mxu0 %v5675_v4  ;;  %v4029_v4 = vld [vmem:[%s8685_s24 + $0x298] sm:$0xff] }
 0xf83   :  { %v5711_v13 = vpack.c.bf16 %v4029_v4, %v4026_v57 }
 0xf85   :  { %5678 = vmatpush1.bf16.msra.mxu0 %v5677_v14  ;;  %v4032_v14 = vld [vmem:[%s8685_s24 + $0x2b0] sm:$0xff] }
 0xf86   :  { %5680 = vmatprep.subr.bf16.mxu0 %v5679_v15  ;;  %v4035_v15 = vld [vmem:[%s8685_s24 + $0x2c8] sm:$0xff] }
 0xf87   :  { %v5715_v27 = vpack.c.bf16 %v4035_v15, %v4032_v14 }
 0xf89   :  { %5682 = vmatpush1.bf16.msra.mxu0 %v5681_v43  ;;  %v4038_v43 = vld [vmem:[%s8685_s24 + $0x2e0] sm:$0xff] }
 0xf8a   :  { %5684 = vmatprep.subr.bf16.mxu0 %v5683_v29  ;;  %v4041_v29 = vld [vmem:[%s8685_s24 + $0x2f8] sm:$0xff] }
 0xf8b   :  { %v5719_v54 = vpack.c.bf16 %v4041_v29, %v4038_v43 }
 0xf8d   :  { %5686 = vmatpush1.bf16.msra.mxu0 %v5685_v47  ;;  %v3990_v47 = vld [vmem:[%s8685_s24 + $0x160] sm:$0xff] }
 0xf8e   :  { %5688 = vmatprep.subr.bf16.mxu0 %v5687_v53  ;;  %v5721_v49 = vpack.c.bf16 %v3993_v46, %v3990_v47  ;;  %v4042_v53 = vld [vmem:[%s8724_s5] sm:$0x7] }
 0xf8f   :  { %v4047_v58 = vrot.slane %v4042_v53, %v6788_v40  ;;  %v4051_v17 = vrot.slane %v4042_v53, %v8360_v34 }
 0xf91   :  { %5690 = vmatpush1.bf16.msra.mxu0 %v5689_v18 }
 0xf92   :  { %5692 = vmatprep.subr.bf16.mxu0 %v5691_v59 }
0x1027   :  { %v3939_v56 = vpop.f32.mrb[36].mxu0 }
0x1028   :  { %v8558_v61 = vadd.f32 %v3939_v56, %v3866_v23  ;;  %v3941_v24 = vpop.f32.mrb[37].mxu0  ;;  %v6072_v56 = vmov 1983009808  }
0x1029   :  { %v3942_v60 = vadd.f32 %v3941_v24, %v3870_v21  ;;  %v4054_v24 = vsub.s32 2, %v6785_v39 }
0x102a   :  { %v3944_v22 = vmax.f32 %v8558_v61, 0.0  ;;  %v4208_v61 = vunpack.c.l.s4 %v6072_v56 }
0x102b   :  { %v3945_v0 = vmax.f32 %v3942_v60, 0.0  ;;  %v4055_v60 = vrot.slane %v4042_v53, %v4054_v24 }
0x102c   :  { %v4209_v9 = vunpack.c.0.s8 %v4208_v61 }
0x102d   :  { %4123 = vmatprep.mubr.f32.mxu0 %v3945_v0 }
0x102e   :  { %4124 = vmatmul.mubr.f32.vlgmr.msra.gmra.mrb[38].mxu0 %v3944_v22  ;;  %v4212_v40 = vsub.s32 %v4209_v9, %v6785_v39 }
0x102f   :  { %5694 = vmatpush3.bf16.msra.mxu0 %v5693_v10  ;;  %4194 = vmatprep.mubr.f32.mxu0 %v3945_v0 }
0x1030   :  { %5696 = vmatprep.subr.bf16.mxu0 %v5695_v28 }
0x1033   :  { %5698 = vmatpush3.bf16.msra.mxu0 %v5697_v44 }
0x1034   :  { %5700 = vmatprep.subr.bf16.mxu0 %v5699_v48 }
0x1037   :  { %5702 = vmatpush3.bf16.msra.mxu0 %v5701_v3 }
0x1038   :  { %5704 = vmatprep.subr.bf16.mxu0 %v5703_v38 }
0x103b   :  { %5706 = vmatpush3.bf16.msra.mxu0 %v5705_v12 }
0x103c   :  { %5708 = vmatprep.subr.bf16.mxu0 %v5707_v51 }
0x103f   :  { %5710 = vmatpush3.bf16.msra.mxu0 %v5709_v7 }
0x1040   :  { %5712 = vmatprep.subr.bf16.mxu0 %v5711_v13 }
0x1043   :  { %5714 = vmatpush3.bf16.msra.mxu0 %v5713_v16 }
0x1044   :  { %5716 = vmatprep.subr.bf16.mxu0 %v5715_v27 }
0x1047   :  { %5718 = vmatpush3.bf16.msra.mxu0 %v5717_v20 }
0x1048   :  { %5720 = vmatprep.subr.bf16.mxu0 %v5719_v54 }
0x104b   :  { %5722 = vmatpush3.bf16.msra.mxu0 %v5721_v49 }
0x104e   :  { %4195 = vmatmul.mubr.f32.vlgmr.msra.gmra.mrb[40].mxu0 %v3944_v22 }
0x1101   :  { %v4125_v18 = vpop.f32.mrb[38].mxu0 }
0x1102   :  { %v4126_v5 = vadd.f32 %v4125_v18, %v4047_v58  ;;  %v4127_v19 = vpop.f32.mrb[39].mxu0 }
0x1103   :  { %v4128_v59 = vadd.f32 %v4127_v19, %v4051_v17 }
0x1104   :  { %v4200_v62 = vmax.f32 %v4126_v5, 0.0 }
0x1105   :  { %v4201_v23 = vmax.f32 %v4128_v59, 0.0 }
0x1107   :  { %v4206_v21 = vcombine.low %v4200_v62, %v4201_v23 }
0x1109   :  { %v4213_v10 = vrot.slane %v4206_v21, %v4212_v40 }
0x1121   :  { %v4698_v11 = vpop.f32.mrb[40].mxu0 }
0x1122   :  { %v4699_v25 = vpop.f32.mrb[41].mxu0 }
0x1123   :  { %v4700_v63 = vadd.f32 %v4699_v25, %v4698_v11 }
0x1125   :  { %v4197_v34 = vadd.f32 %v4700_v63, %v4055_v60 }
0x1127   :  { %v4202_v0 = vmax.f32 %v4197_v34, 0.0 }
0x1129   :  { %v4220_v22 = vrot.slane %v4202_v0, %v4212_v40 }
0x112b   :  { %v4221_v28 = vcombine.low %v4213_v10, %v4220_v22 }
0x112d   :  { %4228 = vst.msk [vmem:[%s8725_s10] sm:$0x3f] %vm4227_vm1, %v4221_v28 }
0x112e   :  { %4233 = vsyncpa [#allocation3], 1 }
0x112f   :  { %4234 = vsyncpa [#allocation5], 1 }
0x1130   :  { %4235 = vsyncpa [#allocation8], 1 }
0x1131   :  { %4236 = vsyncpa [#allocation11], 1 }
0x1132   :  { %4237 = vsyncpa [#allocation14], 1 }
0x1133   :  { %4238 = vsyncpa [#allocation17], 1 }
0x1134   :  { %4239 = vsyncpa [#allocation20], 1 }

</bundles_post_ra>
